<compile_context>
chip_gen: v7x
topology: tpu7x:2x2x1
jax: 0.10.0
libtpu: 0.0.40
codegen_flags: <defaults>
</compile_context>

<pallas_src>
import jax
import jax.numpy as jnp
from jax.experimental import pallas as pl
from jax.experimental.pallas import tpu as pltpu


PAD = 128  # xyz head padded to one full lane group INSIDE the fused conv3 matmul only


# ----------------------------------------------------------------------------
# Pallas kernel: VotingModule + vote_xyz add + L2-normalize vote features
# ----------------------------------------------------------------------------
def voting_kernel(feat_ref, xyz_ref,
                  w1_ref, b1_ref, w2_ref, b2_ref, w3_ref, b3_ref,
                  vote_xyz_ref, vote_feat_ref):
    x_bf = feat_ref[...]                           # (TN, C) bf16 seed features
    x_f32 = x_bf.astype(jnp.float32)               # f32 copy for the residual add

    # conv1 + bn1 + relu   (BN folded into w1/b1; bf16 MXU, f32 accumulate)
    h = jnp.dot(x_bf, w1_ref[...], preferred_element_type=jnp.float32) + b1_ref[...]
    h = jnp.maximum(h, 0.0)

    # conv2 + bn2 + relu   (BN folded into w2/b2)
    h = jnp.dot(h.astype(jnp.bfloat16), w2_ref[...],
                preferred_element_type=jnp.float32) + b2_ref[...]
    h = jnp.maximum(h, 0.0)

    # conv3: fused xyz-offset head (padded to 128 lanes) + feature-residual head
    y = jnp.dot(h.astype(jnp.bfloat16), w3_ref[...],
                preferred_element_type=jnp.float32) + b3_ref[...]   # (TN, 128+C)

    # vote_xyz = seed_xyz + offset, written directly (no padded slab to HBM)
    vote_xyz_ref[...] = xyz_ref[...] + y[:, :3]

    # vote_features = seed_features + residual, then L2-normalize over channels
    # (no epsilon, matching PyTorch features.div(norm) semantics)
    vf = x_f32 + y[:, PAD:]                        # (TN, C) f32
    ss = jnp.sum(vf * vf, axis=-1, keepdims=True)
    vote_feat_ref[...] = (vf * jax.lax.rsqrt(ss)).astype(vote_feat_ref.dtype)


def _num_tensorcores_per_chip():
    """Heuristic: 2 TCs per chip on megacore / v7x parts, else 1."""
    try:
        kind = jax.devices()[0].device_kind.lower()
    except Exception:
        return 1
    return 2 if any(t in kind for t in ("v7", "7x", "v4", "v5p")) else 1


def vote_and_normalize(seed_xyz, seed_feat, params, *, tn=None,
                       feat_out_dtype=jnp.float32):
    """seed_xyz: (B, N, 3) f32, seed_feat: (B, N, C) (cast to bf16 at the boundary).

    Returns (vote_xyz (B,N,3) f32, vote_features (B,N,C) feat_out_dtype).
    """
    B, N, C = seed_feat.shape
    M = B * N
    assert M % 8 == 0

    # bf16 at the boundary (kernel used bf16 operands for the MXU already).
    # In the full CapNet the backbone should emit bf16 features directly.
    seed_feat = seed_feat.astype(jnp.bfloat16)
    feat2 = seed_feat.reshape(M, C)                # channels-last -> free view
    xyz2 = seed_xyz.reshape(M, 3)

    # Tile choice: ~2 grid steps per TensorCore (serial loop per TC, ~0.35us/step
    # overhead; >=2 steps keeps next-tile DMA overlapped with compute).
    if tn is None:
        target_steps = 2 * _num_tensorcores_per_chip()
        tn = min(512, max(8, M // target_steps))
        tn = (tn // 8) * 8
        while tn > 8 and M % tn != 0:
            tn -= 8
    assert M % tn == 0 and tn % 8 == 0
    grid = (M // tn,)

    w1, b1, w2, b2, w3, b3 = params
    rep = lambda shape: pl.BlockSpec(shape, lambda i: (0,) * len(shape))

    weight_bytes = 2 * (w1.size + w2.size + w3.size) + 4 * (b1.size + b2.size + b3.size)
    out_item = jnp.dtype(feat_out_dtype).itemsize
    cost = pl.CostEstimate(
        flops=2 * M * (2 * C * C + C * (PAD + C)),
        transcendentals=M,
        bytes_accessed=(2 * M * C              # bf16 seed-feature read
                        + out_item * M * C     # vote-feature write
                        + 4 * M * 3 * 2        # seed_xyz read + vote_xyz write
                        + weight_bytes),
    )

    vote_xyz2, vote_feat2 = pl.pallas_call(
        voting_kernel,
        out_shape=(jax.ShapeDtypeStruct((M, 3), jnp.float32),
                   jax.ShapeDtypeStruct((M, C), feat_out_dtype)),
        grid_spec=pltpu.PrefetchScalarGridSpec(
            num_scalar_prefetch=0,
            grid=grid,
            in_specs=[
                pl.BlockSpec((tn, C), lambda i: (i, 0)),   # seed feature tile (bf16)
                pl.BlockSpec((tn, 3), lambda i: (i, 0)),   # seed xyz tile (f32)
                rep((C, C)), rep((1, C)),                  # conv1 (BN folded, bf16 W)
                rep((C, C)), rep((1, C)),                  # conv2 (BN folded, bf16 W)
                rep((C, PAD + C)), rep((1, PAD + C)),      # conv3 fused head
            ],
            out_specs=[
                pl.BlockSpec((tn, 3), lambda i: (i, 0)),   # vote_xyz
                pl.BlockSpec((tn, C), lambda i: (i, 0)),   # vote_features
            ],
        ),
        compiler_params=pltpu.CompilerParams(
            dimension_semantics=("parallel",)),
        cost_estimate=cost,
    )(feat2, xyz2, w1, b1, w2, b2, w3, b3)

    return vote_xyz2.reshape(B, N, 3), vote_feat2.reshape(B, N, C)


# ----------------------------------------------------------------------------
# Deterministic parameter construction (VotingModule(vote_factor=1, dim=256))
# ----------------------------------------------------------------------------
def make_params(key, C=256, eps=1e-5):
    ks = jax.random.split(key, 12)
    scale = 0.05
    # PyTorch Conv1d weights are (C_out, C_in, 1); we store transposed (C_in, C_out).
    w1 = jax.random.normal(ks[0], (C, C), jnp.float32) * scale
    b1 = jax.random.normal(ks[1], (C,), jnp.float32) * scale
    w2 = jax.random.normal(ks[2], (C, C), jnp.float32) * scale
    b2 = jax.random.normal(ks[3], (C,), jnp.float32) * scale
    w3 = jax.random.normal(ks[4], (C, 3 + C), jnp.float32) * scale   # conv3: C -> 3+C
    b3 = jax.random.normal(ks[5], (3 + C,), jnp.float32) * scale
    # BatchNorm1d (inference) params
    g1 = 1.0 + 0.1 * jax.random.normal(ks[6], (C,), jnp.float32)
    be1 = 0.1 * jax.random.normal(ks[7], (C,), jnp.float32)
    m1 = 0.1 * jax.random.normal(ks[8], (C,), jnp.float32)
    v1 = jnp.abs(jax.random.normal(ks[9], (C,), jnp.float32)) + 0.5
    g2 = 1.0 + 0.1 * jax.random.normal(ks[10], (C,), jnp.float32)
    be2 = 0.1 * jax.random.normal(ks[11], (C,), jnp.float32)
    m2 = jnp.zeros((C,), jnp.float32)
    v2 = jnp.ones((C,), jnp.float32)

    # Fold BN into conv:  y = s*(xW + b) + t  ->  W' = W*s, b' = b*s + t
    s1 = g1 / jnp.sqrt(v1 + eps); t1 = be1 - m1 * s1
    s2 = g2 / jnp.sqrt(v2 + eps); t2 = be2 - m2 * s2
    w1f = w1 * s1[None, :]; b1f = b1 * s1 + t1
    w2f = w2 * s2[None, :]; b2f = b2 * s2 + t2

    # Fuse conv3 heads: xyz head (C,3) zero-padded to (C,128), then feature head (C,C).
    w3x = jnp.pad(w3[:, :3], ((0, 0), (0, PAD - 3)))
    b3x = jnp.pad(b3[:3], (0, PAD - 3))
    w3_fused = jnp.concatenate([w3x, w3[:, 3:]], axis=1)        # (C, 128+C)
    b3_fused = jnp.concatenate([b3x, b3[3:]], axis=0)           # (128+C,)

    # Matmul weights in bf16 (MXU-native), biases stay f32 (added post-accumulate).
    return (w1f.astype(jnp.bfloat16), b1f[None, :],
            w2f.astype(jnp.bfloat16), b2f[None, :],
            w3_fused.astype(jnp.bfloat16), b3_fused[None, :])


def reference_jax(seed_xyz, seed_feat, params):
    """Pure-JAX reference mirroring the kernel's bf16-boundary / f32-accumulate math."""
    w1, b1, w2, b2, w3, b3 = params
    x = seed_feat.astype(jnp.bfloat16)
    xf = x.astype(jnp.float32)
    h = jnp.maximum(jnp.dot(x, w1, preferred_element_type=jnp.float32) + b1, 0.0)
    h = jnp.maximum(jnp.dot(h.astype(jnp.bfloat16), w2,
                            preferred_element_type=jnp.float32) + b2, 0.0)
    y = jnp.dot(h.astype(jnp.bfloat16), w3, preferred_element_type=jnp.float32) + b3
    offset = y[..., :3]
    resid = y[..., PAD:]
    vf = xf + resid
    vf = vf / jnp.linalg.norm(vf, axis=-1, keepdims=True)
    return seed_xyz + offset, vf


if __name__ == "__main__":
    B, N, C = 2, 512, 256          # batch, num_seed (small), feature dim (=256 in CapNet)
    key = jax.random.PRNGKey(0)
    k_xyz, k_feat, k_param = jax.random.split(key, 3)

    seed_xyz = jax.random.normal(k_xyz, (B, N, 3), jnp.float32)
    # bf16 at the boundary (the backbone would feed bf16 features in production)
    seed_feat = jax.random.normal(k_feat, (B, N, C), jnp.float32).astype(jnp.bfloat16)
    params = make_params(k_param, C)

    vote_xyz, vote_feat = vote_and_normalize(seed_xyz, seed_feat, params)
    jax.block_until_ready((vote_xyz, vote_feat))

    ref_xyz, ref_feat = reference_jax(seed_xyz, seed_feat, params)
    assert jnp.allclose(vote_xyz, ref_xyz, atol=2e-3, rtol=2e-3)
    assert jnp.allclose(vote_feat, ref_feat.astype(vote_feat.dtype), atol=2e-3, rtol=2e-3)

    print("KERNEL_OK")
</pallas_src>

<mosaic_0001>
module attributes {stable_mosaic.version = 11 : i64} {
  func.func @voting_kernel(%arg0: i32, %arg1: memref<512x256xbf16, #tpu.memory_space<vmem>>, %arg2: memref<512x3xf32, #tpu.memory_space<vmem>>, %arg3: memref<256x256xbf16, #tpu.memory_space<vmem>>, %arg4: memref<1x256xf32, #tpu.memory_space<vmem>>, %arg5: memref<256x256xbf16, #tpu.memory_space<vmem>>, %arg6: memref<1x256xf32, #tpu.memory_space<vmem>>, %arg7: memref<256x384xbf16, #tpu.memory_space<vmem>>, %arg8: memref<1x384xf32, #tpu.memory_space<vmem>>, %arg9: memref<512x3xf32, #tpu.memory_space<vmem>>, %arg10: memref<512x256xf32, #tpu.memory_space<vmem>>) attributes {dimension_semantics = [#tpu.dimension_semantics<parallel>], iteration_bounds = array<i64: 2>, scalar_prefetch = 0 : i64, scratch_operands = 0 : i64, tpu.core_type = #tpu.core_type<tc>, window_params = [{transform_indices = @transform_0, window_bounds = array<i64: 512, 256>}, {transform_indices = @transform_1, window_bounds = array<i64: 512, 3>}, {pipeline_mode = #tpu.pipeline_mode<synchronous>, transform_indices = @transform_2, window_bounds = array<i64: 256, 256>}, {pipeline_mode = #tpu.pipeline_mode<synchronous>, transform_indices = @transform_3, window_bounds = array<i64: 1, 256>}, {pipeline_mode = #tpu.pipeline_mode<synchronous>, transform_indices = @transform_4, window_bounds = array<i64: 256, 256>}, {pipeline_mode = #tpu.pipeline_mode<synchronous>, transform_indices = @transform_5, window_bounds = array<i64: 1, 256>}, {pipeline_mode = #tpu.pipeline_mode<synchronous>, transform_indices = @transform_6, window_bounds = array<i64: 256, 384>}, {pipeline_mode = #tpu.pipeline_mode<synchronous>, transform_indices = @transform_7, window_bounds = array<i64: 1, 384>}, {transform_indices = @transform_8, window_bounds = array<i64: 512, 3>}, {transform_indices = @transform_9, window_bounds = array<i64: 512, 256>}]} {
    %c0 = arith.constant 0 : index
    %c0_0 = arith.constant 0 : index
    %0 = vector.load %arg1[%c0, %c0_0] : memref<512x256xbf16, #tpu.memory_space<vmem>>, vector<512x256xbf16>
    %1 = arith.extf %0 : vector<512x256xbf16> to vector<512x256xf32>
    %c0_1 = arith.constant 0 : index
    %c0_2 = arith.constant 0 : index
    %2 = vector.load %arg3[%c0_1, %c0_2] : memref<256x256xbf16, #tpu.memory_space<vmem>>, vector<256x256xbf16>
    %cst = arith.constant dense<0.000000e+00> : vector<512x256xf32>
    %3 = tpu.matmul %0, %2, %cst {dimension_numbers = #tpu.dot_dimension_numbers<[1], [0], [0], [1], [0, 0, 1, 1], [], []>} : vector<512x256xbf16>, vector<256x256xbf16>, vector<512x256xf32> -> vector<512x256xf32>
    %c0_3 = arith.constant 0 : index
    %c0_4 = arith.constant 0 : index
    %4 = vector.load %arg4[%c0_3, %c0_4] : memref<1x256xf32, #tpu.memory_space<vmem>>, vector<1x256xf32>
    %5 = vector.broadcast %4 : vector<1x256xf32> to vector<512x256xf32>
    %6 = arith.addf %3, %5 : vector<512x256xf32>
    %cst_5 = arith.constant 0.000000e+00 : f32
    %7 = vector.broadcast %cst_5 : f32 to vector<512x256xf32>
    %8 = arith.maximumf %6, %7 : vector<512x256xf32>
    %9 = arith.truncf %8 : vector<512x256xf32> to vector<512x256xbf16>
    %c0_6 = arith.constant 0 : index
    %c0_7 = arith.constant 0 : index
    %10 = vector.load %arg5[%c0_6, %c0_7] : memref<256x256xbf16, #tpu.memory_space<vmem>>, vector<256x256xbf16>
    %cst_8 = arith.constant dense<0.000000e+00> : vector<512x256xf32>
    %11 = tpu.matmul %9, %10, %cst_8 {dimension_numbers = #tpu.dot_dimension_numbers<[1], [0], [0], [1], [0, 0, 1, 1], [], []>} : vector<512x256xbf16>, vector<256x256xbf16>, vector<512x256xf32> -> vector<512x256xf32>
    %c0_9 = arith.constant 0 : index
    %c0_10 = arith.constant 0 : index
    %12 = vector.load %arg6[%c0_9, %c0_10] : memref<1x256xf32, #tpu.memory_space<vmem>>, vector<1x256xf32>
    %13 = vector.broadcast %12 : vector<1x256xf32> to vector<512x256xf32>
    %14 = arith.addf %11, %13 : vector<512x256xf32>
    %cst_11 = arith.constant 0.000000e+00 : f32
    %15 = vector.broadcast %cst_11 : f32 to vector<512x256xf32>
    %16 = arith.maximumf %14, %15 : vector<512x256xf32>
    %17 = arith.truncf %16 : vector<512x256xf32> to vector<512x256xbf16>
    %c0_12 = arith.constant 0 : index
    %c0_13 = arith.constant 0 : index
    %18 = vector.load %arg7[%c0_12, %c0_13] : memref<256x384xbf16, #tpu.memory_space<vmem>>, vector<256x384xbf16>
    %cst_14 = arith.constant dense<0.000000e+00> : vector<512x384xf32>
    %19 = tpu.matmul %17, %18, %cst_14 {dimension_numbers = #tpu.dot_dimension_numbers<[1], [0], [0], [1], [0, 0, 1, 1], [], []>} : vector<512x256xbf16>, vector<256x384xbf16>, vector<512x384xf32> -> vector<512x384xf32>
    %c0_15 = arith.constant 0 : index
    %c0_16 = arith.constant 0 : index
    %20 = vector.load %arg8[%c0_15, %c0_16] : memref<1x384xf32, #tpu.memory_space<vmem>>, vector<1x384xf32>
    %21 = vector.broadcast %20 : vector<1x384xf32> to vector<512x384xf32>
    %22 = arith.addf %19, %21 : vector<512x384xf32>
    %c0_17 = arith.constant 0 : index
    %c0_18 = arith.constant 0 : index
    %23 = vector.load %arg2[%c0_17, %c0_18] : memref<512x3xf32, #tpu.memory_space<vmem>>, vector<512x3xf32>
    %24 = vector.extract_strided_slice %22 {offsets = [0, 0], sizes = [512, 3], strides = [1, 1]} : vector<512x384xf32> to vector<512x3xf32>
    %25 = arith.addf %23, %24 : vector<512x3xf32>
    %c0_19 = arith.constant 0 : index
    %c0_20 = arith.constant 0 : index
    %26 = vector.load %arg9[%c0_19, %c0_20] : memref<512x3xf32, #tpu.memory_space<vmem>>, vector<512x3xf32>
    tpu.vector_store %arg9[%c0_19, %c0_20], %25 {strides = array<i32>} : memref<512x3xf32, #tpu.memory_space<vmem>>, vector<512x3xf32>,
    %27 = vector.extract_strided_slice %22 {offsets = [0, 128], sizes = [512, 256], strides = [1, 1]} : vector<512x384xf32> to vector<512x256xf32>
    %28 = arith.addf %1, %27 : vector<512x256xf32>
    %29 = arith.mulf %28, %28 : vector<512x256xf32>
    %cst_21 = arith.constant dense<0.000000e+00> : vector<512xf32>
    %30 = vector.multi_reduction <add>, %29, %cst_21 [1] : vector<512x256xf32> to vector<512xf32>
    %31 = vector.shape_cast %30 : vector<512xf32> to vector<512x1xf32>
    %32 = math.rsqrt %31 : vector<512x1xf32>
    %33 = vector.broadcast %32 : vector<512x1xf32> to vector<512x256xf32>
    %34 = arith.mulf %28, %33 : vector<512x256xf32>
    %c0_22 = arith.constant 0 : index
    %c0_23 = arith.constant 0 : index
    %35 = vector.load %arg10[%c0_22, %c0_23] : memref<512x256xf32, #tpu.memory_space<vmem>>, vector<512x256xf32>
    tpu.vector_store %arg10[%c0_22, %c0_23], %34 {strides = array<i32>} : memref<512x256xf32, #tpu.memory_space<vmem>>, vector<512x256xf32>,
    return
  }
  func.func @transform_0(%arg0: i32) -> (i32, i32) {
    %c0_i32 = arith.constant 0 : i32
    %c0_i32_0 = arith.constant 0 : i32
    return %arg0, %c0_i32 : i32, i32
  }
  func.func @transform_1(%arg0: i32) -> (i32, i32) {
    %c0_i32 = arith.constant 0 : i32
    %c0_i32_0 = arith.constant 0 : i32
    return %arg0, %c0_i32 : i32, i32
  }
  func.func @transform_2(%arg0: i32) -> (i32, i32) {
    %c0_i32 = arith.constant 0 : i32
    %c0_i32_0 = arith.constant 0 : i32
    %c0_i32_1 = arith.constant 0 : i32
    return %c0_i32, %c0_i32_0 : i32, i32
  }
  func.func @transform_3(%arg0: i32) -> (i32, i32) {
    %c0_i32 = arith.constant 0 : i32
    %c0_i32_0 = arith.constant 0 : i32
    %c0_i32_1 = arith.constant 0 : i32
    return %c0_i32, %c0_i32_0 : i32, i32
  }
  func.func @transform_4(%arg0: i32) -> (i32, i32) {
    %c0_i32 = arith.constant 0 : i32
    %c0_i32_0 = arith.constant 0 : i32
    %c0_i32_1 = arith.constant 0 : i32
    return %c0_i32, %c0_i32_0 : i32, i32
  }
  func.func @transform_5(%arg0: i32) -> (i32, i32) {
    %c0_i32 = arith.constant 0 : i32
    %c0_i32_0 = arith.constant 0 : i32
    %c0_i32_1 = arith.constant 0 : i32
    return %c0_i32, %c0_i32_0 : i32, i32
  }
  func.func @transform_6(%arg0: i32) -> (i32, i32) {
    %c0_i32 = arith.constant 0 : i32
    %c0_i32_0 = arith.constant 0 : i32
    %c0_i32_1 = arith.constant 0 : i32
    return %c0_i32, %c0_i32_0 : i32, i32
  }
  func.func @transform_7(%arg0: i32) -> (i32, i32) {
    %c0_i32 = arith.constant 0 : i32
    %c0_i32_0 = arith.constant 0 : i32
    %c0_i32_1 = arith.constant 0 : i32
    return %c0_i32, %c0_i32_0 : i32, i32
  }
  func.func @transform_8(%arg0: i32) -> (i32, i32) {
    %c0_i32 = arith.constant 0 : i32
    %c0_i32_0 = arith.constant 0 : i32
    return %arg0, %c0_i32 : i32, i32
  }
  func.func @transform_9(%arg0: i32) -> (i32, i32) {
    %c0_i32 = arith.constant 0 : i32
    %c0_i32_0 = arith.constant 0 : i32
    return %arg0, %c0_i32 : i32, i32
  }
}

</mosaic_0001>

<bundles_post_ra>
// kernel: tpu_custom_call.1
= control target key start
LH: loop header
LB: loop body
LE: loop exit
PB: predicated region body
PF: predicated region fallthrough
CT: control target
= control target key end

     0   :  { %15 = vsyncpa [#allocation3], 0  ;;  %s7707_s0 = inlined_call_operand.vmem [shape: bf16[1024,256], index: 0, kind: input, shape index: {}]   ;;  %s7708_s1 = inlined_call_operand.vmem [shape: f32[1024,3], index: 1, kind: input, shape index: {}]   ;;  %s7709_s2 = inlined_call_operand.hbm [shape: bf16[256,256], index: 2, kind: input, shape index: {}]   ;;  %s7710_s3 = inlined_call_operand.vmem [shape: f32[1,256], index: 3, kind: input, shape index: {}]   ;;  %s7711_s4 = inlined_call_operand.hbm [shape: bf16[256,256], index: 4, kind: input, shape index: {}]   ;;  %s7712_s5 = inlined_call_operand.vmem [shape: f32[1,256], index: 5, kind: input, shape index: {}]   ;;  %s7713_s6 = inlined_call_operand.hbm [shape: bf16[256,384], index: 6, kind: input, shape index: {}]   ;;  %s7714_s7 = inlined_call_operand.vmem [shape: f32[1,384], index: 7, kind: input, shape index: {}]   ;;  %s7715_s8 = inlined_call_operand.vmem [shape: f32[1024,3], index: 8, kind: output, shape index: {0}]   ;;  %s7716_s9 = inlined_call_operand.hbm [shape: f32[1024,256], index: 9, kind: output, shape index: {1}]  }
   0x1   :  { %16 = vsyncpa [#allocation6], 0 }
   0x2   :  { %17 = vsyncpa [#allocation4], 0 }
   0x3   :  { %19 = vsyncpa [#allocation4 + $0x1], 0  ;;  %s5435_s30 = smov 0   ;;  %s5437_s10 = smov 0  }
   0x4   :  { %s5439_s11 = smov 0   ;;  %s5441_s12 = smov 0  }
   0x5 LB: > { %7780 = sst [smem:[#allocation12_spill]] %s5360_s30  ;;  %s5456_s13 = sadd.s32 4294967295, %s5372_s12   ;;  %s5372_s12 = sphi %s5441_s12, %s7909_s12   ;;  %s5368_s11 = sphi %s5439_s11, %s7911_s11   ;;  %s5364_s10 = sphi %s5437_s10, %s7913_s10   ;;  %s5360_s30 = sphi %s5435_s30, %s7912_s30  }
   0x6   : > { %7781 = sst [smem:[#allocation13_spill]] %s5368_s11  ;;  %s4522_s14 = sadd.s32 4294967294, %s5372_s12  }
   0x7   : > { %s5460_s15 = sadd.s32 1, %s5372_s12   ;;  %s236_s16 = sadd.s32 1, %s5368_s11 }
   0x8   : > { %7782 = sst [smem:[#allocation14_spill]] %s5460_s15  ;;  %s233_s17 = ssub.s32 %s5372_s12, %s5460_s15 }
   0x9   : > { %p246_p0 = scmp.ne.s32.totalorder %s5368_s11, %s5364_s10  ;;  %p234_p1 = scmp.eq.s32.totalorder %s233_s17, 0 }
   0xa   : > { %p247_p2 = scmp.eq.s32.totalorder %s5456_s13, 1  ;;  %p252_p3 = scmp.ne.s32.totalorder %s5364_s10, %s5360_s30 }
   0xb   : > { %p253_p4 = scmp.eq.s32.totalorder %s4522_s14, 1  ;;  %p4523_p7 = scmp.ge.s32.totalorder %s5372_s12, 1 }
   0xc   : > { %s5471_s18 = scalar_select %p234_p1, %s5368_s11, %s236_s16  }
   0xd   : > { %p5473_p5 = por %p247_p2, %p246_p0  ;;  %p5477_p6 = por %p253_p4, %p252_p3 }
   0xe   : > { %7783 = sst [smem:[#allocation15_spill]] %s5471_s18  ;;  %p260_p8 = scmp.lt.s32.totalorder %s5372_s12, 3 }
   0xf   : > { %s7784_s19 = scalar_select %p5473_p5, 1, 0 }
  0x10   : > { %s7785_s20 = scalar_select %p5477_p6, 1, 0 }
  0x11   : > { %p7717_p9 = scmp.eq.s32.totalorder %s5456_s13, 0  ;;  %p5484_p10 = pnand %p4523_p7, %p260_p8 }
  0x12   : > { %7786 = sst [smem:[#allocation16_spill]] %s7785_s20  ;;  %s5374_s22 = smov [#allocation5]  }
  0x13   : > { %s7787_s21 = scalar_select %p5484_p10, 1, 0 }
  0x14   : > { %p4739_p11 = pneg %p5484_p10  ;;  %s288_s23 = sshll.u32 %s5374_s22, 4  ;;  %s5490_s23 = int_to_ptr.vmem [resolvable:$true] %s288_s23 }
  0x15   : > { %s5375_s25 = smov [#allocation2]   ;;  %s5376_s27 = smov [#allocation7]  }
  0x16   : > { %p5494_p12 = pnand %p7717_p9, %p4739_p11  ;;  %s272_s26 = sshll.u32 %s5375_s25, 4  ;;  %s5498_s26 = int_to_ptr.vmem [resolvable:$true] %s272_s26 }
  0x17   : > { %s5500_s28 = sshll.u32 %s5376_s27, 4  ;;  %s5218_s16 = scalar_lea.hbm %s7711_s4, 4096  ;;  %s305_s28 = int_to_ptr.vmem [resolvable:$true] %s5500_s28 }
  0x18   : > { %p5219_p13 = scmp.ne.s32.totalorder %s7711_s4, %s5218_s16  ;;  %p5510_p0 = pneg %p5494_p12 }
  0x19   : > { %p5225_p3 = scmp.lt.u32.totalorder %s5218_s16, %s7711_s4 }
  0x1a   : > { %p5221_p1 = pnand %p5510_p0, %p5219_p13 }
  0x1c   : > { %p5222_p2 = pneg %p5221_p1 }
  0x1e   : > { %p5227_p4 = pnand %p5225_p3, %p5222_p2 }
  0x20   : > { %5230 = shalt.err (!%p5227_p4)
}
  0x21   : > { %s5231_s29 = scalar_lea.vmem %s5490_s23, 4096  ;;  %p5239_p9 = scmp.lt.s32.totalorder %s5490_s23, %s5490_s23 }
  0x22   : > { %p5232_p7 = scmp.ne.s32.totalorder %s5490_s23, %s5231_s29  ;;  %p5240_p6 = scmp.lt.s32.totalorder %s5231_s29, %s5231_s29 }
  0x24   : > { %p5234_p8 = pnand %p5232_p7, %p5510_p0  ;;  %p5241_p13 = por %p5240_p6, %p5239_p9 }
  0x26   : > { %p5235_p11 = pneg %p5234_p8 }
  0x28   : > { %p5242_p1 = pnand %p5241_p13, %p5235_p11 }
  0x2a   : > { %5245 = shalt.err (!%p5242_p1)
}
  0x2b   : > { %s5377_s14 = smov 128   ;;  %s5378_s16 = smov 8  }
  0x2c   : > { %4745 = dma.hbm_to_vmem [thread:$0]  (!%p5494_p12), %s7711_s4, 4096, %s5490_s23, [#allocation6], %s5377_s14, %s5377_s14, %s5378_s16  }
  0x2d   : > { %s5246_s11 = scalar_lea.hbm %s7709_s2, 4096 }
  0x2e   : > { %p5247_p6 = scmp.ne.s32.totalorder %s7709_s2, %s5246_s11  ;;  %p5253_p3 = scmp.lt.u32.totalorder %s5246_s11, %s7709_s2 }
  0x30   : > { %p5249_p9 = pnand %p5247_p6, %p5510_p0 }
  0x32   : > { %p5250_p2 = pneg %p5249_p9 }
  0x34   : > { %p5255_p4 = pnand %p5253_p3, %p5250_p2 }
  0x36   : > { %5258 = shalt.err (!%p5255_p4)
}
  0x37   : > { %s5259_s23 = scalar_lea.vmem %s5498_s26, 4096  ;;  %p5267_p13 = scmp.lt.s32.totalorder %s5498_s26, %s5498_s26 }
  0x38   : > { %p5260_p7 = scmp.ne.s32.totalorder %s5498_s26, %s5259_s23  ;;  %p5268_p1 = scmp.lt.s32.totalorder %s5259_s23, %s5259_s23 }
  0x3a   : > { %p5262_p8 = pnand %p5260_p7, %p5510_p0  ;;  %p5269_p6 = por %p5268_p1, %p5267_p13 }
  0x3c   : > { %p5263_p11 = pneg %p5262_p8 }
  0x3e   : > { %p5270_p9 = pnand %p5269_p6, %p5263_p11 }
  0x40   : > { %5273 = shalt.err (!%p5270_p9)
}
  0x41   : > { %4742 = dma.hbm_to_vmem [thread:$0]  (!%p5494_p12), %s7709_s2, 4096, %s5498_s26, [#allocation3], %s5377_s14, %s5377_s14, %s5378_s16  }
  0x42   : > { %s5274_s17 = scalar_lea.hbm %s7713_s6, 6144 }
  0x43   : > { %p5275_p2 = scmp.ne.s32.totalorder %s7713_s6, %s5274_s17  ;;  %p5281_p7 = scmp.lt.u32.totalorder %s5274_s17, %s7713_s6 }
  0x45   : > { %p5277_p3 = pnand %p5275_p2, %p5510_p0 }
  0x47   : > { %p5278_p4 = pneg %p5277_p3 }
  0x49   : > { %p5283_p8 = pnand %p5281_p7, %p5278_p4 }
  0x4b   : > { %5286 = shalt.err (!%p5283_p8)
}
  0x4c   : > { %s5287_s23 = scalar_lea.vmem %s305_s28, 6144  ;;  %p5295_p6 = scmp.lt.s32.totalorder %s305_s28, %s305_s28 }
  0x4d   : > { %p5288_p11 = scmp.ne.s32.totalorder %s305_s28, %s5287_s23  ;;  %p5296_p9 = scmp.lt.s32.totalorder %s5287_s23, %s5287_s23 }
  0x4f   : > { %p5290_p13 = pnand %p5288_p11, %p5510_p0  ;;  %p5297_p5 = por %p5296_p9, %p5295_p6 }
  0x51   : > { %p5291_p1 = pneg %p5290_p13 }
  0x53   : > { %p5298_p10 = pnand %p5297_p5, %p5291_p1 }
  0x55   : > { %5301 = shalt.err (!%p5298_p10)
}
  0x56   : > { %s5379_s26 = smov 192   ;;  %s5380_s14 = smov 12  }
  0x57   : > { %4748 = dma.hbm_to_vmem [thread:$0]  (!%p5494_p12), %s7713_s6, 6144, %s305_s28, [#allocation6], %s5379_s26, %s5379_s26, %s5380_s14  }
  0x58   : > { %p7790_p2 = scmp.ne.s32.totalorder %s7787_s21, 0 }
  0x5a   : > { %342 = sbr.rel (%p7790_p2) target bundleno = 1287 (0x507), region = 52 }
  0x61   : > { %p7791_p3 = scmp.eq.s32.totalorder %s5456_s13, 0 }
  0x63   : > { %5347 = dma.done.wait (%p7791_p3), [#allocation3], 4096   ;;  %p7792_p0 = pmov %p7791_p3 }
  0x65   : > { %5349 = vsyncadd (%p7792_p0), [#allocation3], 4294963200  ;;  %p7793_p5 = pmov %p7792_p0 }
  0x66   : > { %p7794_p10 = pmov %p7792_p0 }
  0x67   : > { %5351 = dma.done.wait (%p7793_p5), [#allocation6], 10240  }
  0x68   : > { %5353 = vsyncadd (%p7794_p10), [#allocation6], 4294957056  ;;  %v4802_v0 = vld [vmem:[#allocation2 + $0x4] ss:$8 sps:$4 sm:$0xff]   ;;  %v4804_v1 = vld [vmem:[#allocation2] ss:$8 sps:$4 sm:$0xff]  }
  0x69   : > { %1134 = vmatprep.subr.bf16.mxu0 %v4802_v0  ;;  %v4805_v2 = vld [vmem:[#allocation2 + $0x14] ss:$8 sps:$4 sm:$0xff]   ;;  %v4807_v3 = vld [vmem:[#allocation2 + $0x10] ss:$8 sps:$4 sm:$0xff]   ;;  %v4808_v4 = vld [vmem:[#allocation2 + $0x24] ss:$8 sps:$4 sm:$0xff]  }
  0x6a   : > { %1135 = vmatpush1.bf16.msra.mxu0 %v4804_v1  ;;  %s4533_s18 = sshll.u32 %s5456_s13, 6  ;;  %v4810_v5 = vld [vmem:[#allocation2 + $0x20] ss:$8 sps:$4 sm:$0xff]   ;;  %v4811_v6 = vld [vmem:[#allocation2 + $0x34] ss:$8 sps:$4 sm:$0xff]   ;;  %vm3535_vm0 = vcmask 23552  }
  0x6b   : > { %1136 = vmatprep.subr.bf16.mxu0 %v4805_v2  ;;  %p398_p12 = scmp.lt.s32.totalorder %s4533_s18, 127  ;;  %v4813_v7 = vld [vmem:[#allocation2 + $0x30] ss:$8 sps:$4 sm:$0xff]   ;;  %v4814_v8 = vld [vmem:[#allocation2 + $0x44] ss:$8 sps:$4 sm:$0xff]   ;;  %s4724_s28 = sshll.u32 %s5456_s13, 14 }
  0x6c   : > { %v4816_v9 = vld [vmem:[#allocation2 + $0x40] ss:$8 sps:$4 sm:$0xff]   ;;  %v4817_v10 = vld [vmem:[#allocation2 + $0x54] ss:$8 sps:$4 sm:$0xff]   ;;  %v4819_v11 = vld [vmem:[#allocation2 + $0x50] ss:$8 sps:$4 sm:$0xff]   ;;  %s7654_s17 = scalar_lea.hbm %s7716_s9, %s4724_s28 }
  0x6d   : > { %s7915_s18 = smov (!%p398_p12, %s4533_s18), 127  ;;  %v4820_v12 = vld [vmem:[#allocation2 + $0x64] ss:$8 sps:$4 sm:$0xff]   ;;  %v4822_v16 = vld [vmem:[#allocation2 + $0x60] ss:$8 sps:$4 sm:$0xff]   ;;  %p7905_p7 = scmp.ne.s32.totalorder %s7784_s19, 0 }
  0x6e   : > { %1137 = vmatpush1.bf16.msra.mxu0 %v4807_v3  ;;  %s5584_s21 = sshll.u32 %s7915_s18, 3  ;;  %v4823_v17 = vld [vmem:[#allocation2 + $0x74] ss:$8 sps:$4 sm:$0xff]   ;;  %v4825_v18 = vld [vmem:[#allocation2 + $0x70] ss:$8 sps:$4 sm:$0xff]   ;;  %s394_s18 = sand.u32 1, %s5364_s10  }
  0x6f   : > { %1138 = vmatprep.subr.bf16.mxu0 %v4808_v4  ;;  %s5590_s11 = scalar_lea.vmem %s7707_s0, %s5584_s21  ;;  %v4826_v19 = vld [vmem:[#allocation2 + $0x84] ss:$8 sps:$4 sm:$0xff]   ;;  %v4828_v20 = vld [vmem:[#allocation2 + $0x80] ss:$8 sps:$4 sm:$0xff]   ;;  %v4829_v21 = vld [vmem:[#allocation2 + $0x94] ss:$8 sps:$4 sm:$0xff]   ;;  %s6153_s26 = scalar_lea.vmem %s7708_s1, %s5584_s21 }
  0x70   : > { %v418_v13 = vld [vmem:[%s5590_s11] sm:$0xff]  ;;  %v419_v14 = vld [vmem:[%s5590_s11 + $0x8] sm:$0xff]  ;;  %v4831_v22 = vld [vmem:[#allocation2 + $0x90] ss:$8 sps:$4 sm:$0xff]   ;;  %s6174_s30 = scalar_lea.vmem %s7715_s8, %s5584_s21  ;;  %s7012_s21 = sshll.u32 %s394_s18, 10 }
  0x71   : > { %v4541_v15 = vcombine.high %v418_v13, %v419_v14  ;;  %v4832_v23 = vld [vmem:[#allocation2 + $0xa4] ss:$8 sps:$4 sm:$0xff]   ;;  %v4834_v24 = vld [vmem:[#allocation2 + $0xa0] ss:$8 sps:$4 sm:$0xff]   ;;  %v4835_v25 = vld [vmem:[#allocation2 + $0xb4] ss:$8 sps:$4 sm:$0xff]   ;;  %v4540_v37 = vcombine.low %v418_v13, %v419_v14 }
  0x72   : > { %1139 = vmatpush1.bf16.msra.mxu0 %v4810_v5  ;;  %v4837_v26 = vld [vmem:[#allocation2 + $0xb0] ss:$8 sps:$4 sm:$0xff]   ;;  %v4838_v27 = vld [vmem:[#allocation2 + $0xc4] ss:$8 sps:$4 sm:$0xff]   ;;  %v4840_v28 = vld [vmem:[#allocation2 + $0xc0] ss:$8 sps:$4 sm:$0xff]  }
  0x73   : > { %1140 = vmatprep.subr.bf16.mxu0 %v4811_v6  ;;  %1166 = vmatprep.mubr.bf16.mxu0 %v4541_v15  ;;  %v4841_v29 = vld [vmem:[#allocation2 + $0xd4] ss:$8 sps:$4 sm:$0xff]   ;;  %v4843_v30 = vld [vmem:[#allocation2 + $0xd0] ss:$8 sps:$4 sm:$0xff]   ;;  %v4844_v31 = vld [vmem:[#allocation2 + $0xe4] ss:$8 sps:$4 sm:$0xff]  }
  0x74   : > { %v4846_v32 = vld [vmem:[#allocation2 + $0xe0] ss:$8 sps:$4 sm:$0xff]   ;;  %v4847_v33 = vld [vmem:[#allocation2 + $0xf4] ss:$8 sps:$4 sm:$0xff]   ;;  %v4849_v34 = vld [vmem:[#allocation2 + $0xf0] ss:$8 sps:$4 sm:$0xff]  }
  0x75   : > { %v420_v35 = vld [vmem:[%s5590_s11 + $0x10] sm:$0xff]  ;;  %v421_v36 = vld [vmem:[%s5590_s11 + $0x18] sm:$0xff]  ;;  %v422_v39 = vld [vmem:[%s5590_s11 + $0x20] sm:$0xff]  ;;  %s7042_s24 = scalar_lea.vmem [#allocation8], %s7012_s21  ;;  %s7666_s13 = scalar_lea.sflag [#allocation4], %s394_s18 }
  0x76   : > { %1141 = vmatpush1.bf16.msra.mxu0 %v4813_v7  ;;  %v4543_v38 = vcombine.high %v420_v35, %v421_v36  ;;  %v423_v40 = vld [vmem:[%s5590_s11 + $0x28] sm:$0xff]  ;;  %v4542_v41 = vcombine.low %v420_v35, %v421_v36  ;;  %v424_v43 = vld [vmem:[%s5590_s11 + $0x30] sm:$0xff]  ;;  %v425_v44 = vld [vmem:[%s5590_s11 + $0x38] sm:$0xff]  ;;  %s5382_s25 = smov [#allocation8]  }
  0x77   : > { %1142 = vmatprep.subr.bf16.mxu0 %v4814_v8  ;;  %v4545_v42 = vcombine.high %v422_v39, %v423_v40  ;;  %v4544_v45 = vcombine.low %v422_v39, %v423_v40  ;;  %v4547_v46 = vcombine.high %v424_v43, %v425_v44  ;;  %v426_v47 = vld [vmem:[%s5590_s11 + $0x40] sm:$0xff]  ;;  %v427_v48 = vld [vmem:[%s5590_s11 + $0x48] sm:$0xff]  ;;  %v4546_v49 = vcombine.low %v424_v43, %v425_v44  ;;  %v428_v53 = vld [vmem:[%s5590_s11 + $0x50] sm:$0xff]  ;;  %s5306_s27 = sshll.u32 %s5382_s25, 4  ;;  %s5307_s27 = int_to_ptr.vmem [resolvable:$false] %s5306_s27 }
  0x78   : > { %v4549_v50 = vcombine.high %v426_v47, %v427_v48  ;;  %v4890_v51 = vld [vmem:[#allocation5 + $0x4] ss:$8 sps:$4 sm:$0xff]   ;;  %v4892_v52 = vld [vmem:[#allocation5] ss:$8 sps:$4 sm:$0xff]   ;;  %v429_v54 = vld [vmem:[%s5590_s11 + $0x58] sm:$0xff]  ;;  %v4548_v55 = vcombine.low %v426_v47, %v427_v48  ;;  %s5308_s29 = scalar_lea.vmem %s5307_s27, 32768 }
  0x79   : > { %1883 = vmatprep.subr.bf16.mxu1 %v4890_v51  ;;  %v4551_v56 = vcombine.high %v428_v53, %v429_v54  ;;  %v4895_v57 = vld [vmem:[#allocation5 + $0x14] ss:$8 sps:$4 sm:$0xff]   ;;  %v4897_v58 = vld [vmem:[#allocation5 + $0x10] ss:$8 sps:$4 sm:$0xff]   ;;  %v4898_v59 = vld [vmem:[#allocation5 + $0x24] ss:$8 sps:$4 sm:$0xff]   ;;  %v4550_v63 = vcombine.low %v428_v53, %v429_v54 }
  0x7a   : > { %1143 = vmatpush1.bf16.msra.mxu0 %v4816_v9  ;;  %1884 = vmatpush1.bf16.msra.mxu1 %v4892_v52  ;;  %v430_v60 = vld [vmem:[%s5590_s11 + $0x60] sm:$0xff]  ;;  %v431_v61 = vld [vmem:[%s5590_s11 + $0x68] sm:$0xff]  ;;  %v4903_v1 = vld [vmem:[#allocation5 + $0x34] ss:$8 sps:$4 sm:$0xff]  }
  0x7b   : > { %1144 = vmatprep.subr.bf16.mxu0 %v4817_v10  ;;  %1885 = vmatprep.subr.bf16.mxu1 %v4895_v57  ;;  %v4900_v62 = vld [vmem:[#allocation5 + $0x20] ss:$8 sps:$4 sm:$0xff]   ;;  %v4553_v0 = vcombine.high %v430_v60, %v431_v61  ;;  %v4905_v2 = vld [vmem:[#allocation5 + $0x30] ss:$8 sps:$4 sm:$0xff]   ;;  %v4906_v3 = vld [vmem:[#allocation5 + $0x44] ss:$8 sps:$4 sm:$0xff]   ;;  %v4552_v7 = vcombine.low %v430_v60, %v431_v61 }
  0x7c   : > { %v432_v4 = vld [vmem:[%s5590_s11 + $0x70] sm:$0xff]  ;;  %v433_v5 = vld [vmem:[%s5590_s11 + $0x78] sm:$0xff]  ;;  %v4908_v6 = vld [vmem:[#allocation5 + $0x40] ss:$8 sps:$4 sm:$0xff]  }
  0x7d   : > { %v4555_v8 = vcombine.high %v432_v4, %v433_v5  ;;  %v4911_v9 = vld [vmem:[#allocation5 + $0x54] ss:$8 sps:$4 sm:$0xff]   ;;  %v4913_v10 = vld [vmem:[#allocation5 + $0x50] ss:$8 sps:$4 sm:$0xff]   ;;  %v435_v13 = vld [vmem:[%s5590_s11 + $0x88] sm:$0xff]  ;;  %v4554_v15 = vcombine.low %v432_v4, %v433_v5 }
  0x7e   : > { %1145 = vmatpush1.bf16.msra.mxu0 %v4819_v11  ;;  %1886 = vmatpush1.bf16.msra.mxu1 %v4897_v58  ;;  %v4914_v11 = vld [vmem:[#allocation5 + $0x64] ss:$8 sps:$4 sm:$0xff]   ;;  %v4916_v14 = vld [vmem:[#allocation5 + $0x60] ss:$8 sps:$4 sm:$0xff]   ;;  %v440_v36 = vld [vmem:[%s5590_s11 + $0xb0] sm:$0xff] }
  0x7f   : > { %1146 = vmatprep.subr.bf16.mxu0 %v4820_v12  ;;  %1887 = vmatprep.subr.bf16.mxu1 %v4898_v59  ;;  %v434_v12 = vld [vmem:[%s5590_s11 + $0x80] sm:$0xff]  ;;  %v443_v44 = vld [vmem:[%s5590_s11 + $0xc8] sm:$0xff]  ;;  %v444_v51 = vld [vmem:[%s5590_s11 + $0xd0] sm:$0xff]  ;;  %v5381_v59 = vmov 0  }
  0x80   : > { %v4938_v35 = vld [vmem:[#allocation5 + $0xc4] ss:$8 sps:$4 sm:$0xff]   ;;  %v4948_v48 = vld [vmem:[#allocation5 + $0xe0] ss:$8 sps:$4 sm:$0xff]   ;;  %v445_v52 = vld [vmem:[%s5590_s11 + $0xd8] sm:$0xff] }
  0x81   : > { %v442_v43 = vld [vmem:[%s5590_s11 + $0xc0] sm:$0xff]  ;;  %v4567_v54 = vcombine.high %v444_v51, %v445_v52  ;;  %v447_v58 = vld [vmem:[%s5590_s11 + $0xe8] sm:$0xff]  ;;  %v4566_v60 = vcombine.low %v444_v51, %v445_v52  ;;  %v4986_v52 = vld [vmem:[#allocation7 + $0x90] ss:$12 sps:$4 sm:$0xff]  }
  0x82   : > { %1147 = vmatpush1.bf16.msra.mxu0 %v4822_v16  ;;  %1888 = vmatpush1.bf16.msra.mxu1 %v4900_v62  ;;  %v4557_v16 = vcombine.high %v434_v12, %v435_v13  ;;  %v4565_v47 = vcombine.high %v442_v43, %v443_v44  ;;  %v4564_v53 = vcombine.low %v442_v43, %v443_v44  ;;  %v446_v57 = vld [vmem:[%s5590_s11 + $0xe0] sm:$0xff]  ;;  %v448_v62 = vld [vmem:[%s5590_s11 + $0xf0] sm:$0xff]  ;;  %v451_v5 = vld [vmem:[%s5590_s11 + $0x108] sm:$0xff] }
  0x83   : > { %1148 = vmatprep.subr.bf16.mxu0 %v4823_v17  ;;  %1889 = vmatprep.subr.bf16.mxu1 %v4903_v1  ;;  %v4919_v17 = vld [vmem:[#allocation5 + $0x74] ss:$8 sps:$4 sm:$0xff]   ;;  %v4569_v61 = vcombine.high %v446_v57, %v447_v58  ;;  %v450_v4 = vld [vmem:[%s5590_s11 + $0x100] sm:$0xff] }
  0x84   : > { %v4984_v43 = vld [vmem:[#allocation7 + $0x7c] ss:$12 sps:$4 sm:$0xff]   ;;  %v466_v44 = vld [vmem:[%s5590_s11 + $0x180] sm:$0xff] }
  0x86   : > { %1149 = vmatpush1.bf16.msra.mxu0 %v4825_v18  ;;  %1890 = vmatpush1.bf16.msra.mxu1 %v4905_v2  ;;  %v4921_v18 = vld [vmem:[#allocation5 + $0x70] ss:$8 sps:$4 sm:$0xff]  }
  0x87   : > { %1150 = vmatprep.subr.bf16.mxu0 %v4826_v19  ;;  %1891 = vmatprep.subr.bf16.mxu1 %v4906_v3  ;;  %v4922_v19 = vld [vmem:[#allocation5 + $0x84] ss:$8 sps:$4 sm:$0xff]   ;;  %v4964_v3 = vld [vmem:[#allocation7 + $0x1c] ss:$12 sps:$4 sm:$0xff]  }
  0x88   : > { %v4962_v2 = vld [vmem:[#allocation7 + $0x18] ss:$12 sps:$4 sm:$0xff]  }
  0x8a   : > { %1151 = vmatpush1.bf16.msra.mxu0 %v4828_v20  ;;  %1892 = vmatpush1.bf16.msra.mxu1 %v4908_v6  ;;  %v436_v20 = vld [vmem:[%s5590_s11 + $0x90] sm:$0xff] }
  0x8b   : > { %1152 = vmatprep.subr.bf16.mxu0 %v4829_v21  ;;  %1893 = vmatprep.subr.bf16.mxu1 %v4911_v9  ;;  %v437_v21 = vld [vmem:[%s5590_s11 + $0x98] sm:$0xff] }
  0x8c   : > { %v453_v9 = vld [vmem:[%s5590_s11 + $0x118] sm:$0xff] }
  0x8e   : > { %1153 = vmatpush1.bf16.msra.mxu0 %v4831_v22  ;;  %1894 = vmatpush1.bf16.msra.mxu1 %v4913_v10  ;;  %v4924_v22 = vld [vmem:[#allocation5 + $0x80] ss:$8 sps:$4 sm:$0xff]   ;;  %v4572_v10 = vcombine.low %v450_v4, %v451_v5 }
  0x8f   : > { %1154 = vmatprep.subr.bf16.mxu0 %v4832_v23  ;;  %1895 = vmatprep.subr.bf16.mxu1 %v4914_v11  ;;  %v4556_v23 = vcombine.low %v434_v12, %v435_v13  ;;  %v4970_v12 = vld [vmem:[#allocation7 + $0x30] ss:$12 sps:$4 sm:$0xff]   ;;  %v4972_v13 = vld [vmem:[#allocation7 + $0x34] ss:$12 sps:$4 sm:$0xff]  }
  0x92   : > { %1155 = vmatpush1.bf16.msra.mxu0 %v4834_v24  ;;  %1896 = vmatpush1.bf16.msra.mxu1 %v4916_v14  ;;  %v4559_v24 = vcombine.high %v436_v20, %v437_v21  ;;  %v454_v14 = vld [vmem:[%s5590_s11 + $0x120] sm:$0xff] }
  0x93   : > { %1156 = vmatprep.subr.bf16.mxu0 %v4835_v25  ;;  %1897 = vmatprep.subr.bf16.mxu1 %v4919_v17  ;;  %v4927_v25 = vld [vmem:[#allocation5 + $0x94] ss:$8 sps:$4 sm:$0xff]  }
  0x96   : > { %1157 = vmatpush1.bf16.msra.mxu0 %v4837_v26  ;;  %1898 = vmatpush1.bf16.msra.mxu1 %v4921_v18  ;;  %v4929_v26 = vld [vmem:[#allocation5 + $0x90] ss:$8 sps:$4 sm:$0xff]  }
  0x97   : > { %1158 = vmatprep.subr.bf16.mxu0 %v4838_v27  ;;  %1899 = vmatprep.subr.bf16.mxu1 %v4922_v19  ;;  %v4930_v27 = vld [vmem:[#allocation5 + $0xa4] ss:$8 sps:$4 sm:$0xff]   ;;  %v456_v18 = vld [vmem:[%s5590_s11 + $0x130] sm:$0xff]  ;;  %v457_v19 = vld [vmem:[%s5590_s11 + $0x138] sm:$0xff] }
  0x9a   : > { %1159 = vmatpush1.bf16.msra.mxu0 %v4840_v28  ;;  %1900 = vmatpush1.bf16.msra.mxu1 %v4924_v22  ;;  %v438_v28 = vld [vmem:[%s5590_s11 + $0xa0] sm:$0xff]  ;;  %v4974_v22 = vld [vmem:[#allocation7 + $0x48] ss:$12 sps:$4 sm:$0xff]  }
  0x9b   : > { %1160 = vmatprep.subr.bf16.mxu0 %v4841_v29  ;;  %v439_v29 = vld [vmem:[%s5590_s11 + $0xa8] sm:$0xff]  ;;  %1901 = vmatprep.subr.bf16.mxu1 %v4927_v25 }
  0x9c   : > { %v4560_v39 = vcombine.low %v438_v28, %v439_v29  ;;  %v459_v25 = vld [vmem:[%s5590_s11 + $0x148] sm:$0xff] }
  0x9e   : > { %1161 = vmatpush1.bf16.msra.mxu0 %v4843_v30  ;;  %1902 = vmatpush1.bf16.msra.mxu1 %v4929_v26  ;;  %v4932_v30 = vld [vmem:[#allocation5 + $0xa0] ss:$8 sps:$4 sm:$0xff]   ;;  %v4578_v26 = vcombine.low %v456_v18, %v457_v19 }
  0x9f   : > { %1162 = vmatprep.subr.bf16.mxu0 %v4844_v31  ;;  %v4558_v31 = vcombine.low %v436_v20, %v437_v21  ;;  %1903 = vmatprep.subr.bf16.mxu1 %v4930_v27  ;;  %v4579_v21 = vcombine.high %v456_v18, %v457_v19 }
  0xa2   : > { %1163 = vmatpush1.bf16.msra.mxu0 %v4846_v32  ;;  %v4561_v32 = vcombine.high %v438_v28, %v439_v29  ;;  %1904 = vmatpush1.bf16.msra.mxu1 %v4932_v30  ;;  %v460_v28 = vld [vmem:[%s5590_s11 + $0x150] sm:$0xff]  ;;  %v461_v29 = vld [vmem:[%s5590_s11 + $0x158] sm:$0xff] }
  0xa3   : > { %1164 = vmatprep.subr.bf16.mxu0 %v4847_v33  ;;  %v4935_v33 = vld [vmem:[#allocation5 + $0xb4] ss:$8 sps:$4 sm:$0xff]  }
  0xa4   : > { %1905 = vmatprep.subr.bf16.mxu1 %v4935_v33  ;;  %v4980_v33 = vld [vmem:[#allocation7 + $0x64] ss:$12 sps:$4 sm:$0xff]  }
  0xa6   : > { %1165 = vmatpush1.bf16.msra.mxu0 %v4849_v34  ;;  %v4937_v34 = vld [vmem:[#allocation5 + $0xb0] ss:$8 sps:$4 sm:$0xff]  }
  0xa7   : > { %1906 = vmatpush1.bf16.msra.mxu1 %v4937_v34  ;;  %v462_v34 = vld [vmem:[%s5590_s11 + $0x160] sm:$0xff] }
  0xa8   : > { %1907 = vmatprep.subr.bf16.mxu1 %v4938_v35  ;;  %v463_v35 = vld [vmem:[%s5590_s11 + $0x168] sm:$0xff] }
  0xa9   : > { %1167 = vmatmul.mubr.bf16.vlgmr.msra.gmra.mrb[0].mxu0 %v4540_v37  ;;  %v441_v37 = vld [vmem:[%s5590_s11 + $0xb8] sm:$0xff] }
  0xaa   : > { %1176 = vmatprep.mubr.bf16.mxu0 %v4543_v38  ;;  %v4940_v38 = vld [vmem:[#allocation5 + $0xc0] ss:$8 sps:$4 sm:$0xff]   ;;  %v4563_v40 = vcombine.high %v440_v36, %v441_v37 }
  0xab   : > { %1908 = vmatpush1.bf16.msra.mxu1 %v4940_v38  ;;  %v464_v38 = vld [vmem:[%s5590_s11 + $0x170] sm:$0xff] }
  0xb1   : > { %1177 = vmatmul.mubr.bf16.gmra.mrb[4].mxu0 %v4542_v41  ;;  %v4943_v41 = vld [vmem:[#allocation5 + $0xd4] ss:$8 sps:$4 sm:$0xff]  }
  0xb2   : > { %1186 = vmatprep.mubr.bf16.mxu0 %v4545_v42  ;;  %v4945_v42 = vld [vmem:[#allocation5 + $0xd0] ss:$8 sps:$4 sm:$0xff]   ;;  %1909 = vmatprep.subr.bf16.mxu1 %v4943_v41 }
  0xb3   : > { %1910 = vmatpush1.bf16.msra.mxu1 %v4945_v42  ;;  %v4982_v42 = vld [vmem:[#allocation7 + $0x78] ss:$12 sps:$4 sm:$0xff]  }
  0xb9   : > { %1187 = vmatmul.mubr.bf16.gmra.mrb[8].mxu0 %v4544_v45  ;;  %v4562_v45 = vcombine.low %v440_v36, %v441_v37  ;;  %v4582_v36 = vcombine.low %v460_v28, %v461_v29  ;;  %v4585_v37 = vcombine.high %v462_v34, %v463_v35 }
  0xba   : > { %1196 = vmatprep.mubr.bf16.mxu0 %v4547_v46  ;;  %v4946_v46 = vld [vmem:[#allocation5 + $0xe4] ss:$8 sps:$4 sm:$0xff]  }
  0xbb   : > { %1911 = vmatprep.subr.bf16.mxu1 %v4946_v46 }
  0xbc   : > { %1912 = vmatpush1.bf16.msra.mxu1 %v4948_v48  ;;  %v468_v48 = vld [vmem:[%s5590_s11 + $0x190] sm:$0xff] }
  0xc1   : > { %1197 = vmatmul.mubr.bf16.gmra.mrb[12].mxu0 %v4546_v49  ;;  %v4951_v49 = vld [vmem:[#allocation5 + $0xf4] ss:$8 sps:$4 sm:$0xff]  }
  0xc2   : > { %1206 = vmatprep.mubr.bf16.mxu0 %v4549_v50  ;;  %v4953_v50 = vld [vmem:[#allocation5 + $0xf0] ss:$8 sps:$4 sm:$0xff]   ;;  %1913 = vmatprep.subr.bf16.mxu1 %v4951_v49 }
  0xc3   : > { %1914 = vmatpush1.bf16.msra.mxu1 %v4953_v50  ;;  %v469_v49 = vld [vmem:[%s5590_s11 + $0x198] sm:$0xff] }
  0xc4   : > { %3118 = vmatprep.subr.bf16.mxu1 %v5381_v59  ;;  %v4591_v51 = vcombine.high %v468_v48, %v469_v49 }
  0xc9   : > { %1207 = vmatmul.mubr.bf16.gmra.mrb[16].mxu0 %v4548_v55  ;;  %v4954_v55 = vld [vmem:[#allocation7] ss:$12 sps:$4 sm:$0xff]  }
  0xca   : > { %1216 = vmatprep.mubr.bf16.mxu0 %v4551_v56  ;;  %v4956_v56 = vld [vmem:[#allocation7 + $0x4] ss:$12 sps:$4 sm:$0xff]  }
  0xcb   : > { %2765 = vmatprep.subr.bf16.mxu0 %v4956_v56  ;;  %v4590_v56 = vcombine.low %v468_v48, %v469_v49  ;;  %v479_v48 = vld [vmem:[%s5590_s11 + $0x1e8] sm:$0xff] }
  0xcc   : > { %2766 = vmatpush1.bf16.msra.mxu0 %v4954_v55  ;;  %v471_v55 = vld [vmem:[%s5590_s11 + $0x1a8] sm:$0xff] }
  0xcd   : > { %2767 = vmatprep.subr.bf16.mxu0 %v4964_v3 }
  0xd0   : > { %2768 = vmatpush1.bf16.msra.mxu0 %v4962_v2 }
  0xd1   : > { %1217 = vmatmul.mubr.bf16.gmra.mrb[20].mxu0 %v4550_v63  ;;  %v449_v63 = vld [vmem:[%s5590_s11 + $0xf8] sm:$0xff]  ;;  %2769 = vmatprep.subr.bf16.mxu0 %v4972_v13 }
  0xd2   : > { %1226 = vmatprep.mubr.bf16.mxu0 %v4553_v0  ;;  %v4568_v0 = vcombine.low %v446_v57, %v447_v58  ;;  %v4571_v1 = vcombine.high %v448_v62, %v449_v63  ;;  %v4570_v6 = vcombine.low %v448_v62, %v449_v63  ;;  %v644_v57 = vlaneseq  ;;  %v473_v62 = vld [vmem:[%s5590_s11 + $0x1b8] sm:$0xff] }
  0xd4   : > { %2770 = vmatpush1.bf16.msra.mxu0 %v4970_v12 }
  0xd9   : > { %1227 = vmatmul.mubr.bf16.gmra.mrb[24].mxu0 %v4552_v7  ;;  %v4573_v7 = vcombine.high %v450_v4, %v451_v5  ;;  %v4990_v4 = vld [vmem:[#allocation7 + $0xa8] ss:$12 sps:$4 sm:$0xff]   ;;  %v4992_v5 = vld [vmem:[#allocation7 + $0xac] ss:$12 sps:$4 sm:$0xff]  }
  0xda   : > { %1236 = vmatprep.mubr.bf16.mxu0 %v4555_v8  ;;  %v452_v8 = vld [vmem:[%s5590_s11 + $0x110] sm:$0xff] }
  0xdb   : > { %v4575_v11 = vcombine.high %v452_v8, %v453_v9 }
  0xe1   : > { %1237 = vmatmul.mubr.bf16.gmra.mrb[28].mxu0 %v4554_v15  ;;  %v455_v15 = vld [vmem:[%s5590_s11 + $0x128] sm:$0xff] }
  0xe2   : > { %1246 = vmatprep.mubr.bf16.mxu0 %v4557_v16  ;;  %v4574_v16 = vcombine.low %v452_v8, %v453_v9  ;;  %v4577_v17 = vcombine.high %v454_v14, %v455_v15  ;;  %v4576_v20 = vcombine.low %v454_v14, %v455_v15  ;;  %v474_v8 = vld [vmem:[%s5590_s11 + $0x1c0] sm:$0xff]  ;;  %v475_v9 = vld [vmem:[%s5590_s11 + $0x1c8] sm:$0xff] }
  0xe9   : > { %1247 = vmatmul.mubr.bf16.gmra.mrb[32].mxu0 %v4556_v23  ;;  %v4976_v23 = vld [vmem:[#allocation7 + $0x4c] ss:$12 sps:$4 sm:$0xff]  }
  0xea   : > { %1256 = vmatprep.mubr.bf16.mxu0 %v4559_v24  ;;  %2771 = vmatprep.subr.bf16.mxu0 %v4976_v23  ;;  %v458_v24 = vld [vmem:[%s5590_s11 + $0x140] sm:$0xff] }
  0xeb   : > { %2772 = vmatpush1.bf16.msra.mxu0 %v4974_v22  ;;  %v4581_v27 = vcombine.high %v458_v24, %v459_v25  ;;  %v4580_v30 = vcombine.low %v458_v24, %v459_v25  ;;  %v476_v25 = vld [vmem:[%s5590_s11 + $0x1d0] sm:$0xff] }
  0xec   : > { %2773 = vmatprep.subr.bf16.mxu0 %v4980_v33 }
  0xf1   : > { %1257 = vmatmul.mubr.bf16.gmra.mrb[36].mxu0 %v4558_v31  ;;  %v4583_v31 = vcombine.high %v460_v28, %v461_v29  ;;  %v4957_v29 = vld [vmem:[#allocation7 + $0x8] ss:$12 sps:$4 sm:$0xff]  }
  0xf2   : > { %1266 = vmatprep.mubr.bf16.mxu0 %v4561_v32  ;;  %v4978_v32 = vld [vmem:[#allocation7 + $0x60] ss:$12 sps:$4 sm:$0xff]  }
  0xf3   : > { %2774 = vmatpush1.bf16.msra.mxu0 %v4978_v32  ;;  %v4596_v32 = vcombine.low %v474_v8, %v475_v9 }
  0xf4   : > { %2775 = vmatprep.subr.bf16.mxu0 %v4984_v43 }
  0xf7   : > { %2776 = vmatpush1.bf16.msra.mxu0 %v4982_v42 }
  0xf9   : > { %1267 = vmatmul.mubr.bf16.gmra.mrb[40].mxu0 %v4560_v39  ;;  %v465_v39 = vld [vmem:[%s5590_s11 + $0x178] sm:$0xff] }
  0xfa   : > { %1276 = vmatprep.mubr.bf16.mxu0 %v4563_v40  ;;  %v4584_v40 = vcombine.low %v462_v34, %v463_v35  ;;  %v4587_v41 = vcombine.high %v464_v38, %v465_v39  ;;  %v4586_v46 = vcombine.low %v464_v38, %v465_v39  ;;  %v4965_v39 = vld [vmem:[#allocation7 + $0x20] ss:$12 sps:$4 sm:$0xff]  }
 0x101   : > { %1277 = vmatmul.mubr.bf16.gmra.mrb[44].mxu0 %v4562_v45  ;;  %v467_v45 = vld [vmem:[%s5590_s11 + $0x188] sm:$0xff] }
 0x102   : > { %1286 = vmatprep.mubr.bf16.mxu0 %v4565_v47  ;;  %v4589_v47 = vcombine.high %v466_v44, %v467_v45  ;;  %v4588_v50 = vcombine.low %v466_v44, %v467_v45 }
 0x109   : > { %1287 = vmatmul.mubr.bf16.gmra.mrb[48].mxu0 %v4564_v53  ;;  %v4988_v53 = vld [vmem:[#allocation7 + $0x94] ss:$12 sps:$4 sm:$0xff]  }
 0x10a   : > { %1296 = vmatprep.mubr.bf16.mxu0 %v4567_v54  ;;  %2777 = vmatprep.subr.bf16.mxu0 %v4988_v53  ;;  %v470_v54 = vld [vmem:[%s5590_s11 + $0x1a0] sm:$0xff] }
 0x10b   : > { %2778 = vmatpush1.bf16.msra.mxu0 %v4986_v52  ;;  %v4593_v58 = vcombine.high %v470_v54, %v471_v55  ;;  %v4592_v63 = vcombine.low %v470_v54, %v471_v55 }
 0x10c   : > { %2779 = vmatprep.subr.bf16.mxu0 %v4992_v5 }
 0x10f   : > { %2780 = vmatpush1.bf16.msra.mxu0 %v4990_v4 }
 0x111   : > { %1297 = vmatmul.mubr.bf16.gmra.mrb[52].mxu0 %v4566_v60  ;;  %v5647_v60 = vshrl.u32 %v644_v57, 7 }
 0x112   : > { %1306 = vmatprep.mubr.bf16.mxu0 %v4569_v61  ;;  %v472_v61 = vld [vmem:[%s5590_s11 + $0x1b0] sm:$0xff] }
 0x113   : > { %v5658_v2 = vsub.s32 1, %v5647_v60  ;;  %v4595_v3 = vcombine.high %v472_v61, %v473_v62  ;;  %v4594_v13 = vcombine.low %v472_v61, %v473_v62 }
 0x119   : > { %1307 = vmatmul.mubr.bf16.gmra.mrb[56].mxu0 %v4568_v0  ;;  %v5652_v0 = vsub.s32 0, %v5647_v60 }
 0x11a   : > { %1316 = vmatprep.mubr.bf16.mxu0 %v4571_v1  ;;  %v642_v1 = vld [vmem:[%s7710_s3] sm:$0x3] }
 0x121   : > { %1317 = vmatmul.mubr.bf16.gmra.mrb[60].mxu0 %v4570_v6  ;;  %v5661_v6 = vrot.slane %v642_v1, %v5652_v0 }
 0x122   : > { %1326 = vmatprep.mubr.bf16.mxu0 %v4573_v7  ;;  %v5664_v7 = vrot.slane %v642_v1, %v5658_v2 }
 0x129   : > { %1327 = vmatmul.mubr.bf16.gmra.mrb[64].mxu0 %v4572_v10 }
 0x12a   : > { %1336 = vmatprep.mubr.bf16.mxu0 %v4575_v11 }
 0x131   : > { %1337 = vmatmul.mubr.bf16.gmra.mrb[68].mxu0 %v4574_v16  ;;  %v4597_v16 = vcombine.high %v474_v8, %v475_v9  ;;  %v480_v9 = vld [vmem:[%s5590_s11 + $0x1f0] sm:$0xff] }
 0x132   : > { %1346 = vmatprep.mubr.bf16.mxu0 %v4577_v17 }
 0x139   : > { %1347 = vmatmul.mubr.bf16.gmra.mrb[72].mxu0 %v4576_v20 }
 0x13a   : > { %1356 = vmatprep.mubr.bf16.mxu0 %v4579_v21 }
 0x141   : > { %1357 = vmatmul.mubr.bf16.gmra.mrb[76].mxu0 %v4578_v26  ;;  %v477_v26 = vld [vmem:[%s5590_s11 + $0x1d8] sm:$0xff] }
 0x142   : > { %1366 = vmatprep.mubr.bf16.mxu0 %v4581_v27  ;;  %v4599_v35 = vcombine.high %v476_v25, %v477_v26  ;;  %v4598_v54 = vcombine.low %v476_v25, %v477_v26  ;;  %v5000_v25 = vld [vmem:[#allocation7 + $0xdc] ss:$12 sps:$4 sm:$0xff]  }
 0x149   : > { %1367 = vmatmul.mubr.bf16.gmra.mrb[80].mxu0 %v4580_v30 }
 0x14a   : > { %1376 = vmatprep.mubr.bf16.mxu0 %v4583_v31 }
 0x151   : > { %1377 = vmatmul.mubr.bf16.gmra.mrb[84].mxu0 %v4582_v36 }
 0x152   : > { %1386 = vmatprep.mubr.bf16.mxu0 %v4585_v37 }
 0x159   : > { %1387 = vmatmul.mubr.bf16.gmra.mrb[88].mxu0 %v4584_v40  ;;  %v4994_v40 = vld [vmem:[#allocation7 + $0xc0] ss:$12 sps:$4 sm:$0xff]  }
 0x15a   : > { %1396 = vmatprep.mubr.bf16.mxu0 %v4587_v41  ;;  %v4996_v41 = vld [vmem:[#allocation7 + $0xc4] ss:$12 sps:$4 sm:$0xff]  }
 0x15b   : > { %2781 = vmatprep.subr.bf16.mxu0 %v4996_v41 }
 0x15c   : > { %2782 = vmatpush1.bf16.msra.mxu0 %v4994_v40 }
 0x15d   : > { %2783 = vmatprep.subr.bf16.mxu0 %v5000_v25 }
 0x161   : > { %1397 = vmatmul.mubr.bf16.gmra.mrb[92].mxu0 %v4586_v46 }
 0x162   : > { %1406 = vmatprep.mubr.bf16.mxu0 %v4589_v47  ;;  %v478_v47 = vld [vmem:[%s5590_s11 + $0x1e0] sm:$0xff] }
 0x163   : > { %v4601_v57 = vcombine.high %v478_v47, %v479_v48 }
 0x169   : > { %1407 = vmatmul.mubr.bf16.gmra.mrb[96].mxu0 %v4588_v50 }
 0x16a   : > { %1416 = vmatprep.mubr.bf16.mxu0 %v4591_v51  ;;  %v4973_v51 = vld [vmem:[#allocation7 + $0x38] ss:$12 sps:$4 sm:$0xff]  }
 0x171   : > { %1417 = vmatmul.mubr.bf16.gmra.mrb[100].mxu0 %v4590_v56 }
 0x172   : > { %1426 = vmatprep.mubr.bf16.mxu0 %v4593_v58 }
 0x179   : > { %1427 = vmatmul.mubr.bf16.gmra.mrb[104].mxu0 %v4592_v63  ;;  %v4977_v63 = vld [vmem:[#allocation7 + $0x50] ss:$12 sps:$4 sm:$0xff]  }
 0x17a   : > { %1436 = vmatprep.mubr.bf16.mxu0 %v4595_v3 }
 0x17c   : > { %v1168_v10 = vpop.f32.mrb[0].mxu0 }
 0x17d   : > { %v1169_v11 = vadd.f32 %v1168_v10, %v5661_v6  ;;  %v1170_v12 = vpop.f32.mrb[1].mxu0  ;;  %v481_v10 = vld [vmem:[%s5590_s11 + $0x1f8] sm:$0xff] }
 0x17e   : > { %v1171_v14 = vadd.f32 %v1170_v12, %v5664_v7  ;;  %v1172_v15 = vpop.f32.mrb[2].mxu0 }
 0x17f   : > { %v1173_v17 = vadd.f32 %v1172_v15, %v5661_v6  ;;  %v1174_v18 = vpop.f32.mrb[3].mxu0  ;;  %v1487_v20 = vmax.f32 %v1169_v11, 0.0 }
 0x180   : > { %v1175_v19 = vadd.f32 %v1174_v18, %v5664_v7  ;;  %v1488_v22 = vmax.f32 %v1171_v14, 0.0 }
 0x181   : > { %v1489_v21 = vmax.f32 %v1173_v17, 0.0  ;;  %1437 = vmatmul.mubr.bf16.gmra.mrb[108].mxu0 %v4594_v13  ;;  %v4981_v13 = vld [vmem:[#allocation7 + $0x68] ss:$12 sps:$4 sm:$0xff]  }
 0x182   : > { %v1490_v23 = vmax.f32 %v1175_v19, 0.0  ;;  %1446 = vmatprep.mubr.bf16.mxu0 %v4597_v16  ;;  %v4600_v16 = vcombine.low %v478_v47, %v479_v48  ;;  %v4603_v19 = vcombine.high %v480_v9, %v481_v10 }
 0x183   : > { %v1615_v24 = vpack.c.bf16 %v1489_v21, %v1487_v20 }
 0x184   : > { %v1178_v27 = vpop.f32.mrb[4].mxu0  ;;  %v1616_v28 = vpack.c.bf16 %v1490_v23, %v1488_v22  ;;  %v4985_v23 = vld [vmem:[#allocation7 + $0x80] ss:$12 sps:$4 sm:$0xff]  }
 0x185   : > { %v1179_v30 = vadd.f32 %v1178_v27, %v5661_v6  ;;  %v1180_v31 = vpop.f32.mrb[5].mxu0 }
 0x186   : > { %v1181_v33 = vadd.f32 %v1180_v31, %v5664_v7  ;;  %v1182_v34 = vpop.f32.mrb[6].mxu0  ;;  %1915 = vmatprep.mubr.bf16.mxu1 %v1616_v28 }
 0x187   : > { %v1183_v36 = vadd.f32 %v1182_v34, %v5661_v6  ;;  %v1184_v37 = vpop.f32.mrb[7].mxu0  ;;  %1916 = vmatmul.mubr.bf16.vlgmr.msra.gmra.mrb[0].mxu1 %v1615_v24  ;;  %v1491_v42 = vmax.f32 %v1179_v30, 0.0  ;;  %v4998_v24 = vld [vmem:[#allocation7 + $0xd8] ss:$12 sps:$4 sm:$0xff]  }
 0x188   : > { %v1185_v38 = vadd.f32 %v1184_v37, %v5664_v7  ;;  %3119 = vmatpush1.bf16.msra.mxu1 %v4957_v29  ;;  %v1492_v44 = vmax.f32 %v1181_v33, 0.0  ;;  %2784 = vmatpush1.bf16.msra.mxu0 %v4998_v24  ;;  %v4989_v33 = vld [vmem:[#allocation7 + $0x98] ss:$12 sps:$4 sm:$0xff]  }
 0x189   : > { %v1493_v43 = vmax.f32 %v1183_v36, 0.0  ;;  %1447 = vmatmul.mubr.bf16.gmra.mrb[112].mxu0 %v4596_v32  ;;  %3120 = vmatprep.subr.bf16.mxu1 %v5381_v59  ;;  %v4602_v36 = vcombine.low %v480_v9, %v481_v10  ;;  %v5005_v10 = vld [vmem:[#allocation7 + $0xf8] ss:$12 sps:$4 sm:$0xff]  }
 0x18a   : > { %v1494_v45 = vmax.f32 %v1185_v38, 0.0  ;;  %1456 = vmatprep.mubr.bf16.mxu0 %v4599_v35 }
 0x18b   : > { %v1617_v46 = vpack.c.bf16 %v1493_v43, %v1491_v42  ;;  %v4993_v42 = vld [vmem:[#allocation7 + $0xb0] ss:$12 sps:$4 sm:$0xff]  }
 0x18c   : > { %v1618_v49 = vpack.c.bf16 %v1494_v45, %v1492_v44  ;;  %v1188_v50 = vpop.f32.mrb[8].mxu0  ;;  %3121 = vmatpush1.bf16.msra.mxu1 %v4965_v39 }
 0x18d   : > { %v1189_v52 = vadd.f32 %v1188_v50, %v5661_v6  ;;  %v1190_v53 = vpop.f32.mrb[9].mxu0  ;;  %3122 = vmatprep.subr.bf16.mxu1 %v5381_v59  ;;  %v4997_v50 = vld [vmem:[#allocation7 + $0xc8] ss:$12 sps:$4 sm:$0xff]  }
 0x18e   : > { %v1191_v55 = vadd.f32 %v1190_v53, %v5664_v7  ;;  %v1192_v56 = vpop.f32.mrb[10].mxu0  ;;  %1925 = vmatprep.mubr.bf16.mxu1 %v1618_v49 }
 0x18f   : > { %v1193_v58 = vadd.f32 %v1192_v56, %v5661_v6  ;;  %v1194_v61 = vpop.f32.mrb[11].mxu0  ;;  %1926 = vmatmul.mubr.bf16.gmra.mrb[4].mxu1 %v1617_v46  ;;  %v1495_v1 = vmax.f32 %v1189_v52, 0.0 }
 0x190   : > { %v1195_v62 = vadd.f32 %v1194_v61, %v5664_v7  ;;  %3123 = vmatpush1.bf16.msra.mxu1 %v4973_v51  ;;  %v1496_v4 = vmax.f32 %v1191_v55, 0.0  ;;  %v5002_v61 = vld [vmem:[#allocation7 + $0xf0] ss:$12 sps:$4 sm:$0xff]  }
 0x191   : > { %v1497_v3 = vmax.f32 %v1193_v58, 0.0  ;;  %1457 = vmatmul.mubr.bf16.gmra.mrb[116].mxu0 %v4598_v54  ;;  %3124 = vmatprep.subr.bf16.mxu1 %v5381_v59  ;;  %v5001_v58 = vld [vmem:[#allocation7 + $0xe0] ss:$12 sps:$4 sm:$0xff]  }
 0x192   : > { %v1498_v5 = vmax.f32 %v1195_v62, 0.0  ;;  %1466 = vmatprep.mubr.bf16.mxu0 %v4601_v57  ;;  %v5004_v62 = vld [vmem:[#allocation7 + $0xf4] ss:$12 sps:$4 sm:$0xff]  }
 0x193   : > { %v1619_v8 = vpack.c.bf16 %v1497_v3, %v1495_v1  ;;  %2785 = vmatprep.subr.bf16.mxu0 %v5004_v62 }
 0x194   : > { %v1620_v11 = vpack.c.bf16 %v1498_v5, %v1496_v4  ;;  %v1198_v12 = vpop.f32.mrb[12].mxu0  ;;  %3125 = vmatpush1.bf16.msra.mxu1 %v4977_v63  ;;  %2786 = vmatpush1.bf16.msra.mxu0 %v5002_v61 }
 0x195   : > { %v1199_v14 = vadd.f32 %v1198_v12, %v5661_v6  ;;  %v1200_v15 = vpop.f32.mrb[13].mxu0  ;;  %3126 = vmatprep.subr.bf16.mxu1 %v5381_v59 }
 0x196   : > { %v1201_v17 = vadd.f32 %v1200_v15, %v5664_v7  ;;  %v1202_v18 = vpop.f32.mrb[14].mxu0  ;;  %1935 = vmatprep.mubr.bf16.mxu1 %v1620_v11 }
 0x197   : > { %v1203_v20 = vadd.f32 %v1202_v18, %v5661_v6  ;;  %v1204_v21 = vpop.f32.mrb[15].mxu0  ;;  %1936 = vmatmul.mubr.bf16.gmra.mrb[8].mxu1 %v1619_v8  ;;  %v1499_v26 = vmax.f32 %v1199_v14, 0.0 }
 0x198   : > { %v1205_v22 = vadd.f32 %v1204_v21, %v5664_v7  ;;  %3127 = vmatpush1.bf16.msra.mxu1 %v4981_v13  ;;  %v1500_v28 = vmax.f32 %v1201_v17, 0.0 }
 0x199   : > { %v1501_v27 = vmax.f32 %v1203_v20, 0.0  ;;  %1467 = vmatmul.mubr.bf16.gmra.mrb[120].mxu0 %v4600_v16  ;;  %3128 = vmatprep.subr.bf16.mxu1 %v5381_v59 }
 0x19a   : > { %v1502_v29 = vmax.f32 %v1205_v22, 0.0  ;;  %1476 = vmatprep.mubr.bf16.mxu0 %v4603_v19 }
 0x19b   : > { %v1621_v30 = vpack.c.bf16 %v1501_v27, %v1499_v26 }
 0x19c   : > { %v1622_v31 = vpack.c.bf16 %v1502_v29, %v1500_v28  ;;  %v1208_v32 = vpop.f32.mrb[16].mxu0  ;;  %3129 = vmatpush1.bf16.msra.mxu1 %v4985_v23 }
 0x19d   : > { %v1209_v34 = vadd.f32 %v1208_v32, %v5661_v6  ;;  %v1210_v35 = vpop.f32.mrb[17].mxu0  ;;  %3130 = vmatprep.subr.bf16.mxu1 %v5381_v59  ;;  %v5006_v32 = vld [vmem:[#allocation7 + $0x108] ss:$12 sps:$4 sm:$0xff]  }
 0x19e   : > { %v1211_v37 = vadd.f32 %v1210_v35, %v5664_v7  ;;  %v1212_v38 = vpop.f32.mrb[18].mxu0  ;;  %1945 = vmatprep.mubr.bf16.mxu1 %v1622_v31 }
 0x19f   : > { %v1213_v39 = vadd.f32 %v1212_v38, %v5661_v6  ;;  %v1214_v40 = vpop.f32.mrb[19].mxu0  ;;  %1946 = vmatmul.mubr.bf16.gmra.mrb[12].mxu1 %v1621_v30  ;;  %v1503_v43 = vmax.f32 %v1209_v34, 0.0 }
 0x1a0   : > { %v1215_v41 = vadd.f32 %v1214_v40, %v5664_v7  ;;  %3131 = vmatpush1.bf16.msra.mxu1 %v4989_v33  ;;  %v1504_v45 = vmax.f32 %v1211_v37, 0.0  ;;  %v5008_v33 = vld [vmem:[#allocation7 + $0x10c] ss:$12 sps:$4 sm:$0xff]  }
 0x1a1   : > { %v1505_v44 = vmax.f32 %v1213_v39, 0.0  ;;  %1477 = vmatmul.mubr.bf16.gmra.mrb[124].mxu0 %v4602_v36  ;;  %3132 = vmatprep.subr.bf16.mxu1 %v5381_v59 }
 0x1a2   : > { %v1506_v46 = vmax.f32 %v1215_v41, 0.0  ;;  %2787 = vmatprep.subr.bf16.mxu0 %v5008_v33  ;;  %v5009_v41 = vld [vmem:[#allocation7 + $0x110] ss:$12 sps:$4 sm:$0xff]  }
 0x1a3   : > { %v1623_v47 = vpack.c.bf16 %v1505_v44, %v1503_v43  ;;  %2788 = vmatpush1.bf16.msra.mxu0 %v5006_v32 }
 0x1a4   : > { %v1624_v48 = vpack.c.bf16 %v1506_v46, %v1504_v45  ;;  %v1218_v49 = vpop.f32.mrb[20].mxu0  ;;  %3133 = vmatpush1.bf16.msra.mxu1 %v4993_v42 }
 0x1a5   : > { %v1219_v51 = vadd.f32 %v1218_v49, %v5661_v6  ;;  %v1220_v52 = vpop.f32.mrb[21].mxu0  ;;  %3134 = vmatprep.subr.bf16.mxu1 %v5381_v59 }
 0x1a6   : > { %v1221_v53 = vadd.f32 %v1220_v52, %v5664_v7  ;;  %v1222_v54 = vpop.f32.mrb[22].mxu0  ;;  %1955 = vmatprep.mubr.bf16.mxu1 %v1624_v48 }
 0x1a7   : > { %v1223_v55 = vadd.f32 %v1222_v54, %v5661_v6  ;;  %v1224_v56 = vpop.f32.mrb[23].mxu0  ;;  %1956 = vmatmul.mubr.bf16.gmra.mrb[16].mxu1 %v1623_v47  ;;  %v1507_v63 = vmax.f32 %v1219_v51, 0.0 }
 0x1a8   : > { %v1225_v57 = vadd.f32 %v1224_v56, %v5664_v7  ;;  %3135 = vmatpush1.bf16.msra.mxu1 %v4997_v50  ;;  %v1508_v3 = vmax.f32 %v1221_v53, 0.0 }
 0x1a9   : > { %v1509_v1 = vmax.f32 %v1223_v55, 0.0  ;;  %3136 = vmatprep.subr.bf16.mxu1 %v5381_v59 }
 0x1aa   : > { %v1510_v4 = vmax.f32 %v1225_v57, 0.0 }
 0x1ab   : > { %v1625_v5 = vpack.c.bf16 %v1509_v1, %v1507_v63 }
 0x1ac   : > { %v1626_v8 = vpack.c.bf16 %v1510_v4, %v1508_v3  ;;  %v1228_v9 = vpop.f32.mrb[24].mxu0  ;;  %3137 = vmatpush1.bf16.msra.mxu1 %v5001_v58  ;;  %v5010_v3 = vld [vmem:[#allocation7 + $0x120] ss:$12 sps:$4 sm:$0xff]   ;;  %v5012_v4 = vld [vmem:[#allocation7 + $0x124] ss:$12 sps:$4 sm:$0xff]  }
 0x1ad   : > { %v1229_v11 = vadd.f32 %v1228_v9, %v5661_v6  ;;  %v1230_v12 = vpop.f32.mrb[25].mxu0  ;;  %3138 = vmatprep.subr.bf16.mxu1 %v5381_v59  ;;  %2789 = vmatprep.subr.bf16.mxu0 %v5012_v4 }
 0x1ae   : > { %v1231_v13 = vadd.f32 %v1230_v12, %v5664_v7  ;;  %v1232_v14 = vpop.f32.mrb[26].mxu0  ;;  %1965 = vmatprep.mubr.bf16.mxu1 %v1626_v8  ;;  %2790 = vmatpush1.bf16.msra.mxu0 %v5010_v3 }
 0x1af   : > { %v1233_v15 = vadd.f32 %v1232_v14, %v5661_v6  ;;  %v1234_v16 = vpop.f32.mrb[27].mxu0  ;;  %1966 = vmatmul.mubr.bf16.gmra.mrb[20].mxu1 %v1625_v5  ;;  %v1511_v18 = vmax.f32 %v1229_v11, 0.0  ;;  %v5013_v14 = vld [vmem:[#allocation7 + $0x128] ss:$12 sps:$4 sm:$0xff]  }
 0x1b0   : > { %v1235_v17 = vadd.f32 %v1234_v16, %v5664_v7  ;;  %3139 = vmatpush1.bf16.msra.mxu1 %v5005_v10  ;;  %v1512_v20 = vmax.f32 %v1231_v13, 0.0 }
 0x1b1   : > { %v1513_v19 = vmax.f32 %v1233_v15, 0.0  ;;  %3140 = vmatprep.subr.bf16.mxu1 %v5381_v59 }
 0x1b2   : > { %v1514_v21 = vmax.f32 %v1235_v17, 0.0 }
 0x1b3   : > { %v1627_v22 = vpack.c.bf16 %v1513_v19, %v1511_v18 }
 0x1b4   : > { %v1628_v23 = vpack.c.bf16 %v1514_v21, %v1512_v20  ;;  %v1238_v24 = vpop.f32.mrb[28].mxu0  ;;  %3141 = vmatpush1.bf16.msra.mxu1 %v5009_v41 }
 0x1b5   : > { %v1239_v25 = vadd.f32 %v1238_v24, %v5661_v6  ;;  %v1240_v26 = vpop.f32.mrb[29].mxu0  ;;  %3142 = vmatprep.subr.bf16.mxu1 %v5381_v59 }
 0x1b6   : > { %v1241_v27 = vadd.f32 %v1240_v26, %v5664_v7  ;;  %v1242_v28 = vpop.f32.mrb[30].mxu0  ;;  %1975 = vmatprep.mubr.bf16.mxu1 %v1628_v23 }
 0x1b7   : > { %v1243_v29 = vadd.f32 %v1242_v28, %v5661_v6  ;;  %v1244_v30 = vpop.f32.mrb[31].mxu0  ;;  %1976 = vmatmul.mubr.bf16.gmra.mrb[24].mxu1 %v1627_v22  ;;  %v1515_v34 = vmax.f32 %v1239_v25, 0.0 }
 0x1b8   : > { %v1245_v31 = vadd.f32 %v1244_v30, %v5664_v7  ;;  %v1516_v36 = vmax.f32 %v1241_v27, 0.0  ;;  %3143 = vmatpush1.bf16.msra.mxu1 %v5013_v14 }
 0x1b9   : > { %v1517_v35 = vmax.f32 %v1243_v29, 0.0  ;;  %3144 = vmatprep.subr.bf16.mxu1 %v5381_v59 }
 0x1ba   : > { %v1518_v37 = vmax.f32 %v1245_v31, 0.0 }
 0x1bb   : > { %v1629_v38 = vpack.c.bf16 %v1517_v35, %v1515_v34  ;;  %v5016_v35 = vld [vmem:[#allocation7 + $0x13c] ss:$12 sps:$4 sm:$0xff]  }
 0x1bc   : > { %v1630_v39 = vpack.c.bf16 %v1518_v37, %v1516_v36  ;;  %v1248_v40 = vpop.f32.mrb[32].mxu0  ;;  %v5014_v37 = vld [vmem:[#allocation7 + $0x138] ss:$12 sps:$4 sm:$0xff]   ;;  %2791 = vmatprep.subr.bf16.mxu0 %v5016_v35 }
 0x1bd   : > { %v1249_v42 = vadd.f32 %v1248_v40, %v5661_v6  ;;  %v1250_v43 = vpop.f32.mrb[33].mxu0  ;;  %2792 = vmatpush1.bf16.msra.mxu0 %v5014_v37 }
 0x1be   : > { %v1251_v44 = vadd.f32 %v1250_v43, %v5664_v7  ;;  %v1252_v45 = vpop.f32.mrb[34].mxu0  ;;  %1985 = vmatprep.mubr.bf16.mxu1 %v1630_v39  ;;  %v5020_v43 = vld [vmem:[#allocation7 + $0x154] ss:$12 sps:$4 sm:$0xff]  }
 0x1bf   : > { %v1253_v46 = vadd.f32 %v1252_v45, %v5661_v6  ;;  %v1254_v47 = vpop.f32.mrb[35].mxu0  ;;  %1986 = vmatmul.mubr.bf16.gmra.mrb[28].mxu1 %v1629_v38  ;;  %v1519_v49 = vmax.f32 %v1249_v42, 0.0  ;;  %2793 = vmatprep.subr.bf16.mxu0 %v5020_v43 }
 0x1c0   : > { %v1255_v48 = vadd.f32 %v1254_v47, %v5664_v7  ;;  %v1520_v51 = vmax.f32 %v1251_v44, 0.0  ;;  %v5018_v47 = vld [vmem:[#allocation7 + $0x150] ss:$12 sps:$4 sm:$0xff]  }
 0x1c1   : > { %v1521_v50 = vmax.f32 %v1253_v46, 0.0  ;;  %v5017_v46 = vld [vmem:[#allocation7 + $0x140] ss:$12 sps:$4 sm:$0xff]   ;;  %2794 = vmatpush1.bf16.msra.mxu0 %v5018_v47 }
 0x1c2   : > { %v1522_v52 = vmax.f32 %v1255_v48, 0.0  ;;  %3145 = vmatpush1.bf16.msra.mxu1 %v5017_v46 }
 0x1c3   : > { %v1631_v53 = vpack.c.bf16 %v1521_v50, %v1519_v49  ;;  %3146 = vmatprep.subr.bf16.mxu1 %v5381_v59 }
 0x1c4   : > { %v1632_v54 = vpack.c.bf16 %v1522_v52, %v1520_v51  ;;  %v1258_v55 = vpop.f32.mrb[36].mxu0 }
 0x1c5   : > { %v1259_v56 = vadd.f32 %v1258_v55, %v5661_v6  ;;  %v1260_v57 = vpop.f32.mrb[37].mxu0 }
 0x1c6   : > { %v1261_v58 = vadd.f32 %v1260_v57, %v5664_v7  ;;  %v1262_v61 = vpop.f32.mrb[38].mxu0  ;;  %1995 = vmatprep.mubr.bf16.mxu1 %v1632_v54  ;;  %v5023_v54 = vld [vmem:[#allocation7 + $0x16c] ss:$12 sps:$4 sm:$0xff]  }
 0x1c7   : > { %v1263_v62 = vadd.f32 %v1262_v61, %v5661_v6  ;;  %v1264_v63 = vpop.f32.mrb[39].mxu0  ;;  %1996 = vmatmul.mubr.bf16.gmra.mrb[32].mxu1 %v1631_v53  ;;  %v1523_v5 = vmax.f32 %v1259_v56, 0.0  ;;  %v5021_v56 = vld [vmem:[#allocation7 + $0x168] ss:$12 sps:$4 sm:$0xff]   ;;  %2795 = vmatprep.subr.bf16.mxu0 %v5023_v54 }
 0x1c8   : > { %v1265_v1 = vadd.f32 %v1264_v63, %v5664_v7  ;;  %v1524_v9 = vmax.f32 %v1261_v58, 0.0  ;;  %2796 = vmatpush1.bf16.msra.mxu0 %v5021_v56 }
 0x1c9   : > { %v1525_v8 = vmax.f32 %v1263_v62, 0.0 }
 0x1ca   : > { %v1526_v10 = vmax.f32 %v1265_v1, 0.0 }
 0x1cb   : > { %v1633_v11 = vpack.c.bf16 %v1525_v8, %v1523_v5 }
 0x1cc   : > { %v1634_v12 = vpack.c.bf16 %v1526_v10, %v1524_v9  ;;  %v1268_v13 = vpop.f32.mrb[40].mxu0 }
 0x1cd   : > { %v1269_v15 = vadd.f32 %v1268_v13, %v5661_v6  ;;  %v1270_v16 = vpop.f32.mrb[41].mxu0 }
 0x1ce   : > { %v1271_v17 = vadd.f32 %v1270_v16, %v5664_v7  ;;  %v1272_v18 = vpop.f32.mrb[42].mxu0  ;;  %2005 = vmatprep.mubr.bf16.mxu1 %v1634_v12 }
 0x1cf   : > { %v1273_v19 = vadd.f32 %v1272_v18, %v5661_v6  ;;  %v1274_v20 = vpop.f32.mrb[43].mxu0  ;;  %2006 = vmatmul.mubr.bf16.gmra.mrb[36].mxu1 %v1633_v11  ;;  %v1527_v22 = vmax.f32 %v1269_v15, 0.0 }
 0x1d0   : > { %v1275_v21 = vadd.f32 %v1274_v20, %v5664_v7  ;;  %v1528_v24 = vmax.f32 %v1271_v17, 0.0  ;;  %v5024_v20 = vld [vmem:[#allocation7 + $0x158] ss:$12 sps:$4 sm:$0xff]  }
 0x1d1   : > { %v1529_v23 = vmax.f32 %v1273_v19, 0.0  ;;  %3147 = vmatpush1.bf16.msra.mxu1 %v5024_v20 }
 0x1d2   : > { %v1530_v25 = vmax.f32 %v1275_v21, 0.0  ;;  %3148 = vmatprep.subr.bf16.mxu1 %v5381_v59 }
 0x1d3   : > { %v1635_v26 = vpack.c.bf16 %v1529_v23, %v1527_v22 }
 0x1d4   : > { %v1636_v27 = vpack.c.bf16 %v1530_v25, %v1528_v24  ;;  %v1278_v28 = vpop.f32.mrb[44].mxu0 }
 0x1d5   : > { %v1279_v29 = vadd.f32 %v1278_v28, %v5661_v6  ;;  %v1280_v30 = vpop.f32.mrb[45].mxu0 }
 0x1d6   : > { %v1281_v31 = vadd.f32 %v1280_v30, %v5664_v7  ;;  %v1282_v32 = vpop.f32.mrb[46].mxu0  ;;  %2015 = vmatprep.mubr.bf16.mxu1 %v1636_v27 }
 0x1d7   : > { %v1283_v33 = vadd.f32 %v1282_v32, %v5661_v6  ;;  %v1284_v34 = vpop.f32.mrb[47].mxu0  ;;  %2016 = vmatmul.mubr.bf16.gmra.mrb[40].mxu1 %v1635_v26  ;;  %v1531_v38 = vmax.f32 %v1279_v29, 0.0 }
 0x1d8   : > { %v1285_v36 = vadd.f32 %v1284_v34, %v5664_v7  ;;  %v1532_v40 = vmax.f32 %v1281_v31, 0.0 }
 0x1d9   : > { %v1533_v39 = vmax.f32 %v1283_v33, 0.0 }
 0x1da   : > { %v1534_v41 = vmax.f32 %v1285_v36, 0.0 }
 0x1db   : > { %v1637_v42 = vpack.c.bf16 %v1533_v39, %v1531_v38 }
 0x1dc   : > { %v1638_v44 = vpack.c.bf16 %v1534_v41, %v1532_v40  ;;  %v1288_v45 = vpop.f32.mrb[48].mxu0 }
 0x1dd   : > { %v1289_v48 = vadd.f32 %v1288_v45, %v5661_v6  ;;  %v1290_v49 = vpop.f32.mrb[49].mxu0 }
 0x1de   : > { %v1291_v50 = vadd.f32 %v1290_v49, %v5664_v7  ;;  %v1292_v51 = vpop.f32.mrb[50].mxu0  ;;  %2025 = vmatprep.mubr.bf16.mxu1 %v1638_v44 }
 0x1df   : > { %v1293_v52 = vadd.f32 %v1292_v51, %v5661_v6  ;;  %v1294_v53 = vpop.f32.mrb[51].mxu0  ;;  %2026 = vmatmul.mubr.bf16.gmra.mrb[44].mxu1 %v1637_v42  ;;  %v1535_v57 = vmax.f32 %v1289_v48, 0.0  ;;  %v5025_v48 = vld [vmem:[#allocation7 + $0x170] ss:$12 sps:$4 sm:$0xff]  }
 0x1e0   : > { %v1295_v55 = vadd.f32 %v1294_v53, %v5664_v7  ;;  %v1536_v61 = vmax.f32 %v1291_v50, 0.0  ;;  %3149 = vmatpush1.bf16.msra.mxu1 %v5025_v48 }
 0x1e1   : > { %v1537_v58 = vmax.f32 %v1293_v52, 0.0 }
 0x1e2   : > { %v1538_v62 = vmax.f32 %v1295_v55, 0.0 }
 0x1e3   : > { %v1639_v63 = vpack.c.bf16 %v1537_v58, %v1535_v57 }
 0x1e4   : > { %v1640_v1 = vpack.c.bf16 %v1538_v62, %v1536_v61  ;;  %v1298_v3 = vpop.f32.mrb[52].mxu0 }
 0x1e5   : > { %v1299_v4 = vadd.f32 %v1298_v3, %v5661_v6  ;;  %v1300_v5 = vpop.f32.mrb[53].mxu0 }
 0x1e6   : > { %v1301_v8 = vadd.f32 %v1300_v5, %v5664_v7  ;;  %v1302_v9 = vpop.f32.mrb[54].mxu0  ;;  %2035 = vmatprep.mubr.bf16.mxu1 %v1640_v1 }
 0x1e7   : > { %v1303_v10 = vadd.f32 %v1302_v9, %v5661_v6  ;;  %v1304_v11 = vpop.f32.mrb[55].mxu0  ;;  %2036 = vmatmul.mubr.bf16.gmra.mrb[48].mxu1 %v1639_v63  ;;  %v1539_v13 = vmax.f32 %v1299_v4, 0.0 }
 0x1e8   : > { %v1305_v12 = vadd.f32 %v1304_v11, %v5664_v7  ;;  %v1540_v15 = vmax.f32 %v1301_v8, 0.0 }
 0x1e9   : > { %v1541_v14 = vmax.f32 %v1303_v10, 0.0 }
 0x1ea   : > { %v1542_v16 = vmax.f32 %v1305_v12, 0.0 }
 0x1eb   : > { %v1641_v17 = vpack.c.bf16 %v1541_v14, %v1539_v13 }
 0x1ec   : > { %v1642_v18 = vpack.c.bf16 %v1542_v16, %v1540_v15  ;;  %v1308_v19 = vpop.f32.mrb[56].mxu0 }
 0x1ed   : > { %v1309_v21 = vadd.f32 %v1308_v19, %v5661_v6  ;;  %v1310_v22 = vpop.f32.mrb[57].mxu0 }
 0x1ee   : > { %v1311_v23 = vadd.f32 %v1310_v22, %v5664_v7  ;;  %v1312_v24 = vpop.f32.mrb[58].mxu0  ;;  %2045 = vmatprep.mubr.bf16.mxu1 %v1642_v18 }
 0x1ef   : > { %v1313_v25 = vadd.f32 %v1312_v24, %v5661_v6  ;;  %v1314_v26 = vpop.f32.mrb[59].mxu0  ;;  %2046 = vmatmul.mubr.bf16.gmra.mrb[52].mxu1 %v1641_v17  ;;  %v1543_v28 = vmax.f32 %v1309_v21, 0.0 }
 0x1f0   : > { %v1315_v27 = vadd.f32 %v1314_v26, %v5664_v7  ;;  %v1544_v30 = vmax.f32 %v1311_v23, 0.0 }
 0x1f1   : > { %v1545_v29 = vmax.f32 %v1313_v25, 0.0 }
 0x1f2   : > { %v1546_v31 = vmax.f32 %v1315_v27, 0.0 }
 0x1f3   : > { %v1643_v32 = vpack.c.bf16 %v1545_v29, %v1543_v28 }
 0x1f4   : > { %v1644_v33 = vpack.c.bf16 %v1546_v31, %v1544_v30  ;;  %v1318_v34 = vpop.f32.mrb[60].mxu0 }
 0x1f5   : > { %v1319_v35 = vadd.f32 %v1318_v34, %v5661_v6  ;;  %v1320_v36 = vpop.f32.mrb[61].mxu0 }
 0x1f6   : > { %v1321_v37 = vadd.f32 %v1320_v36, %v5664_v7  ;;  %v1322_v38 = vpop.f32.mrb[62].mxu0  ;;  %2055 = vmatprep.mubr.bf16.mxu1 %v1644_v33 }
 0x1f7   : > { %v1323_v39 = vadd.f32 %v1322_v38, %v5661_v6  ;;  %v1324_v40 = vpop.f32.mrb[63].mxu0  ;;  %2056 = vmatmul.mubr.bf16.gmra.mrb[56].mxu1 %v1643_v32  ;;  %v1547_v41 = vmax.f32 %v1319_v35, 0.0 }
 0x1f8   : > { %v1325_v59 = vadd.f32 %v1324_v40, %v5664_v7  ;;  %v1548_v43 = vmax.f32 %v1321_v37, 0.0 }
 0x1f9   : > { %v1549_v42 = vmax.f32 %v1323_v39, 0.0 }
 0x1fa   : > { %v1550_v44 = vmax.f32 %v1325_v59, 0.0 }
 0x1fb   : > { %v1645_v45 = vpack.c.bf16 %v1549_v42, %v1547_v41 }
 0x1fc   : > { %v1646_v46 = vpack.c.bf16 %v1550_v44, %v1548_v43  ;;  %v1328_v47 = vpop.f32.mrb[64].mxu0 }
 0x1fd   : > { %v1329_v49 = vadd.f32 %v1328_v47, %v5661_v6  ;;  %v1330_v50 = vpop.f32.mrb[65].mxu0 }
 0x1fe   : > { %v1331_v51 = vadd.f32 %v1330_v50, %v5664_v7  ;;  %v1332_v52 = vpop.f32.mrb[66].mxu0  ;;  %2065 = vmatprep.mubr.bf16.mxu1 %v1646_v46 }
 0x1ff   : > { %v1333_v53 = vadd.f32 %v1332_v52, %v5661_v6  ;;  %v1334_v54 = vpop.f32.mrb[67].mxu0  ;;  %2066 = vmatmul.mubr.bf16.gmra.mrb[60].mxu1 %v1645_v45  ;;  %v1551_v56 = vmax.f32 %v1329_v49, 0.0 }
 0x200   : > { %v1335_v55 = vadd.f32 %v1334_v54, %v5664_v7  ;;  %v1552_v58 = vmax.f32 %v1331_v51, 0.0 }
 0x201   : > { %v1553_v57 = vmax.f32 %v1333_v53, 0.0 }
 0x202   : > { %v1554_v61 = vmax.f32 %v1335_v55, 0.0 }
 0x203   : > { %v1647_v62 = vpack.c.bf16 %v1553_v57, %v1551_v56 }
 0x204   : > { %v1648_v63 = vpack.c.bf16 %v1554_v61, %v1552_v58  ;;  %v1338_v1 = vpop.f32.mrb[68].mxu0 }
 0x205   : > { %v1339_v3 = vadd.f32 %v1338_v1, %v5661_v6  ;;  %v1340_v4 = vpop.f32.mrb[69].mxu0 }
 0x206   : > { %v1341_v5 = vadd.f32 %v1340_v4, %v5664_v7  ;;  %v1342_v8 = vpop.f32.mrb[70].mxu0  ;;  %2075 = vmatprep.mubr.bf16.mxu1 %v1648_v63 }
 0x207   : > { %v1343_v9 = vadd.f32 %v1342_v8, %v5661_v6  ;;  %v1344_v10 = vpop.f32.mrb[71].mxu0  ;;  %2076 = vmatmul.mubr.bf16.gmra.mrb[64].mxu1 %v1647_v62  ;;  %v1555_v12 = vmax.f32 %v1339_v3, 0.0 }
 0x208   : > { %v1345_v11 = vadd.f32 %v1344_v10, %v5664_v7  ;;  %v1556_v14 = vmax.f32 %v1341_v5, 0.0 }
 0x209   : > { %v1557_v13 = vmax.f32 %v1343_v9, 0.0 }
 0x20a   : > { %v1558_v15 = vmax.f32 %v1345_v11, 0.0 }
 0x20b   : > { %v1649_v16 = vpack.c.bf16 %v1557_v13, %v1555_v12 }
 0x20c   : > { %v1650_v17 = vpack.c.bf16 %v1558_v15, %v1556_v14  ;;  %v1348_v18 = vpop.f32.mrb[72].mxu0 }
 0x20d   : > { %v1349_v19 = vadd.f32 %v1348_v18, %v5661_v6  ;;  %v1350_v20 = vpop.f32.mrb[73].mxu0 }
 0x20e   : > { %v1351_v21 = vadd.f32 %v1350_v20, %v5664_v7  ;;  %v1352_v22 = vpop.f32.mrb[74].mxu0  ;;  %2085 = vmatprep.mubr.bf16.mxu1 %v1650_v17 }
 0x20f   : > { %v1353_v23 = vadd.f32 %v1352_v22, %v5661_v6  ;;  %v1354_v24 = vpop.f32.mrb[75].mxu0  ;;  %2086 = vmatmul.mubr.bf16.gmra.mrb[68].mxu1 %v1649_v16  ;;  %v1559_v26 = vmax.f32 %v1349_v19, 0.0 }
 0x210   : > { %v1355_v25 = vadd.f32 %v1354_v24, %v5664_v7  ;;  %v1560_v28 = vmax.f32 %v1351_v21, 0.0 }
 0x211   : > { %v1561_v27 = vmax.f32 %v1353_v23, 0.0 }
 0x212   : > { %v1562_v29 = vmax.f32 %v1355_v25, 0.0 }
 0x213   : > { %v1651_v30 = vpack.c.bf16 %v1561_v27, %v1559_v26 }
 0x214   : > { %v1652_v31 = vpack.c.bf16 %v1562_v29, %v1560_v28  ;;  %v1358_v32 = vpop.f32.mrb[76].mxu0 }
 0x215   : > { %v1359_v33 = vadd.f32 %v1358_v32, %v5661_v6  ;;  %v1360_v34 = vpop.f32.mrb[77].mxu0 }
 0x216   : > { %v1361_v35 = vadd.f32 %v1360_v34, %v5664_v7  ;;  %v1362_v36 = vpop.f32.mrb[78].mxu0  ;;  %2095 = vmatprep.mubr.bf16.mxu1 %v1652_v31 }
 0x217   : > { %v1363_v37 = vadd.f32 %v1362_v36, %v5661_v6  ;;  %v1364_v38 = vpop.f32.mrb[79].mxu0  ;;  %2096 = vmatmul.mubr.bf16.gmra.mrb[72].mxu1 %v1651_v30  ;;  %v1563_v40 = vmax.f32 %v1359_v33, 0.0 }
 0x218   : > { %v1365_v39 = vadd.f32 %v1364_v38, %v5664_v7  ;;  %v1564_v41 = vmax.f32 %v1361_v35, 0.0 }
 0x219   : > { %v1565_v59 = vmax.f32 %v1363_v37, 0.0 }
 0x21a   : > { %v1566_v42 = vmax.f32 %v1365_v39, 0.0 }
 0x21b   : > { %v1653_v43 = vpack.c.bf16 %v1565_v59, %v1563_v40 }
 0x21c   : > { %v1654_v44 = vpack.c.bf16 %v1566_v42, %v1564_v41  ;;  %v1368_v45 = vpop.f32.mrb[80].mxu0 }
 0x21d   : > { %v1369_v46 = vadd.f32 %v1368_v45, %v5661_v6  ;;  %v1370_v47 = vpop.f32.mrb[81].mxu0 }
 0x21e   : > { %v1371_v48 = vadd.f32 %v1370_v47, %v5664_v7  ;;  %v1372_v49 = vpop.f32.mrb[82].mxu0  ;;  %2105 = vmatprep.mubr.bf16.mxu1 %v1654_v44 }
 0x21f   : > { %v1373_v50 = vadd.f32 %v1372_v49, %v5661_v6  ;;  %v1374_v51 = vpop.f32.mrb[83].mxu0  ;;  %2106 = vmatmul.mubr.bf16.gmra.mrb[76].mxu1 %v1653_v43  ;;  %v1567_v53 = vmax.f32 %v1369_v46, 0.0 }
 0x220   : > { %v1375_v52 = vadd.f32 %v1374_v51, %v5664_v7  ;;  %v1568_v55 = vmax.f32 %v1371_v48, 0.0 }
 0x221   : > { %v1569_v54 = vmax.f32 %v1373_v50, 0.0 }
 0x222   : > { %v1570_v56 = vmax.f32 %v1375_v52, 0.0 }
 0x223   : > { %v1655_v57 = vpack.c.bf16 %v1569_v54, %v1567_v53 }
 0x224   : > { %v1656_v58 = vpack.c.bf16 %v1570_v56, %v1568_v55  ;;  %v1378_v61 = vpop.f32.mrb[84].mxu0 }
 0x225   : > { %v1379_v62 = vadd.f32 %v1378_v61, %v5661_v6  ;;  %v1380_v63 = vpop.f32.mrb[85].mxu0 }
 0x226   : > { %v1381_v1 = vadd.f32 %v1380_v63, %v5664_v7  ;;  %v1382_v3 = vpop.f32.mrb[86].mxu0  ;;  %2115 = vmatprep.mubr.bf16.mxu1 %v1656_v58 }
 0x227   : > { %v1383_v4 = vadd.f32 %v1382_v3, %v5661_v6  ;;  %v1384_v5 = vpop.f32.mrb[87].mxu0  ;;  %2116 = vmatmul.mubr.bf16.gmra.mrb[80].mxu1 %v1655_v57  ;;  %v1571_v9 = vmax.f32 %v1379_v62, 0.0 }
 0x228   : > { %v1385_v8 = vadd.f32 %v1384_v5, %v5664_v7  ;;  %v1572_v11 = vmax.f32 %v1381_v1, 0.0 }
 0x229   : > { %v1573_v10 = vmax.f32 %v1383_v4, 0.0 }
 0x22a   : > { %v1574_v12 = vmax.f32 %v1385_v8, 0.0 }
 0x22b   : > { %v1657_v13 = vpack.c.bf16 %v1573_v10, %v1571_v9 }
 0x22c   : > { %v1658_v14 = vpack.c.bf16 %v1574_v12, %v1572_v11  ;;  %v1388_v15 = vpop.f32.mrb[88].mxu0 }
 0x22d   : > { %v1389_v16 = vadd.f32 %v1388_v15, %v5661_v6  ;;  %v1390_v17 = vpop.f32.mrb[89].mxu0 }
 0x22e   : > { %v1391_v18 = vadd.f32 %v1390_v17, %v5664_v7  ;;  %v1392_v19 = vpop.f32.mrb[90].mxu0  ;;  %2125 = vmatprep.mubr.bf16.mxu1 %v1658_v14 }
 0x22f   : > { %v1393_v20 = vadd.f32 %v1392_v19, %v5661_v6  ;;  %v1394_v21 = vpop.f32.mrb[91].mxu0  ;;  %2126 = vmatmul.mubr.bf16.gmra.mrb[84].mxu1 %v1657_v13  ;;  %v1575_v23 = vmax.f32 %v1389_v16, 0.0 }
 0x230   : > { %v1395_v22 = vadd.f32 %v1394_v21, %v5664_v7  ;;  %v1576_v25 = vmax.f32 %v1391_v18, 0.0 }
 0x231   : > { %v1577_v24 = vmax.f32 %v1393_v20, 0.0 }
 0x232   : > { %v1578_v26 = vmax.f32 %v1395_v22, 0.0 }
 0x233   : > { %v1659_v27 = vpack.c.bf16 %v1577_v24, %v1575_v23 }
 0x234   : > { %v1660_v28 = vpack.c.bf16 %v1578_v26, %v1576_v25  ;;  %v1398_v29 = vpop.f32.mrb[92].mxu0 }
 0x235   : > { %v1399_v30 = vadd.f32 %v1398_v29, %v5661_v6  ;;  %v1400_v31 = vpop.f32.mrb[93].mxu0 }
 0x236   : > { %v1401_v32 = vadd.f32 %v1400_v31, %v5664_v7  ;;  %v1402_v33 = vpop.f32.mrb[94].mxu0  ;;  %2135 = vmatprep.mubr.bf16.mxu1 %v1660_v28 }
 0x237   : > { %v1403_v34 = vadd.f32 %v1402_v33, %v5661_v6  ;;  %v1404_v35 = vpop.f32.mrb[95].mxu0  ;;  %2136 = vmatmul.mubr.bf16.gmra.mrb[88].mxu1 %v1659_v27  ;;  %v1579_v37 = vmax.f32 %v1399_v30, 0.0  ;;  %v1711_v27 = vld [vmem:[%s7712_s5] sm:$0x3] }
 0x238   : > { %v1405_v36 = vadd.f32 %v1404_v35, %v5664_v7  ;;  %v1580_v39 = vmax.f32 %v1401_v32, 0.0 }
 0x239   : > { %v1581_v38 = vmax.f32 %v1403_v34, 0.0  ;;  %v5804_v34 = vrot.slane %v1711_v27, %v5652_v0 }
 0x23a   : > { %v1582_v40 = vmax.f32 %v1405_v36, 0.0  ;;  %v5808_v36 = vrot.slane %v1711_v27, %v5658_v2 }
 0x23b   : > { %v1661_v59 = vpack.c.bf16 %v1581_v38, %v1579_v37 }
 0x23c   : > { %v1662_v41 = vpack.c.bf16 %v1582_v40, %v1580_v39  ;;  %v1408_v42 = vpop.f32.mrb[96].mxu0 }
 0x23d   : > { %v1409_v43 = vadd.f32 %v1408_v42, %v5661_v6  ;;  %v1410_v44 = vpop.f32.mrb[97].mxu0 }
 0x23e   : > { %v1411_v45 = vadd.f32 %v1410_v44, %v5664_v7  ;;  %v1412_v46 = vpop.f32.mrb[98].mxu0  ;;  %2145 = vmatprep.mubr.bf16.mxu1 %v1662_v41 }
 0x23f   : > { %v1413_v47 = vadd.f32 %v1412_v46, %v5661_v6  ;;  %v1414_v48 = vpop.f32.mrb[99].mxu0  ;;  %2146 = vmatmul.mubr.bf16.gmra.mrb[92].mxu1 %v1661_v59  ;;  %v1583_v50 = vmax.f32 %v1409_v43, 0.0 }
 0x240   : > { %v1415_v49 = vadd.f32 %v1414_v48, %v5664_v7  ;;  %v1584_v52 = vmax.f32 %v1411_v45, 0.0 }
 0x241   : > { %v1585_v51 = vmax.f32 %v1413_v47, 0.0 }
 0x242   : > { %v1586_v53 = vmax.f32 %v1415_v49, 0.0 }
 0x243   : > { %v1663_v54 = vpack.c.bf16 %v1585_v51, %v1583_v50 }
 0x244   : > { %v1664_v55 = vpack.c.bf16 %v1586_v53, %v1584_v52  ;;  %v1418_v56 = vpop.f32.mrb[100].mxu0 }
 0x245   : > { %v1419_v57 = vadd.f32 %v1418_v56, %v5661_v6  ;;  %v1420_v58 = vpop.f32.mrb[101].mxu0 }
 0x246   : > { %v1421_v61 = vadd.f32 %v1420_v58, %v5664_v7  ;;  %v1422_v62 = vpop.f32.mrb[102].mxu0  ;;  %2155 = vmatprep.mubr.bf16.mxu1 %v1664_v55 }
 0x247   : > { %v1423_v63 = vadd.f32 %v1422_v62, %v5661_v6  ;;  %v1424_v1 = vpop.f32.mrb[103].mxu0  ;;  %2156 = vmatmul.mubr.bf16.gmra.mrb[96].mxu1 %v1663_v54  ;;  %v1587_v4 = vmax.f32 %v1419_v57, 0.0 }
 0x248   : > { %v1425_v3 = vadd.f32 %v1424_v1, %v5664_v7  ;;  %v1588_v8 = vmax.f32 %v1421_v61, 0.0 }
 0x249   : > { %v1589_v5 = vmax.f32 %v1423_v63, 0.0 }
 0x24a   : > { %v1590_v9 = vmax.f32 %v1425_v3, 0.0 }
 0x24b   : > { %v1665_v10 = vpack.c.bf16 %v1589_v5, %v1587_v4 }
 0x24c   : > { %v1666_v11 = vpack.c.bf16 %v1590_v9, %v1588_v8  ;;  %v1428_v12 = vpop.f32.mrb[104].mxu0 }
 0x24d   : > { %v1429_v13 = vadd.f32 %v1428_v12, %v5661_v6  ;;  %v1430_v14 = vpop.f32.mrb[105].mxu0 }
 0x24e   : > { %v1431_v15 = vadd.f32 %v1430_v14, %v5664_v7  ;;  %v1432_v16 = vpop.f32.mrb[106].mxu0  ;;  %2165 = vmatprep.mubr.bf16.mxu1 %v1666_v11 }
 0x24f   : > { %v1433_v17 = vadd.f32 %v1432_v16, %v5661_v6  ;;  %v1434_v18 = vpop.f32.mrb[107].mxu0  ;;  %2166 = vmatmul.mubr.bf16.gmra.mrb[100].mxu1 %v1665_v10  ;;  %v1591_v20 = vmax.f32 %v1429_v13, 0.0 }
 0x250   : > { %v1435_v19 = vadd.f32 %v1434_v18, %v5664_v7  ;;  %v1592_v22 = vmax.f32 %v1431_v15, 0.0 }
 0x251   : > { %v1593_v21 = vmax.f32 %v1433_v17, 0.0 }
 0x252   : > { %v1594_v23 = vmax.f32 %v1435_v19, 0.0 }
 0x253   : > { %v1667_v24 = vpack.c.bf16 %v1593_v21, %v1591_v20 }
 0x254   : > { %v1668_v25 = vpack.c.bf16 %v1594_v23, %v1592_v22  ;;  %v1438_v26 = vpop.f32.mrb[108].mxu0 }
 0x255   : > { %v1439_v28 = vadd.f32 %v1438_v26, %v5661_v6  ;;  %v1440_v29 = vpop.f32.mrb[109].mxu0 }
 0x256   : > { %v1441_v30 = vadd.f32 %v1440_v29, %v5664_v7  ;;  %v1442_v31 = vpop.f32.mrb[110].mxu0  ;;  %2175 = vmatprep.mubr.bf16.mxu1 %v1668_v25 }
 0x257   : > { %v1443_v32 = vadd.f32 %v1442_v31, %v5661_v6  ;;  %v1444_v33 = vpop.f32.mrb[111].mxu0  ;;  %2176 = vmatmul.mubr.bf16.gmra.mrb[104].mxu1 %v1667_v24  ;;  %v1595_v37 = vmax.f32 %v1439_v28, 0.0 }
 0x258   : > { %v1445_v35 = vadd.f32 %v1444_v33, %v5664_v7  ;;  %v1596_v39 = vmax.f32 %v1441_v30, 0.0 }
 0x259   : > { %v1597_v38 = vmax.f32 %v1443_v32, 0.0 }
 0x25a   : > { %v1598_v40 = vmax.f32 %v1445_v35, 0.0  ;;  %v1917_v59 = vpop.f32.mrb[0].mxu1 }
 0x25b   : > { %v1669_v41 = vpack.c.bf16 %v1597_v38, %v1595_v37  ;;  %v1918_v42 = vadd.f32 %v1917_v59, %v5804_v34  ;;  %v1919_v43 = vpop.f32.mrb[1].mxu1 }
 0x25c   : > { %v1670_v44 = vpack.c.bf16 %v1598_v40, %v1596_v39  ;;  %v1920_v45 = vadd.f32 %v1919_v43, %v5808_v36  ;;  %v1448_v46 = vpop.f32.mrb[112].mxu0  ;;  %v1921_v47 = vpop.f32.mrb[2].mxu1 }
 0x25d   : > { %v1449_v48 = vadd.f32 %v1448_v46, %v5661_v6  ;;  %v1922_v49 = vadd.f32 %v1921_v47, %v5804_v34  ;;  %v1450_v50 = vpop.f32.mrb[113].mxu0  ;;  %v1923_v51 = vpop.f32.mrb[3].mxu1  ;;  %v2236_v55 = vmax.f32 %v1918_v42, 0.0 }
 0x25e   : > { %v1451_v52 = vadd.f32 %v1450_v50, %v5664_v7  ;;  %v1924_v53 = vadd.f32 %v1923_v51, %v5808_v36  ;;  %v1452_v54 = vpop.f32.mrb[114].mxu0  ;;  %2185 = vmatprep.mubr.bf16.mxu1 %v1670_v44  ;;  %v2237_v61 = vmax.f32 %v1920_v45, 0.0 }
 0x25f   : > { %v2238_v56 = vmax.f32 %v1922_v49, 0.0  ;;  %v1453_v57 = vadd.f32 %v1452_v54, %v5661_v6  ;;  %v1454_v58 = vpop.f32.mrb[115].mxu0  ;;  %2186 = vmatmul.mubr.bf16.gmra.mrb[108].mxu1 %v1669_v41  ;;  %v1599_v1 = vmax.f32 %v1449_v48, 0.0 }
 0x260   : > { %v2239_v62 = vmax.f32 %v1924_v53, 0.0  ;;  %v1455_v63 = vadd.f32 %v1454_v58, %v5664_v7  ;;  %v1600_v5 = vmax.f32 %v1451_v52, 0.0 }
 0x261   : > { %v5818_v3 = vpack.c.bf16 %v2238_v56, %v2236_v55  ;;  %v1601_v4 = vmax.f32 %v1453_v57, 0.0 }
 0x262   : > { %v5820_v8 = vpack.c.bf16 %v2239_v62, %v2237_v61  ;;  %v1602_v9 = vmax.f32 %v1455_v63, 0.0  ;;  %v1927_v10 = vpop.f32.mrb[4].mxu1 }
 0x263   : > { %v1671_v11 = vpack.c.bf16 %v1601_v4, %v1599_v1  ;;  %v1928_v12 = vadd.f32 %v1927_v10, %v5804_v34  ;;  %v1929_v13 = vpop.f32.mrb[5].mxu1 }
 0x264   : > { %v1672_v14 = vpack.c.bf16 %v1602_v9, %v1600_v5  ;;  %v1930_v15 = vadd.f32 %v1929_v13, %v5808_v36  ;;  %v1458_v16 = vpop.f32.mrb[116].mxu0  ;;  %v1931_v17 = vpop.f32.mrb[6].mxu1  ;;  %2797 = vmatprep.mubr.bf16.mxu0 %v5820_v8 }
 0x265   : > { %v1459_v18 = vadd.f32 %v1458_v16, %v5661_v6  ;;  %v1932_v19 = vadd.f32 %v1931_v17, %v5804_v34  ;;  %v1460_v20 = vpop.f32.mrb[117].mxu0  ;;  %v1933_v21 = vpop.f32.mrb[7].mxu1  ;;  %2798 = vmatmul.mubr.bf16.vlgmr.msra.gmra.mrb[128].mxu0 %v5818_v3  ;;  %v2240_v25 = vmax.f32 %v1928_v12, 0.0 }
 0x266   : > { %v1461_v22 = vadd.f32 %v1460_v20, %v5664_v7  ;;  %v1934_v23 = vadd.f32 %v1933_v21, %v5808_v36  ;;  %v1462_v24 = vpop.f32.mrb[118].mxu0  ;;  %2195 = vmatprep.mubr.bf16.mxu1 %v1672_v14  ;;  %v2241_v29 = vmax.f32 %v1930_v15, 0.0 }
 0x267   : > { %v2242_v26 = vmax.f32 %v1932_v19, 0.0  ;;  %v1463_v27 = vadd.f32 %v1462_v24, %v5661_v6  ;;  %v1464_v28 = vpop.f32.mrb[119].mxu0  ;;  %2196 = vmatmul.mubr.bf16.gmra.mrb[112].mxu1 %v1671_v11  ;;  %v1603_v32 = vmax.f32 %v1459_v18, 0.0 }
 0x268   : > { %v2243_v30 = vmax.f32 %v1934_v23, 0.0  ;;  %v1465_v31 = vadd.f32 %v1464_v28, %v5664_v7  ;;  %v1604_v37 = vmax.f32 %v1461_v22, 0.0 }
 0x269   : > { %v5832_v33 = vpack.c.bf16 %v2242_v26, %v2240_v25  ;;  %v1605_v35 = vmax.f32 %v1463_v27, 0.0 }
 0x26a   : > { %v5834_v38 = vpack.c.bf16 %v2243_v30, %v2241_v29  ;;  %v1606_v39 = vmax.f32 %v1465_v31, 0.0  ;;  %v1937_v40 = vpop.f32.mrb[8].mxu1 }
 0x26b   : > { %v1673_v59 = vpack.c.bf16 %v1605_v35, %v1603_v32  ;;  %v1938_v41 = vadd.f32 %v1937_v40, %v5804_v34  ;;  %v1939_v42 = vpop.f32.mrb[9].mxu1 }
 0x26c   : > { %v1674_v43 = vpack.c.bf16 %v1606_v39, %v1604_v37  ;;  %v1940_v44 = vadd.f32 %v1939_v42, %v5808_v36  ;;  %v1468_v45 = vpop.f32.mrb[120].mxu0  ;;  %v1941_v46 = vpop.f32.mrb[10].mxu1  ;;  %2807 = vmatprep.mubr.bf16.mxu0 %v5834_v38 }
 0x26d   : > { %v1469_v47 = vadd.f32 %v1468_v45, %v5661_v6  ;;  %v1942_v48 = vadd.f32 %v1941_v46, %v5804_v34  ;;  %v1470_v49 = vpop.f32.mrb[121].mxu0  ;;  %v1943_v50 = vpop.f32.mrb[11].mxu1  ;;  %2808 = vmatmul.mubr.bf16.gmra.mrb[132].mxu0 %v5832_v33  ;;  %v2244_v54 = vmax.f32 %v1938_v41, 0.0 }
 0x26e   : > { %v1471_v51 = vadd.f32 %v1470_v49, %v5664_v7  ;;  %v1944_v52 = vadd.f32 %v1943_v50, %v5808_v36  ;;  %v1472_v53 = vpop.f32.mrb[122].mxu0  ;;  %2205 = vmatprep.mubr.bf16.mxu1 %v1674_v43  ;;  %v2245_v58 = vmax.f32 %v1940_v44, 0.0 }
 0x26f   : > { %v2246_v55 = vmax.f32 %v1942_v48, 0.0  ;;  %v1473_v56 = vadd.f32 %v1472_v53, %v5661_v6  ;;  %v1474_v57 = vpop.f32.mrb[123].mxu0  ;;  %2206 = vmatmul.mubr.bf16.gmra.mrb[116].mxu1 %v1673_v59  ;;  %v1607_v63 = vmax.f32 %v1469_v47, 0.0 }
 0x270   : > { %v2247_v61 = vmax.f32 %v1944_v52, 0.0  ;;  %v1475_v62 = vadd.f32 %v1474_v57, %v5664_v7  ;;  %v1608_v5 = vmax.f32 %v1471_v51, 0.0 }
 0x271   : > { %v5846_v1 = vpack.c.bf16 %v2246_v55, %v2244_v54  ;;  %v1609_v4 = vmax.f32 %v1473_v56, 0.0 }
 0x272   : > { %v5848_v9 = vpack.c.bf16 %v2247_v61, %v2245_v58  ;;  %v1610_v10 = vmax.f32 %v1475_v62, 0.0  ;;  %v1947_v11 = vpop.f32.mrb[12].mxu1 }
 0x273   : > { %v1675_v12 = vpack.c.bf16 %v1609_v4, %v1607_v63  ;;  %v1948_v13 = vadd.f32 %v1947_v11, %v5804_v34  ;;  %v1949_v14 = vpop.f32.mrb[13].mxu1 }
 0x274   : > { %v1676_v15 = vpack.c.bf16 %v1610_v10, %v1608_v5  ;;  %v1950_v16 = vadd.f32 %v1949_v14, %v5808_v36  ;;  %v1478_v17 = vpop.f32.mrb[124].mxu0  ;;  %v1951_v18 = vpop.f32.mrb[14].mxu1  ;;  %2817 = vmatprep.mubr.bf16.mxu0 %v5848_v9 }
 0x275   : > { %v1479_v19 = vadd.f32 %v1478_v17, %v5661_v6  ;;  %v1952_v20 = vadd.f32 %v1951_v18, %v5804_v34  ;;  %v1480_v21 = vpop.f32.mrb[125].mxu0  ;;  %v1953_v22 = vpop.f32.mrb[15].mxu1  ;;  %2818 = vmatmul.mubr.bf16.gmra.mrb[136].mxu0 %v5846_v1  ;;  %v2248_v26 = vmax.f32 %v1948_v13, 0.0 }
 0x276   : > { %v1481_v23 = vadd.f32 %v1480_v21, %v5664_v7  ;;  %v1954_v24 = vadd.f32 %v1953_v22, %v5808_v36  ;;  %v1482_v25 = vpop.f32.mrb[126].mxu0  ;;  %2215 = vmatprep.mubr.bf16.mxu1 %v1676_v15  ;;  %v2249_v30 = vmax.f32 %v1950_v16, 0.0 }
 0x277   : > { %v2250_v27 = vmax.f32 %v1952_v20, 0.0  ;;  %v1483_v28 = vadd.f32 %v1482_v25, %v5661_v6  ;;  %v1484_v29 = vpop.f32.mrb[127].mxu0  ;;  %2216 = vmatmul.mubr.bf16.gmra.mrb[120].mxu1 %v1675_v12  ;;  %v1611_v35 = vmax.f32 %v1479_v19, 0.0 }
 0x278   : > { %v2251_v31 = vmax.f32 %v1954_v24, 0.0  ;;  %v1485_v32 = vadd.f32 %v1484_v29, %v5664_v7  ;;  %v1612_v40 = vmax.f32 %v1481_v23, 0.0 }
 0x279   : > { %v5860_v37 = vpack.c.bf16 %v2250_v27, %v2248_v26  ;;  %v1613_v39 = vmax.f32 %v1483_v28, 0.0 }
 0x27a   : > { %v5862_v59 = vpack.c.bf16 %v2251_v31, %v2249_v30  ;;  %v1614_v41 = vmax.f32 %v1485_v32, 0.0  ;;  %v1957_v42 = vpop.f32.mrb[16].mxu1 }
 0x27b   : > { %v1677_v43 = vpack.c.bf16 %v1613_v39, %v1611_v35  ;;  %v1958_v44 = vadd.f32 %v1957_v42, %v5804_v34  ;;  %v1959_v45 = vpop.f32.mrb[17].mxu1 }
 0x27c   : > { %v1678_v6 = vpack.c.bf16 %v1614_v41, %v1612_v40  ;;  %v1960_v46 = vadd.f32 %v1959_v45, %v5808_v36  ;;  %v1961_v47 = vpop.f32.mrb[18].mxu1  ;;  %2827 = vmatprep.mubr.bf16.mxu0 %v5862_v59 }
 0x27d   : > { %v1962_v7 = vadd.f32 %v1961_v47, %v5804_v34  ;;  %v1963_v48 = vpop.f32.mrb[19].mxu1  ;;  %2828 = vmatmul.mubr.bf16.gmra.mrb[140].mxu0 %v5860_v37  ;;  %v2252_v50 = vmax.f32 %v1958_v44, 0.0 }
 0x27e   : > { %v1964_v49 = vadd.f32 %v1963_v48, %v5808_v36  ;;  %2225 = vmatprep.mubr.bf16.mxu1 %v1678_v6  ;;  %v2253_v52 = vmax.f32 %v1960_v46, 0.0 }
 0x27f   : > { %v2254_v51 = vmax.f32 %v1962_v7, 0.0  ;;  %2226 = vmatmul.mubr.bf16.gmra.mrb[124].mxu1 %v1677_v43 }
 0x280   : > { %v2255_v53 = vmax.f32 %v1964_v49, 0.0  ;;  %3150 = vmatprep.mubr.bf16.mxu1 %v5820_v8 }
 0x281   : > { %v5871_v54 = vpack.c.bf16 %v2254_v51, %v2252_v50 }
 0x282   : > { %v5873_v55 = vpack.c.bf16 %v2255_v53, %v2253_v52  ;;  %v1967_v56 = vpop.f32.mrb[20].mxu1 }
 0x283   : > { %v1968_v57 = vadd.f32 %v1967_v56, %v5804_v34  ;;  %v1969_v58 = vpop.f32.mrb[21].mxu1 }
 0x284   : > { %v1970_v61 = vadd.f32 %v1969_v58, %v5808_v36  ;;  %v1971_v62 = vpop.f32.mrb[22].mxu1  ;;  %2837 = vmatprep.mubr.bf16.mxu0 %v5873_v55 }
 0x285   : > { %v1972_v63 = vadd.f32 %v1971_v62, %v5804_v34  ;;  %v1973_v4 = vpop.f32.mrb[23].mxu1  ;;  %2838 = vmatmul.mubr.bf16.gmra.mrb[144].mxu0 %v5871_v54  ;;  %v2256_v5 = vmax.f32 %v1968_v57, 0.0 }
 0x286   : > { %v1974_v8 = vadd.f32 %v1973_v4, %v5808_v36  ;;  %v2257_v11 = vmax.f32 %v1970_v61, 0.0 }
 0x287   : > { %v2258_v10 = vmax.f32 %v1972_v63, 0.0  ;;  %3151 = vmatmul.mubr.bf16.vlgmr.msra.gmra.mrb[128].mxu1 %v5818_v3 }
 0x288   : > { %v2259_v12 = vmax.f32 %v1974_v8, 0.0  ;;  %3158 = vmatprep.mubr.bf16.mxu1 %v5834_v38 }
 0x289   : > { %v5883_v13 = vpack.c.bf16 %v2258_v10, %v2256_v5 }
 0x28a   : > { %v5885_v14 = vpack.c.bf16 %v2259_v12, %v2257_v11  ;;  %v1977_v15 = vpop.f32.mrb[24].mxu1 }
 0x28b   : > { %v1978_v16 = vadd.f32 %v1977_v15, %v5804_v34  ;;  %v1979_v17 = vpop.f32.mrb[25].mxu1 }
 0x28c   : > { %v1980_v18 = vadd.f32 %v1979_v17, %v5808_v36  ;;  %v1981_v19 = vpop.f32.mrb[26].mxu1  ;;  %2847 = vmatprep.mubr.bf16.mxu0 %v5885_v14 }
 0x28d   : > { %v1982_v20 = vadd.f32 %v1981_v19, %v5804_v34  ;;  %v1983_v3 = vpop.f32.mrb[27].mxu1  ;;  %2848 = vmatmul.mubr.bf16.gmra.mrb[148].mxu0 %v5883_v13  ;;  %v2260_v21 = vmax.f32 %v1978_v16, 0.0 }
 0x28e   : > { %v1984_v38 = vadd.f32 %v1983_v3, %v5808_v36  ;;  %v2261_v23 = vmax.f32 %v1980_v18, 0.0 }
 0x28f   : > { %v2262_v22 = vmax.f32 %v1982_v20, 0.0  ;;  %3159 = vmatmul.mubr.bf16.gmra.mrb[132].mxu1 %v5832_v33 }
 0x290   : > { %v2263_v24 = vmax.f32 %v1984_v38, 0.0  ;;  %3166 = vmatprep.mubr.bf16.mxu1 %v5848_v9 }
 0x291   : > { %v5895_v25 = vpack.c.bf16 %v2262_v22, %v2260_v21 }
 0x292   : > { %v5897_v26 = vpack.c.bf16 %v2263_v24, %v2261_v23  ;;  %v1987_v27 = vpop.f32.mrb[28].mxu1 }
 0x293   : > { %v1988_v28 = vadd.f32 %v1987_v27, %v5804_v34  ;;  %v1989_v29 = vpop.f32.mrb[29].mxu1 }
 0x294   : > { %v1990_v30 = vadd.f32 %v1989_v29, %v5808_v36  ;;  %v1991_v31 = vpop.f32.mrb[30].mxu1  ;;  %2857 = vmatprep.mubr.bf16.mxu0 %v5897_v26 }
 0x295   : > { %v1992_v32 = vadd.f32 %v1991_v31, %v5804_v34  ;;  %v1993_v33 = vpop.f32.mrb[31].mxu1  ;;  %2858 = vmatmul.mubr.bf16.gmra.mrb[152].mxu0 %v5895_v25  ;;  %v2264_v35 = vmax.f32 %v1988_v28, 0.0 }
 0x296   : > { %v1994_v9 = vadd.f32 %v1993_v33, %v5808_v36  ;;  %v2265_v40 = vmax.f32 %v1990_v30, 0.0 }
 0x297   : > { %v2266_v39 = vmax.f32 %v1992_v32, 0.0  ;;  %3167 = vmatmul.mubr.bf16.gmra.mrb[136].mxu1 %v5846_v1 }
 0x298   : > { %v2267_v41 = vmax.f32 %v1994_v9, 0.0  ;;  %3174 = vmatprep.mubr.bf16.mxu1 %v5862_v59 }
 0x299   : > { %v5907_v42 = vpack.c.bf16 %v2266_v39, %v2264_v35 }
 0x29a   : > { %v5909_v43 = vpack.c.bf16 %v2267_v41, %v2265_v40  ;;  %v1997_v44 = vpop.f32.mrb[32].mxu1 }
 0x29b   : > { %v1998_v45 = vadd.f32 %v1997_v44, %v5804_v34  ;;  %v1999_v6 = vpop.f32.mrb[33].mxu1 }
 0x29c   : > { %v2000_v46 = vadd.f32 %v1999_v6, %v5808_v36  ;;  %v2001_v47 = vpop.f32.mrb[34].mxu1  ;;  %2867 = vmatprep.mubr.bf16.mxu0 %v5909_v43 }
 0x29d   : > { %v2002_v7 = vadd.f32 %v2001_v47, %v5804_v34  ;;  %v2003_v1 = vpop.f32.mrb[35].mxu1  ;;  %2868 = vmatmul.mubr.bf16.gmra.mrb[156].mxu0 %v5907_v42  ;;  %v2268_v48 = vmax.f32 %v1998_v45, 0.0 }
 0x29e   : > { %v2004_v59 = vadd.f32 %v2003_v1, %v5808_v36  ;;  %v2269_v50 = vmax.f32 %v2000_v46, 0.0 }
 0x29f   : > { %v2270_v49 = vmax.f32 %v2002_v7, 0.0  ;;  %3175 = vmatmul.mubr.bf16.gmra.mrb[140].mxu1 %v5860_v37 }
 0x2a0   : > { %v2271_v51 = vmax.f32 %v2004_v59, 0.0  ;;  %3182 = vmatprep.mubr.bf16.mxu1 %v5873_v55 }
 0x2a1   : > { %v5919_v52 = vpack.c.bf16 %v2270_v49, %v2268_v48 }
 0x2a2   : > { %v5921_v53 = vpack.c.bf16 %v2271_v51, %v2269_v50  ;;  %v2007_v56 = vpop.f32.mrb[36].mxu1 }
 0x2a3   : > { %v2008_v57 = vadd.f32 %v2007_v56, %v5804_v34  ;;  %v2009_v58 = vpop.f32.mrb[37].mxu1 }
 0x2a4   : > { %v2010_v61 = vadd.f32 %v2009_v58, %v5808_v36  ;;  %v2011_v62 = vpop.f32.mrb[38].mxu1  ;;  %2877 = vmatprep.mubr.bf16.mxu0 %v5921_v53 }
 0x2a5   : > { %v2012_v63 = vadd.f32 %v2011_v62, %v5804_v34  ;;  %v2013_v37 = vpop.f32.mrb[39].mxu1  ;;  %2878 = vmatmul.mubr.bf16.gmra.mrb[160].mxu0 %v5919_v52  ;;  %v2272_v4 = vmax.f32 %v2008_v57, 0.0 }
 0x2a6   : > { %v2014_v55 = vadd.f32 %v2013_v37, %v5808_v36  ;;  %v2273_v5 = vmax.f32 %v2010_v61, 0.0 }
 0x2a7   : > { %v2274_v8 = vmax.f32 %v2012_v63, 0.0  ;;  %3183 = vmatmul.mubr.bf16.gmra.mrb[144].mxu1 %v5871_v54 }
 0x2a8   : > { %v2275_v10 = vmax.f32 %v2014_v55, 0.0  ;;  %3190 = vmatprep.mubr.bf16.mxu1 %v5885_v14 }
 0x2a9   : > { %v5931_v11 = vpack.c.bf16 %v2274_v8, %v2272_v4 }
 0x2aa   : > { %v5933_v12 = vpack.c.bf16 %v2275_v10, %v2273_v5  ;;  %v2017_v15 = vpop.f32.mrb[40].mxu1 }
 0x2ab   : > { %v2018_v16 = vadd.f32 %v2017_v15, %v5804_v34  ;;  %v2019_v17 = vpop.f32.mrb[41].mxu1 }
 0x2ac   : > { %v2020_v18 = vadd.f32 %v2019_v17, %v5808_v36  ;;  %v2021_v19 = vpop.f32.mrb[42].mxu1  ;;  %2887 = vmatprep.mubr.bf16.mxu0 %v5933_v12 }
 0x2ad   : > { %v2022_v20 = vadd.f32 %v2021_v19, %v5804_v34  ;;  %v2023_v54 = vpop.f32.mrb[43].mxu1  ;;  %2888 = vmatmul.mubr.bf16.gmra.mrb[164].mxu0 %v5931_v11  ;;  %v2276_v3 = vmax.f32 %v2018_v16, 0.0 }
 0x2ae   : > { %v2024_v14 = vadd.f32 %v2023_v54, %v5808_v36  ;;  %v2277_v21 = vmax.f32 %v2020_v18, 0.0 }
 0x2af   : > { %v2278_v38 = vmax.f32 %v2022_v20, 0.0  ;;  %3191 = vmatmul.mubr.bf16.gmra.mrb[148].mxu1 %v5883_v13 }
 0x2b0   : > { %v2279_v22 = vmax.f32 %v2024_v14, 0.0  ;;  %3198 = vmatprep.mubr.bf16.mxu1 %v5897_v26 }
 0x2b1   : > { %v5943_v23 = vpack.c.bf16 %v2278_v38, %v2276_v3 }
 0x2b2   : > { %v5945_v24 = vpack.c.bf16 %v2279_v22, %v2277_v21  ;;  %v2027_v27 = vpop.f32.mrb[44].mxu1 }
 0x2b3   : > { %v2028_v28 = vadd.f32 %v2027_v27, %v5804_v34  ;;  %v2029_v29 = vpop.f32.mrb[45].mxu1 }
 0x2b4   : > { %v2030_v30 = vadd.f32 %v2029_v29, %v5808_v36  ;;  %v2031_v31 = vpop.f32.mrb[46].mxu1  ;;  %2897 = vmatprep.mubr.bf16.mxu0 %v5945_v24 }
 0x2b5   : > { %v2032_v32 = vadd.f32 %v2031_v31, %v5804_v34  ;;  %v2033_v13 = vpop.f32.mrb[47].mxu1  ;;  %2898 = vmatmul.mubr.bf16.gmra.mrb[168].mxu0 %v5943_v23  ;;  %v2280_v33 = vmax.f32 %v2028_v28, 0.0 }
 0x2b6   : > { %v2034_v26 = vadd.f32 %v2033_v13, %v5808_v36  ;;  %v2281_v35 = vmax.f32 %v2030_v30, 0.0 }
 0x2b7   : > { %v2282_v9 = vmax.f32 %v2032_v32, 0.0  ;;  %3199 = vmatmul.mubr.bf16.gmra.mrb[152].mxu1 %v5895_v25 }
 0x2b8   : > { %v2283_v39 = vmax.f32 %v2034_v26, 0.0  ;;  %3206 = vmatprep.mubr.bf16.mxu1 %v5909_v43 }
 0x2b9   : > { %v5955_v40 = vpack.c.bf16 %v2282_v9, %v2280_v33 }
 0x2ba   : > { %v5957_v41 = vpack.c.bf16 %v2283_v39, %v2281_v35  ;;  %v2037_v44 = vpop.f32.mrb[48].mxu1 }
 0x2bb   : > { %v2038_v45 = vadd.f32 %v2037_v44, %v5804_v34  ;;  %v2039_v6 = vpop.f32.mrb[49].mxu1 }
 0x2bc   : > { %v2040_v46 = vadd.f32 %v2039_v6, %v5808_v36  ;;  %v2041_v47 = vpop.f32.mrb[50].mxu1  ;;  %2907 = vmatprep.mubr.bf16.mxu0 %v5957_v41 }
 0x2bd   : > { %v2042_v7 = vadd.f32 %v2041_v47, %v5804_v34  ;;  %v2043_v25 = vpop.f32.mrb[51].mxu1  ;;  %2908 = vmatmul.mubr.bf16.gmra.mrb[172].mxu0 %v5955_v40  ;;  %v2284_v1 = vmax.f32 %v2038_v45, 0.0 }
 0x2be   : > { %v2044_v43 = vadd.f32 %v2043_v25, %v5808_v36  ;;  %v2285_v48 = vmax.f32 %v2040_v46, 0.0 }
 0x2bf   : > { %v2286_v59 = vmax.f32 %v2042_v7, 0.0  ;;  %3207 = vmatmul.mubr.bf16.gmra.mrb[156].mxu1 %v5907_v42 }
 0x2c0   : > { %v2287_v49 = vmax.f32 %v2044_v43, 0.0  ;;  %3214 = vmatprep.mubr.bf16.mxu1 %v5921_v53 }
 0x2c1   : > { %v5967_v50 = vpack.c.bf16 %v2286_v59, %v2284_v1 }
 0x2c2   : > { %v5969_v51 = vpack.c.bf16 %v2287_v49, %v2285_v48  ;;  %v2047_v56 = vpop.f32.mrb[52].mxu1 }
 0x2c3   : > { %v2048_v57 = vadd.f32 %v2047_v56, %v5804_v34  ;;  %v2049_v58 = vpop.f32.mrb[53].mxu1 }
 0x2c4   : > { %v2050_v61 = vadd.f32 %v2049_v58, %v5808_v36  ;;  %v2051_v62 = vpop.f32.mrb[54].mxu1  ;;  %2917 = vmatprep.mubr.bf16.mxu0 %v5969_v51 }
 0x2c5   : > { %v2052_v63 = vadd.f32 %v2051_v62, %v5804_v34  ;;  %v2053_v42 = vpop.f32.mrb[55].mxu1  ;;  %2918 = vmatmul.mubr.bf16.gmra.mrb[176].mxu0 %v5967_v50  ;;  %v2288_v37 = vmax.f32 %v2048_v57, 0.0 }
 0x2c6   : > { %v2054_v53 = vadd.f32 %v2053_v42, %v5808_v36  ;;  %v2289_v4 = vmax.f32 %v2050_v61, 0.0 }
 0x2c7   : > { %v2290_v55 = vmax.f32 %v2052_v63, 0.0  ;;  %3215 = vmatmul.mubr.bf16.gmra.mrb[160].mxu1 %v5919_v52 }
 0x2c8   : > { %v2291_v8 = vmax.f32 %v2054_v53, 0.0  ;;  %3222 = vmatprep.mubr.bf16.mxu1 %v5933_v12 }
 0x2c9   : > { %v5979_v5 = vpack.c.bf16 %v2290_v55, %v2288_v37 }
 0x2ca   : > { %v5981_v10 = vpack.c.bf16 %v2291_v8, %v2289_v4  ;;  %v2057_v15 = vpop.f32.mrb[56].mxu1 }
 0x2cb   : > { %v2058_v16 = vadd.f32 %v2057_v15, %v5804_v34  ;;  %v2059_v17 = vpop.f32.mrb[57].mxu1 }
 0x2cc   : > { %v2060_v18 = vadd.f32 %v2059_v17, %v5808_v36  ;;  %v2061_v19 = vpop.f32.mrb[58].mxu1  ;;  %2927 = vmatprep.mubr.bf16.mxu0 %v5981_v10 }
 0x2cd   : > { %v2062_v20 = vadd.f32 %v2061_v19, %v5804_v34  ;;  %v2063_v52 = vpop.f32.mrb[59].mxu1  ;;  %2928 = vmatmul.mubr.bf16.gmra.mrb[180].mxu0 %v5979_v5  ;;  %v2292_v54 = vmax.f32 %v2058_v16, 0.0 }
 0x2ce   : > { %v2064_v12 = vadd.f32 %v2063_v52, %v5808_v36  ;;  %v2293_v3 = vmax.f32 %v2060_v18, 0.0 }
 0x2cf   : > { %v2294_v14 = vmax.f32 %v2062_v20, 0.0  ;;  %3223 = vmatmul.mubr.bf16.gmra.mrb[164].mxu1 %v5931_v11 }
 0x2d0   : > { %v2295_v38 = vmax.f32 %v2064_v12, 0.0  ;;  %3230 = vmatprep.mubr.bf16.mxu1 %v5945_v24 }
 0x2d1   : > { %v5991_v21 = vpack.c.bf16 %v2294_v14, %v2292_v54 }
 0x2d2   : > { %v5993_v22 = vpack.c.bf16 %v2295_v38, %v2293_v3  ;;  %v2067_v27 = vpop.f32.mrb[60].mxu1 }
 0x2d3   : > { %v2068_v28 = vadd.f32 %v2067_v27, %v5804_v34  ;;  %v2069_v29 = vpop.f32.mrb[61].mxu1 }
 0x2d4   : > { %v2070_v30 = vadd.f32 %v2069_v29, %v5808_v36  ;;  %v2071_v31 = vpop.f32.mrb[62].mxu1  ;;  %2937 = vmatprep.mubr.bf16.mxu0 %v5993_v22 }
 0x2d5   : > { %v2072_v32 = vadd.f32 %v2071_v31, %v5804_v34  ;;  %v2073_v11 = vpop.f32.mrb[63].mxu1  ;;  %2938 = vmatmul.mubr.bf16.gmra.mrb[184].mxu0 %v5991_v21  ;;  %v2296_v13 = vmax.f32 %v2068_v28, 0.0 }
 0x2d6   : > { %v2074_v24 = vadd.f32 %v2073_v11, %v5808_v36  ;;  %v2297_v33 = vmax.f32 %v2070_v30, 0.0 }
 0x2d7   : > { %v2298_v26 = vmax.f32 %v2072_v32, 0.0  ;;  %3231 = vmatmul.mubr.bf16.gmra.mrb[168].mxu1 %v5943_v23 }
 0x2d8   : > { %v2299_v9 = vmax.f32 %v2074_v24, 0.0  ;;  %3238 = vmatprep.mubr.bf16.mxu1 %v5957_v41 }
 0x2d9   : > { %v6003_v35 = vpack.c.bf16 %v2298_v26, %v2296_v13 }
 0x2da   : > { %v6005_v39 = vpack.c.bf16 %v2299_v9, %v2297_v33  ;;  %v2077_v44 = vpop.f32.mrb[64].mxu1 }
 0x2db   : > { %v2078_v45 = vadd.f32 %v2077_v44, %v5804_v34  ;;  %v2079_v6 = vpop.f32.mrb[65].mxu1 }
 0x2dc   : > { %v2080_v46 = vadd.f32 %v2079_v6, %v5808_v36  ;;  %v2081_v47 = vpop.f32.mrb[66].mxu1  ;;  %2947 = vmatprep.mubr.bf16.mxu0 %v6005_v39 }
 0x2dd   : > { %v2082_v7 = vadd.f32 %v2081_v47, %v5804_v34  ;;  %v2083_v23 = vpop.f32.mrb[67].mxu1  ;;  %2948 = vmatmul.mubr.bf16.gmra.mrb[188].mxu0 %v6003_v35  ;;  %v2300_v25 = vmax.f32 %v2078_v45, 0.0 }
 0x2de   : > { %v2084_v41 = vadd.f32 %v2083_v23, %v5808_v36  ;;  %v2301_v1 = vmax.f32 %v2080_v46, 0.0 }
 0x2df   : > { %v2302_v43 = vmax.f32 %v2082_v7, 0.0  ;;  %3239 = vmatmul.mubr.bf16.gmra.mrb[172].mxu1 %v5955_v40 }
 0x2e0   : > { %v2303_v59 = vmax.f32 %v2084_v41, 0.0  ;;  %3246 = vmatprep.mubr.bf16.mxu1 %v5969_v51 }
 0x2e1   : > { %v6015_v48 = vpack.c.bf16 %v2302_v43, %v2300_v25 }
 0x2e2   : > { %v6017_v49 = vpack.c.bf16 %v2303_v59, %v2301_v1  ;;  %v2087_v56 = vpop.f32.mrb[68].mxu1 }
 0x2e3   : > { %v2088_v57 = vadd.f32 %v2087_v56, %v5804_v34  ;;  %v2089_v58 = vpop.f32.mrb[69].mxu1 }
 0x2e4   : > { %v2090_v61 = vadd.f32 %v2089_v58, %v5808_v36  ;;  %v2091_v62 = vpop.f32.mrb[70].mxu1  ;;  %2957 = vmatprep.mubr.bf16.mxu0 %v6017_v49 }
 0x2e5   : > { %v2092_v63 = vadd.f32 %v2091_v62, %v5804_v34  ;;  %v2093_v40 = vpop.f32.mrb[71].mxu1  ;;  %2958 = vmatmul.mubr.bf16.gmra.mrb[192].mxu0 %v6015_v48  ;;  %v2304_v42 = vmax.f32 %v2088_v57, 0.0 }
 0x2e6   : > { %v2094_v51 = vadd.f32 %v2093_v40, %v5808_v36  ;;  %v2305_v37 = vmax.f32 %v2090_v61, 0.0 }
 0x2e7   : > { %v2306_v53 = vmax.f32 %v2092_v63, 0.0  ;;  %3247 = vmatmul.mubr.bf16.gmra.mrb[176].mxu1 %v5967_v50 }
 0x2e8   : > { %v2307_v55 = vmax.f32 %v2094_v51, 0.0  ;;  %3254 = vmatprep.mubr.bf16.mxu1 %v5981_v10 }
 0x2e9   : > { %v6027_v4 = vpack.c.bf16 %v2306_v53, %v2304_v42 }
 0x2ea   : > { %v6029_v8 = vpack.c.bf16 %v2307_v55, %v2305_v37  ;;  %v2097_v15 = vpop.f32.mrb[72].mxu1 }
 0x2eb   : > { %v2098_v16 = vadd.f32 %v2097_v15, %v5804_v34  ;;  %v2099_v17 = vpop.f32.mrb[73].mxu1 }
 0x2ec   : > { %v2100_v18 = vadd.f32 %v2099_v17, %v5808_v36  ;;  %v2101_v19 = vpop.f32.mrb[74].mxu1  ;;  %2967 = vmatprep.mubr.bf16.mxu0 %v6029_v8 }
 0x2ed   : > { %v2102_v20 = vadd.f32 %v2101_v19, %v5804_v34  ;;  %v2103_v50 = vpop.f32.mrb[75].mxu1  ;;  %2968 = vmatmul.mubr.bf16.gmra.mrb[196].mxu0 %v6027_v4  ;;  %v2308_v52 = vmax.f32 %v2098_v16, 0.0 }
 0x2ee   : > { %v2104_v10 = vadd.f32 %v2103_v50, %v5808_v36  ;;  %v2309_v54 = vmax.f32 %v2100_v18, 0.0 }
 0x2ef   : > { %v2310_v12 = vmax.f32 %v2102_v20, 0.0  ;;  %3255 = vmatmul.mubr.bf16.gmra.mrb[180].mxu1 %v5979_v5 }
 0x2f0   : > { %v2311_v14 = vmax.f32 %v2104_v10, 0.0  ;;  %3262 = vmatprep.mubr.bf16.mxu1 %v5993_v22 }
 0x2f1   : > { %v6039_v3 = vpack.c.bf16 %v2310_v12, %v2308_v52 }
 0x2f2   : > { %v6041_v38 = vpack.c.bf16 %v2311_v14, %v2309_v54  ;;  %v2107_v27 = vpop.f32.mrb[76].mxu1 }
 0x2f3   : > { %v2108_v28 = vadd.f32 %v2107_v27, %v5804_v34  ;;  %v2109_v29 = vpop.f32.mrb[77].mxu1 }
 0x2f4   : > { %v2110_v30 = vadd.f32 %v2109_v29, %v5808_v36  ;;  %v2111_v31 = vpop.f32.mrb[78].mxu1  ;;  %2977 = vmatprep.mubr.bf16.mxu0 %v6041_v38 }
 0x2f5   : > { %v2112_v32 = vadd.f32 %v2111_v31, %v5804_v34  ;;  %v2113_v5 = vpop.f32.mrb[79].mxu1  ;;  %2978 = vmatmul.mubr.bf16.gmra.mrb[200].mxu0 %v6039_v3  ;;  %v2312_v11 = vmax.f32 %v2108_v28, 0.0 }
 0x2f6   : > { %v2114_v22 = vadd.f32 %v2113_v5, %v5808_v36  ;;  %v2313_v13 = vmax.f32 %v2110_v30, 0.0 }
 0x2f7   : > { %v2314_v24 = vmax.f32 %v2112_v32, 0.0  ;;  %3263 = vmatmul.mubr.bf16.gmra.mrb[184].mxu1 %v5991_v21 }
 0x2f8   : > { %v2315_v26 = vmax.f32 %v2114_v22, 0.0  ;;  %3270 = vmatprep.mubr.bf16.mxu1 %v6005_v39 }
 0x2f9   : > { %v6051_v33 = vpack.c.bf16 %v2314_v24, %v2312_v11 }
 0x2fa   : > { %v6053_v9 = vpack.c.bf16 %v2315_v26, %v2313_v13  ;;  %v2117_v44 = vpop.f32.mrb[80].mxu1 }
 0x2fb   : > { %v2118_v45 = vadd.f32 %v2117_v44, %v5804_v34  ;;  %v2119_v6 = vpop.f32.mrb[81].mxu1 }
 0x2fc   : > { %v2120_v46 = vadd.f32 %v2119_v6, %v5808_v36  ;;  %v2121_v47 = vpop.f32.mrb[82].mxu1  ;;  %2987 = vmatprep.mubr.bf16.mxu0 %v6053_v9 }
 0x2fd   : > { %v2122_v7 = vadd.f32 %v2121_v47, %v5804_v34  ;;  %v2123_v21 = vpop.f32.mrb[83].mxu1  ;;  %2988 = vmatmul.mubr.bf16.gmra.mrb[204].mxu0 %v6051_v33  ;;  %v2316_v23 = vmax.f32 %v2118_v45, 0.0 }
 0x2fe   : > { %v2124_v39 = vadd.f32 %v2123_v21, %v5808_v36  ;;  %v2317_v25 = vmax.f32 %v2120_v46, 0.0 }
 0x2ff   : > { %v2318_v41 = vmax.f32 %v2122_v7, 0.0  ;;  %3271 = vmatmul.mubr.bf16.gmra.mrb[188].mxu1 %v6003_v35 }
 0x300   : > { %v2319_v43 = vmax.f32 %v2124_v39, 0.0  ;;  %3278 = vmatprep.mubr.bf16.mxu1 %v6017_v49 }
 0x301   : > { %v6063_v1 = vpack.c.bf16 %v2318_v41, %v2316_v23 }
 0x302   : > { %v6065_v59 = vpack.c.bf16 %v2319_v43, %v2317_v25  ;;  %v2127_v56 = vpop.f32.mrb[84].mxu1 }
 0x303   : > { %v2128_v57 = vadd.f32 %v2127_v56, %v5804_v34  ;;  %v2129_v58 = vpop.f32.mrb[85].mxu1 }
 0x304   : > { %v2130_v61 = vadd.f32 %v2129_v58, %v5808_v36  ;;  %v2131_v62 = vpop.f32.mrb[86].mxu1  ;;  %2997 = vmatprep.mubr.bf16.mxu0 %v6065_v59 }
 0x305   : > { %v2132_v63 = vadd.f32 %v2131_v62, %v5804_v34  ;;  %v2133_v35 = vpop.f32.mrb[87].mxu1  ;;  %2998 = vmatmul.mubr.bf16.gmra.mrb[208].mxu0 %v6063_v1  ;;  %v2320_v40 = vmax.f32 %v2128_v57, 0.0 }
 0x306   : > { %v2134_v49 = vadd.f32 %v2133_v35, %v5808_v36  ;;  %v2321_v42 = vmax.f32 %v2130_v61, 0.0 }
 0x307   : > { %v2322_v51 = vmax.f32 %v2132_v63, 0.0  ;;  %3279 = vmatmul.mubr.bf16.gmra.mrb[192].mxu1 %v6015_v48 }
 0x308   : > { %v2323_v53 = vmax.f32 %v2134_v49, 0.0  ;;  %3286 = vmatprep.mubr.bf16.mxu1 %v6029_v8 }
 0x309   : > { %v6075_v37 = vpack.c.bf16 %v2322_v51, %v2320_v40 }
 0x30a   : > { %v6077_v55 = vpack.c.bf16 %v2323_v53, %v2321_v42  ;;  %v2137_v15 = vpop.f32.mrb[88].mxu1 }
 0x30b   : > { %v2138_v16 = vadd.f32 %v2137_v15, %v5804_v34  ;;  %v2139_v17 = vpop.f32.mrb[89].mxu1 }
 0x30c   : > { %v2140_v18 = vadd.f32 %v2139_v17, %v5808_v36  ;;  %v2141_v19 = vpop.f32.mrb[90].mxu1  ;;  %3007 = vmatprep.mubr.bf16.mxu0 %v6077_v55 }
 0x30d   : > { %v2142_v20 = vadd.f32 %v2141_v19, %v5804_v34  ;;  %v2143_v48 = vpop.f32.mrb[91].mxu1  ;;  %3008 = vmatmul.mubr.bf16.gmra.mrb[212].mxu0 %v6075_v37  ;;  %v2324_v50 = vmax.f32 %v2138_v16, 0.0 }
 0x30e   : > { %v2144_v8 = vadd.f32 %v2143_v48, %v5808_v36  ;;  %v2325_v52 = vmax.f32 %v2140_v18, 0.0 }
 0x30f   : > { %v2326_v10 = vmax.f32 %v2142_v20, 0.0  ;;  %3287 = vmatmul.mubr.bf16.gmra.mrb[196].mxu1 %v6027_v4 }
 0x310   : > { %v2327_v12 = vmax.f32 %v2144_v8, 0.0  ;;  %3294 = vmatprep.mubr.bf16.mxu1 %v6041_v38 }
 0x311   : > { %v6087_v54 = vpack.c.bf16 %v2326_v10, %v2324_v50 }
 0x312   : > { %v6089_v14 = vpack.c.bf16 %v2327_v12, %v2325_v52  ;;  %v2147_v27 = vpop.f32.mrb[92].mxu1 }
 0x313   : > { %v2148_v28 = vadd.f32 %v2147_v27, %v5804_v34  ;;  %v2149_v29 = vpop.f32.mrb[93].mxu1 }
 0x314   : > { %v2150_v30 = vadd.f32 %v2149_v29, %v5808_v36  ;;  %v2151_v31 = vpop.f32.mrb[94].mxu1  ;;  %3017 = vmatprep.mubr.bf16.mxu0 %v6089_v14 }
 0x315   : > { %v2152_v32 = vadd.f32 %v2151_v31, %v5804_v34  ;;  %v2153_v4 = vpop.f32.mrb[95].mxu1  ;;  %3018 = vmatmul.mubr.bf16.gmra.mrb[216].mxu0 %v6087_v54  ;;  %v2328_v5 = vmax.f32 %v2148_v28, 0.0  ;;  %v6142_v28 = vld [vmem:[%s7714_s7] sm:$0x7] }
 0x316   : > { %v2154_v38 = vadd.f32 %v2153_v4, %v5808_v36  ;;  %v2329_v11 = vmax.f32 %v2150_v30, 0.0  ;;  %v6157_v4 = vrot.slane %v6142_v28, %v5652_v0 }
 0x317   : > { %v2330_v22 = vmax.f32 %v2152_v32, 0.0  ;;  %3295 = vmatmul.mubr.bf16.gmra.mrb[200].mxu1 %v6039_v3 }
 0x318   : > { %v2331_v24 = vmax.f32 %v2154_v38, 0.0  ;;  %3302 = vmatprep.mubr.bf16.mxu1 %v6053_v9 }
 0x319   : > { %v6099_v13 = vpack.c.bf16 %v2330_v22, %v2328_v5 }
 0x31a   : > { %v6101_v26 = vpack.c.bf16 %v2331_v24, %v2329_v11  ;;  %v2157_v44 = vpop.f32.mrb[96].mxu1 }
 0x31b   : > { %v2158_v45 = vadd.f32 %v2157_v44, %v5804_v34  ;;  %v2159_v6 = vpop.f32.mrb[97].mxu1 }
 0x31c   : > { %v2160_v46 = vadd.f32 %v2159_v6, %v5808_v36  ;;  %v2161_v47 = vpop.f32.mrb[98].mxu1  ;;  %3027 = vmatprep.mubr.bf16.mxu0 %v6101_v26 }
 0x31d   : > { %v2162_v7 = vadd.f32 %v2161_v47, %v5804_v34  ;;  %v2163_v3 = vpop.f32.mrb[99].mxu1  ;;  %3028 = vmatmul.mubr.bf16.gmra.mrb[220].mxu0 %v6099_v13  ;;  %v2332_v21 = vmax.f32 %v2158_v45, 0.0  ;;  %v3407_v45 = vld [vmem:[%s6153_s26] sm:$0xff] }
 0x31e   : > { %v2164_v9 = vadd.f32 %v2163_v3, %v5808_v36  ;;  %v2333_v23 = vmax.f32 %v2160_v46, 0.0  ;;  %v3408_v3 = vld [vmem:[%s6153_s26 + $0x8] sm:$0xff] }
 0x31f   : > { %v2334_v39 = vmax.f32 %v2162_v7, 0.0  ;;  %3303 = vmatmul.mubr.bf16.gmra.mrb[204].mxu1 %v6051_v33 }
 0x320   : > { %v2335_v41 = vmax.f32 %v2164_v9, 0.0  ;;  %3310 = vmatprep.mubr.bf16.mxu1 %v6065_v59 }
 0x321   : > { %v6111_v25 = vpack.c.bf16 %v2334_v39, %v2332_v21 }
 0x322   : > { %v6113_v43 = vpack.c.bf16 %v2335_v41, %v2333_v23  ;;  %v2167_v56 = vpop.f32.mrb[100].mxu1 }
 0x323   : > { %v2168_v57 = vadd.f32 %v2167_v56, %v5804_v34  ;;  %v2169_v58 = vpop.f32.mrb[101].mxu1 }
 0x324   : > { %v2170_v61 = vadd.f32 %v2169_v58, %v5808_v36  ;;  %v2171_v62 = vpop.f32.mrb[102].mxu1  ;;  %3037 = vmatprep.mubr.bf16.mxu0 %v6113_v43 }
 0x325   : > { %v2172_v63 = vadd.f32 %v2171_v62, %v5804_v34  ;;  %v2173_v33 = vpop.f32.mrb[103].mxu1  ;;  %3038 = vmatmul.mubr.bf16.gmra.mrb[224].mxu0 %v6111_v25  ;;  %v2336_v35 = vmax.f32 %v2168_v57, 0.0 }
 0x326   : > { %v2174_v59 = vadd.f32 %v2173_v33, %v5808_v36  ;;  %v2337_v40 = vmax.f32 %v2170_v61, 0.0 }
 0x327   : > { %v2338_v49 = vmax.f32 %v2172_v63, 0.0  ;;  %3311 = vmatmul.mubr.bf16.gmra.mrb[208].mxu1 %v6063_v1 }
 0x328   : > { %v2339_v51 = vmax.f32 %v2174_v59, 0.0  ;;  %3318 = vmatprep.mubr.bf16.mxu1 %v6077_v55 }
 0x329   : > { %v6123_v42 = vpack.c.bf16 %v2338_v49, %v2336_v35 }
 0x32a   : > { %v6125_v53 = vpack.c.bf16 %v2339_v51, %v2337_v40  ;;  %v2177_v15 = vpop.f32.mrb[104].mxu1  ;;  %v3409_v40 = vld [vmem:[%s6153_s26 + $0x10] sm:$0xff] }
 0x32b   : > { %v2178_v16 = vadd.f32 %v2177_v15, %v5804_v34  ;;  %v2179_v17 = vpop.f32.mrb[105].mxu1 }
 0x32c   : > { %v2180_v18 = vadd.f32 %v2179_v17, %v5808_v36  ;;  %v2181_v19 = vpop.f32.mrb[106].mxu1  ;;  %3047 = vmatprep.mubr.bf16.mxu0 %v6125_v53 }
 0x32d   : > { %v2182_v20 = vadd.f32 %v2181_v19, %v5804_v34  ;;  %v2183_v1 = vpop.f32.mrb[107].mxu1  ;;  %3048 = vmatmul.mubr.bf16.gmra.mrb[228].mxu0 %v6123_v42  ;;  %v2340_v48 = vmax.f32 %v2178_v16, 0.0 }
 0x32e   : > { %v2184_v55 = vadd.f32 %v2183_v1, %v5808_v36  ;;  %v2341_v50 = vmax.f32 %v2180_v18, 0.0 }
 0x32f   : > { %v2342_v8 = vmax.f32 %v2182_v20, 0.0  ;;  %3319 = vmatmul.mubr.bf16.gmra.mrb[212].mxu1 %v6075_v37  ;;  %v3410_v20 = vld [vmem:[%s6153_s26 + $0x18] sm:$0xff] }
 0x330   : > { %v2343_v10 = vmax.f32 %v2184_v55, 0.0  ;;  %3326 = vmatprep.mubr.bf16.mxu1 %v6089_v14 }
 0x331   : > { %v6135_v52 = vpack.c.bf16 %v2342_v8, %v2340_v48 }
 0x332   : > { %v6137_v12 = vpack.c.bf16 %v2343_v10, %v2341_v50  ;;  %v2187_v27 = vpop.f32.mrb[108].mxu1 }
 0x333   : > { %v2188_v29 = vadd.f32 %v2187_v27, %v5804_v34  ;;  %v2189_v30 = vpop.f32.mrb[109].mxu1 }
 0x334   : > { %v2190_v37 = vadd.f32 %v2189_v30, %v5808_v36  ;;  %v2191_v31 = vpop.f32.mrb[110].mxu1  ;;  %3057 = vmatprep.mubr.bf16.mxu0 %v6137_v12 }
 0x335   : > { %v2192_v14 = vadd.f32 %v2191_v31, %v5804_v34  ;;  %v2193_v32 = vpop.f32.mrb[111].mxu1  ;;  %3058 = vmatmul.mubr.bf16.gmra.mrb[232].mxu0 %v6135_v52  ;;  %v2344_v5 = vmax.f32 %v2188_v29, 0.0 }
 0x336   : > { %v2194_v38 = vadd.f32 %v2193_v32, %v5808_v36  ;;  %v2345_v11 = vmax.f32 %v2190_v37, 0.0 }
 0x337   : > { %v2346_v22 = vmax.f32 %v2192_v14, 0.0  ;;  %3327 = vmatmul.mubr.bf16.gmra.mrb[216].mxu1 %v6087_v54 }
 0x338   : > { %v2347_v24 = vmax.f32 %v2194_v38, 0.0  ;;  %v2799_v44 = vpop.f32.mrb[128].mxu0  ;;  %3334 = vmatprep.mubr.bf16.mxu1 %v6101_v26 }
 0x339   : > { %v6163_v6 = vpack.c.bf16 %v2346_v22, %v2344_v5  ;;  %v2800_v46 = vadd.f32 %v2799_v44, %v6157_v4  ;;  %v6166_v47 = vpop.f32.mrb[129].mxu0  ;;  %v3411_v5 = vld [vmem:[%s6153_s26 + $0x20] sm:$0xff] }
 0x33a   : > { %v6168_v0 = vpack.c.bf16 %v2347_v24, %v2345_v11  ;;  %v2197_v54 = vpop.f32.mrb[112].mxu1  ;;  %v2803_v7 = vpop.f32.mrb[130].mxu0 }
 0x33b   : > { %v3471_v26 = vadd.f32 %v3407_v45, %v2800_v46  ;;  %v2198_v9 = vadd.f32 %v2197_v54, %v5804_v34  ;;  %v2804_v21 = vadd.f32 %v2803_v7, %v6157_v4  ;;  %v2199_v39 = vpop.f32.mrb[113].mxu1  ;;  %v6179_v23 = vpop.f32.mrb[131].mxu0  ;;  %v3412_v54 = vld [vmem:[%s6153_s26 + $0x28] sm:$0xff] }
 0x33c   : > { %v2200_v41 = vadd.f32 %v2199_v39, %v5808_v36  ;;  %v2201_v56 = vpop.f32.mrb[114].mxu1  ;;  %3067 = vmatprep.mubr.bf16.mxu0 %v6168_v0 }
 0x33d   : > { %3536 = vst.msk [vmem:[%s6174_s30] sm:$0xff] %vm3535_vm0, %v3471_v26  ;;  %v3472_v57 = vadd.f32 %v3408_v3, %v2804_v21  ;;  %v2202_v58 = vadd.f32 %v2201_v56, %v5804_v34  ;;  %v2203_v61 = vpop.f32.mrb[115].mxu1  ;;  %3068 = vmatmul.mubr.bf16.gmra.mrb[236].mxu0 %v6163_v6  ;;  %v2348_v63 = vmax.f32 %v2198_v9, 0.0 }
 0x33e   : > { %v2204_v62 = vadd.f32 %v2203_v61, %v5808_v36  ;;  %v2349_v59 = vmax.f32 %v2200_v41, 0.0 }
 0x33f   : > { %3537 = vst.msk [vmem:[%s6174_s30 + $0x8] sm:$0xff] %vm3535_vm0, %v3472_v57  ;;  %v2350_v33 = vmax.f32 %v2202_v58, 0.0  ;;  %3335 = vmatmul.mubr.bf16.gmra.mrb[220].mxu1 %v6099_v13 }
 0x340   : > { %v2351_v35 = vmax.f32 %v2204_v62, 0.0  ;;  %v2809_v49 = vpop.f32.mrb[132].mxu0  ;;  %3342 = vmatprep.mubr.bf16.mxu1 %v6113_v43 }
 0x341   : > { %v6193_v51 = vpack.c.bf16 %v2350_v33, %v2348_v63  ;;  %v2810_v15 = vadd.f32 %v2809_v49, %v6157_v4  ;;  %v6196_v16 = vpop.f32.mrb[133].mxu0 }
 0x342   : > { %v6198_v17 = vpack.c.bf16 %v2351_v35, %v2349_v59  ;;  %v2207_v18 = vpop.f32.mrb[116].mxu1  ;;  %v2813_v19 = vpop.f32.mrb[134].mxu0  ;;  %v3413_v59 = vld [vmem:[%s6153_s26 + $0x30] sm:$0xff] }
 0x343   : > { %v3473_v13 = vadd.f32 %v3409_v40, %v2810_v15  ;;  %v2208_v1 = vadd.f32 %v2207_v18, %v5804_v34  ;;  %v2814_v55 = vadd.f32 %v2813_v19, %v6157_v4  ;;  %v2209_v48 = vpop.f32.mrb[117].mxu1  ;;  %v6203_v43 = vpop.f32.mrb[135].mxu0  ;;  %v6248_v15 = vrot.slane %v6142_v28, %v5658_v2 }
 0x344   : > { %v2210_v8 = vadd.f32 %v2209_v48, %v5808_v36  ;;  %v2211_v50 = vpop.f32.mrb[118].mxu1  ;;  %3077 = vmatprep.mubr.bf16.mxu0 %v6198_v17 }
 0x345   : > { %3538 = vst.msk [vmem:[%s6174_s30 + $0x10] sm:$0xff] %vm3535_vm0, %v3473_v13  ;;  %v3474_v10 = vadd.f32 %v3410_v20, %v2814_v55  ;;  %v2212_v27 = vadd.f32 %v2211_v50, %v5804_v34  ;;  %v2213_v29 = vpop.f32.mrb[119].mxu1  ;;  %3078 = vmatmul.mubr.bf16.gmra.mrb[240].mxu0 %v6193_v51  ;;  %v2352_v37 = vmax.f32 %v2208_v1, 0.0  ;;  %v3414_v20 = vld [vmem:[%s6153_s26 + $0x38] sm:$0xff] }
 0x346   : > { %v2214_v30 = vadd.f32 %v2213_v29, %v5808_v36  ;;  %v2353_v14 = vmax.f32 %v2210_v8, 0.0  ;;  %v2504_v8 = vsub.s32 2, %v5647_v60 }
 0x347   : > { %3539 = vst.msk [vmem:[%s6174_s30 + $0x18] sm:$0xff] %vm3535_vm0, %v3474_v10  ;;  %v2354_v31 = vmax.f32 %v2212_v27, 0.0  ;;  %3343 = vmatmul.mubr.bf16.gmra.mrb[224].mxu1 %v6111_v25 }
 0x348   : > { %v2355_v32 = vmax.f32 %v2214_v30, 0.0  ;;  %v2819_v38 = vpop.f32.mrb[136].mxu0  ;;  %3350 = vmatprep.mubr.bf16.mxu1 %v6125_v53  ;;  %v5154_v30 = vld [vmem:[%s5590_s11] sm:$0xff] }
 0x349   : > { %v6217_v22 = vpack.c.bf16 %v2354_v31, %v2352_v37  ;;  %v2820_v11 = vadd.f32 %v2819_v38, %v6157_v4  ;;  %v6220_v24 = vpop.f32.mrb[137].mxu0  ;;  %v482_v37 = vunpack.c.l.bf16 %v5154_v30  ;;  %v2802_v31 = vadd.f32 %v6166_v47, %v6248_v15 }
 0x34a   : > { %v6222_v44 = vpack.c.bf16 %v2355_v32, %v2353_v14  ;;  %v2217_v45 = vpop.f32.mrb[120].mxu1  ;;  %v2823_v46 = vpop.f32.mrb[138].mxu0 }
 0x34b   : > { %v3475_v25 = vadd.f32 %v3411_v5, %v2820_v11  ;;  %v2218_v7 = vadd.f32 %v2217_v45, %v5804_v34  ;;  %v2824_v3 = vadd.f32 %v2823_v46, %v6157_v4  ;;  %v2219_v26 = vpop.f32.mrb[121].mxu1  ;;  %v6227_v53 = vpop.f32.mrb[139].mxu0  ;;  %v3415_v45 = vld [vmem:[%s6153_s26 + $0x40] sm:$0xff] }
 0x34c   : > { %v2220_v9 = vadd.f32 %v2219_v26, %v5808_v36  ;;  %v2221_v21 = vpop.f32.mrb[122].mxu1  ;;  %3087 = vmatprep.mubr.bf16.mxu0 %v6222_v44  ;;  %v3416_v26 = vld [vmem:[%s6153_s26 + $0x48] sm:$0xff] }
 0x34d   : > { %3540 = vst.msk [vmem:[%s6174_s30 + $0x20] sm:$0xff] %vm3535_vm0, %v3475_v25  ;;  %v3476_v39 = vadd.f32 %v3412_v54, %v2824_v3  ;;  %v2222_v41 = vadd.f32 %v2221_v21, %v5804_v34  ;;  %v2223_v56 = vpop.f32.mrb[123].mxu1  ;;  %3088 = vmatmul.mubr.bf16.gmra.mrb[244].mxu0 %v6217_v22  ;;  %v2356_v58 = vmax.f32 %v2218_v7, 0.0  ;;  %v483_v54 = vunpack.c.h.bf16 %v5154_v30 }
 0x34e   : > { %v2224_v57 = vadd.f32 %v2223_v56, %v5808_v36  ;;  %v2357_v62 = vmax.f32 %v2220_v9, 0.0  ;;  %v6281_v25 = vadd.f32 %v2802_v31, %v482_v37  ;;  %v2816_v30 = vadd.f32 %v6203_v43, %v6248_v15  ;;  %v3418_v31 = vld [vmem:[%s6153_s26 + $0x58] sm:$0xff] }
 0x34f   : > { %3541 = vst.msk [vmem:[%s6174_s30 + $0x28] sm:$0xff] %vm3535_vm0, %v3476_v39  ;;  %v2358_v61 = vmax.f32 %v2222_v41, 0.0  ;;  %3351 = vmatmul.mubr.bf16.gmra.mrb[228].mxu1 %v6123_v42 }
 0x350   : > { %v2359_v63 = vmax.f32 %v2224_v57, 0.0  ;;  %v2829_v33 = vpop.f32.mrb[140].mxu0  ;;  %3358 = vmatprep.mubr.bf16.mxu1 %v6137_v12 }
 0x351   : > { %v6241_v35 = vpack.c.bf16 %v2358_v61, %v2356_v58  ;;  %v2830_v49 = vadd.f32 %v2829_v33, %v6157_v4  ;;  %v6244_v40 = vpop.f32.mrb[141].mxu0 }
 0x352   : > { %v6250_v18 = vpack.c.bf16 %v2359_v63, %v2357_v62  ;;  %v2227_v42 = vpop.f32.mrb[124].mxu1  ;;  %v2833_v19 = vpop.f32.mrb[142].mxu0 }
 0x353   : > { %v3477_v13 = vadd.f32 %v3413_v59, %v2830_v49  ;;  %v2228_v12 = vadd.f32 %v2227_v42, %v5804_v34  ;;  %v2834_v1 = vadd.f32 %v2833_v19, %v6157_v4  ;;  %v2229_v55 = vpop.f32.mrb[125].mxu1  ;;  %v6255_v48 = vpop.f32.mrb[143].mxu0  ;;  %v5156_v59 = vld [vmem:[%s5590_s11 + $0x10] sm:$0xff]  ;;  %v2812_v42 = vadd.f32 %v6196_v16, %v6248_v15 }
 0x354   : > { %v2230_v2 = vadd.f32 %v2229_v55, %v5808_v36  ;;  %v2231_v50 = vpop.f32.mrb[126].mxu1  ;;  %3097 = vmatprep.mubr.bf16.mxu0 %v6250_v18  ;;  %v486_v49 = vunpack.c.l.bf16 %v5156_v59  ;;  %v3417_v55 = vld [vmem:[%s6153_s26 + $0x50] sm:$0xff] }
 0x355   : > { %3542 = vst.msk [vmem:[%s6174_s30 + $0x30] sm:$0xff] %vm3535_vm0, %v3477_v13  ;;  %v3478_v10 = vadd.f32 %v3414_v20, %v2834_v1  ;;  %v2232_v27 = vadd.f32 %v2231_v50, %v5804_v34  ;;  %v2233_v29 = vpop.f32.mrb[127].mxu1  ;;  %3098 = vmatmul.mubr.bf16.gmra.mrb[248].mxu0 %v6241_v35  ;;  %v2360_v14 = vmax.f32 %v2228_v12, 0.0  ;;  %v6272_v34 = vrot.slane %v6142_v28, %v2504_v8 }
 0x356   : > { %v2234_v60 = vadd.f32 %v2233_v29, %v5808_v36  ;;  %v2361_v38 = vmax.f32 %v2230_v2, 0.0  ;;  %v3728_v13 = vmul.f32 %v6281_v25, %v6281_v25  ;;  %v487_v2 = vunpack.c.h.bf16 %v5156_v59 }
 0x357   : > { %3543 = vst.msk [vmem:[%s6174_s30 + $0x38] sm:$0xff] %vm3535_vm0, %v3478_v10  ;;  %v2362_v32 = vmax.f32 %v2232_v27, 0.0  ;;  %3359 = vmatmul.mubr.bf16.gmra.mrb[232].mxu1 %v6135_v52  ;;  %v5155_v52 = vld [vmem:[%s5590_s11 + $0x8] sm:$0xff]  ;;  %v6321_v10 = vadd.f32 %v2812_v42, %v486_v49  ;;  %v5157_v27 = vld [vmem:[%s5590_s11 + $0x18] sm:$0xff] }
 0x358   : > { %v2363_v5 = vmax.f32 %v2234_v60, 0.0  ;;  %v2839_v11 = vpop.f32.mrb[144].mxu0  ;;  %3366 = vmatprep.mubr.bf16.mxu1 %v6168_v0  ;;  %v484_v7 = vunpack.c.l.bf16 %v5155_v52  ;;  %v485_v21 = vunpack.c.h.bf16 %v5155_v52  ;;  %v2806_v0 = vadd.f32 %v6179_v23, %v6248_v15 }
 0x359   : > { %v6276_v47 = vpack.c.bf16 %v2362_v32, %v2360_v14  ;;  %v2840_v36 = vadd.f32 %v2839_v11, %v6157_v4  ;;  %v6279_v46 = vpop.f32.mrb[145].mxu0  ;;  %v488_v29 = vunpack.c.l.bf16 %v5157_v27  ;;  %v489_v60 = vunpack.c.h.bf16 %v5157_v27 }
 0x35a   : > { %v6284_v28 = vpack.c.bf16 %v2363_v5, %v2361_v38  ;;  %v2843_v3 = vpop.f32.mrb[146].mxu0  ;;  %v3152_v9 = vpop.f32.mrb[128].mxu1  ;;  %v6303_v19 = vadd.f32 %v2806_v0, %v484_v7 }
 0x35b   : > { %v3479_v39 = vadd.f32 %v3415_v45, %v2840_v36  ;;  %v2844_v41 = vadd.f32 %v2843_v3, %v6157_v4  ;;  %v3153_v56 = vadd.f32 %v3152_v9, %v6272_v34  ;;  %v6291_v57 = vpop.f32.mrb[147].mxu0  ;;  %v3154_v58 = vpop.f32.mrb[129].mxu1  ;;  %v3732_v9 = vmul.f32 %v6321_v10, %v6321_v10 }
 0x35c   : > { %3107 = vmatprep.mubr.bf16.mxu0 %v6284_v28  ;;  %v3155_v61 = vpop.f32.mrb[130].mxu1  ;;  %v3730_v45 = vmul.f32 %v6303_v19, %v6303_v19  ;;  %v5159_v58 = vld [vmem:[%s5590_s11 + $0x28] sm:$0xff] }
 0x35d   : > { %3544 = vst.msk [vmem:[%s6174_s30 + $0x40] sm:$0xff] %vm3535_vm0, %v3479_v39  ;;  %v3480_v62 = vadd.f32 %v3416_v26, %v2844_v41  ;;  %v6296_v63 = vadd.f32 %v3153_v56, %v483_v54  ;;  %v3156_v23 = vadd.f32 %v3155_v61, %v6272_v34  ;;  %3108 = vmatmul.mubr.bf16.gmra.mrb[252].mxu0 %v6276_v47  ;;  %v3157_v33 = vpop.f32.mrb[131].mxu1  ;;  %v492_v61 = vunpack.c.l.bf16 %v5159_v58 }
 0x35e   : > { %v6338_v26 = vadd.f32 %v2816_v30, %v488_v29  ;;  %v2822_v39 = vadd.f32 %v6220_v24, %v6248_v15  ;;  %v3419_v33 = vld [vmem:[%s6153_s26 + $0x60] sm:$0xff] }
 0x35f   : > { %3545 = vst.msk [vmem:[%s6174_s30 + $0x48] sm:$0xff] %vm3535_vm0, %v3480_v62  ;;  %v6307_v20 = vadd.f32 %v3156_v23, %v485_v21  ;;  %3367 = vmatmul.mubr.bf16.gmra.mrb[236].mxu1 %v6163_v6  ;;  %v3729_v12 = vmul.f32 %v6296_v63, %v6296_v63  ;;  %v5158_v21 = vld [vmem:[%s5590_s11 + $0x20] sm:$0xff]  ;;  %v2826_v62 = vadd.f32 %v6227_v53, %v6248_v15 }
 0x360   : > { %v2849_v1 = vpop.f32.mrb[148].mxu0  ;;  %3374 = vmatprep.mubr.bf16.mxu1 %v6198_v17  ;;  %v490_v0 = vunpack.c.l.bf16 %v5158_v21  ;;  %v491_v49 = vunpack.c.h.bf16 %v5158_v21  ;;  %v3734_v53 = vmul.f32 %v6338_v26, %v6338_v26 }
 0x361   : > { %v2850_v16 = vadd.f32 %v2849_v1, %v6157_v4  ;;  %v6317_v8 = vpop.f32.mrb[149].mxu0  ;;  %v3856_v50 = vadd.f32 %v3729_v12, %v3728_v13  ;;  %v3731_v6 = vmul.f32 %v6307_v20, %v6307_v20  ;;  %v3420_v12 = vld [vmem:[%s6153_s26 + $0x68] sm:$0xff]  ;;  %v6371_v29 = vadd.f32 %v2826_v62, %v492_v61 }
 0x362   : > { %v2853_v37 = vpop.f32.mrb[150].mxu0  ;;  %v3160_v17 = vpop.f32.mrb[132].mxu1 }
 0x363   : > { %v3481_v14 = vadd.f32 %v3417_v55, %v2850_v16  ;;  %v2854_v32 = vadd.f32 %v2853_v37, %v6157_v4  ;;  %v3161_v38 = vadd.f32 %v3160_v17, %v6272_v34  ;;  %v6329_v5 = vpop.f32.mrb[151].mxu0  ;;  %v3162_v11 = vpop.f32.mrb[133].mxu1  ;;  %3857 = vadd.xlane.f32.xlu0 %v3856_v50  ;;  %v3859_v3 = vadd.f32 %v3731_v6, %v3730_v45 }
 0x364   : > { %v3163_v36 = vpop.f32.mrb[134].mxu1  ;;  %v493_v55 = vunpack.c.h.bf16 %v5159_v58  ;;  %v6365_v16 = vadd.f32 %v2822_v39, %v490_v0  ;;  %v2832_v11 = vadd.f32 %v6244_v40, %v6248_v15  ;;  %v3738_v21 = vmul.f32 %v6371_v29, %v6371_v29 }
 0x365   : > { %3546 = vst.msk [vmem:[%s6174_s30 + $0x50] sm:$0xff] %vm3535_vm0, %v3481_v14  ;;  %v3482_v43 = vadd.f32 %v3418_v31, %v2854_v32  ;;  %v6335_v54 = vadd.f32 %v3161_v38, %v487_v2  ;;  %v3164_v52 = vadd.f32 %v3163_v36, %v6272_v34  ;;  %v3165_v7 = vpop.f32.mrb[135].mxu1  ;;  %v5160_v32 = vld [vmem:[%s5590_s11 + $0x30] sm:$0xff] }
 0x366   : > { %v494_v38 = vunpack.c.l.bf16 %v5160_v32  ;;  %v3736_v36 = vmul.f32 %v6365_v16, %v6365_v16  ;;  %v495_v40 = vunpack.c.h.bf16 %v5160_v32 }
 0x367   : > { %3547 = vst.msk [vmem:[%s6174_s30 + $0x58] sm:$0xff] %vm3535_vm0, %v3482_v43  ;;  %v6347_v41 = vadd.f32 %v3164_v52, %v489_v60  ;;  %3375 = vmatmul.mubr.bf16.gmra.mrb[240].mxu1 %v6193_v51  ;;  %3860 = vadd.xlane.f32.xlu0 %v3859_v3  ;;  %v3733_v56 = vmul.f32 %v6335_v54, %v6335_v54  ;;  %v5161_v52 = vld [vmem:[%s5590_s11 + $0x38] sm:$0xff] }
 0x368   : > { %v2859_v23 = vpop.f32.mrb[152].mxu0  ;;  %3382 = vmatprep.mubr.bf16.mxu1 %v6222_v44  ;;  %v496_v7 = vunpack.c.l.bf16 %v5161_v52  ;;  %v6402_v61 = vadd.f32 %v2832_v11, %v494_v38  ;;  %v2846_v38 = vadd.f32 %v6291_v57, %v6248_v15 }
 0x369   : > { %v2860_v24 = vadd.f32 %v2859_v23, %v6157_v4  ;;  %v6358_v59 = vpop.f32.mrb[153].mxu0  ;;  %v3862_v42 = vadd.f32 %v3733_v56, %v3732_v9  ;;  %v3735_v51 = vmul.f32 %v6347_v41, %v6347_v41  ;;  %v3421_v9 = vld [vmem:[%s6153_s26 + $0x70] sm:$0xff] }
 0x36a   : > { %v2863_v13 = vpop.f32.mrb[154].mxu0  ;;  %v3168_v1 = vpop.f32.mrb[136].mxu1 }
 0x36b   : > { %v3483_v44 = vadd.f32 %v3419_v33, %v2860_v24  ;;  %v2864_v2 = vadd.f32 %v2863_v13, %v6157_v4  ;;  %v3169_v50 = vadd.f32 %v3168_v1, %v6272_v34  ;;  %v6369_v6 = vpop.f32.mrb[155].mxu0  ;;  %v3170_v27 = vpop.f32.mrb[137].mxu1  ;;  %3863 = vadd.xlane.f32.xlu1 %v3862_v42  ;;  %v3865_v14 = vadd.f32 %v3735_v51, %v3734_v53 }
 0x36c   : > { %v3171_v30 = vpop.f32.mrb[138].mxu1  ;;  %v497_v33 = vunpack.c.h.bf16 %v5161_v52 }
 0x36d   : > { %3548 = vst.msk [vmem:[%s6174_s30 + $0x60] sm:$0xff] %vm3535_vm0, %v3483_v44  ;;  %v3484_v37 = vadd.f32 %v3420_v12, %v2864_v2  ;;  %v6375_v31 = vadd.f32 %v3169_v50, %v491_v49  ;;  %v3172_v17 = vadd.f32 %v3171_v30, %v6272_v34  ;;  %v3173_v60 = vpop.f32.mrb[139].mxu1  ;;  %v5162_v50 = vld [vmem:[%s5590_s11 + $0x40] sm:$0xff]  ;;  %v2842_v30 = vadd.f32 %v6279_v46, %v6248_v15 }
 0x36e   : > { %v498_v27 = vunpack.c.l.bf16 %v5162_v50  ;;  %v3423_v46 = vld [vmem:[%s6153_s26 + $0x80] sm:$0xff] }
 0x36f   : > { %3549 = vst.msk [vmem:[%s6174_s30 + $0x68] sm:$0xff] %vm3535_vm0, %v3484_v37  ;;  %v6383_v45 = vadd.f32 %v3172_v17, %v493_v55  ;;  %3383 = vmatmul.mubr.bf16.gmra.mrb[244].mxu1 %v6217_v22  ;;  %3866 = vadd.xlane.f32.xlu1 %v3865_v14  ;;  %v3737_v43 = vmul.f32 %v6375_v31, %v6375_v31  ;;  %v5163_v14 = vld [vmem:[%s5590_s11 + $0x48] sm:$0xff] }
 0x370   : > { %v2869_v3 = vpop.f32.mrb[156].mxu0  ;;  %3390 = vmatprep.mubr.bf16.mxu1 %v6250_v18  ;;  %v2836_v22 = vadd.f32 %v6255_v48, %v6248_v15  ;;  %v3422_v18 = vld [vmem:[%s6153_s26 + $0x78] sm:$0xff]  ;;  %v3740_v17 = vmul.f32 %v6402_v61, %v6402_v61  ;;  %v500_v32 = vunpack.c.l.bf16 %v5163_v14 }
 0x371   : > { %v2870_v0 = vadd.f32 %v2869_v3, %v6157_v4  ;;  %v6398_v39 = vpop.f32.mrb[157].mxu0  ;;  %v3868_v56 = vadd.f32 %v3737_v43, %v3736_v36  ;;  %v3739_v58 = vmul.f32 %v6383_v45, %v6383_v45  ;;  %v499_v36 = vunpack.c.h.bf16 %v5162_v50 }
 0x372   : > { %v2873_v62 = vpop.f32.mrb[158].mxu0  ;;  %v3176_v23 = vpop.f32.mrb[140].mxu1  ;;  %v6409_v1 = vadd.f32 %v2836_v22, %v496_v7  ;;  %v501_v22 = vunpack.c.h.bf16 %v5163_v14 }
 0x373   : > { %v3485_v24 = vadd.f32 %v3421_v9, %v2870_v0  ;;  %v2874_v49 = vadd.f32 %v2873_v62, %v6157_v4  ;;  %v3177_v48 = vadd.f32 %v3176_v23, %v6272_v34  ;;  %v6407_v42 = vpop.f32.mrb[159].mxu0  ;;  %v3178_v51 = vpop.f32.mrb[141].mxu1  ;;  %3869 = vadd.xlane.f32.xlu0 %v3868_v56  ;;  %v3871_v13 = vadd.f32 %v3739_v58, %v3738_v21 }
 0x374   : > { %v3179_v12 = vpop.f32.mrb[142].mxu1  ;;  %v3742_v7 = vmul.f32 %v6409_v1, %v6409_v1  ;;  %v6440_v9 = vadd.f32 %v2842_v30, %v498_v27  ;;  %v6447_v23 = vadd.f32 %v2846_v38, %v500_v32  ;;  %v5165_v27 = vld [vmem:[%s5590_s11 + $0x58] sm:$0xff]  ;;  %v2856_v32 = vadd.f32 %v6329_v5, %v6248_v15 }
 0x375   : > { %3550 = vst.msk [vmem:[%s6174_s30 + $0x70] sm:$0xff] %vm3535_vm0, %v3485_v24  ;;  %v3486_v55 = vadd.f32 %v3422_v18, %v2874_v49  ;;  %v6413_v53 = vadd.f32 %v3177_v48, %v495_v40  ;;  %v3180_v44 = vadd.f32 %v3179_v12, %v6272_v34  ;;  %v3181_v2 = vpop.f32.mrb[143].mxu1  ;;  %3872 = vadd.xlane.f32.xlu1 %v3871_v13  ;;  %v3424_v40 = vld [vmem:[%s6153_s26 + $0x88] sm:$0xff]  ;;  %v5164_v13 = vld [vmem:[%s5590_s11 + $0x50] sm:$0xff]  ;;  %v504_v30 = vunpack.c.l.bf16 %v5165_v27 }
 0x376   : > { %v502_v12 = vunpack.c.l.bf16 %v5164_v13  ;;  %v3744_v2 = vmul.f32 %v6440_v9, %v6440_v9  ;;  %v503_v14 = vunpack.c.h.bf16 %v5164_v13  ;;  %v2862_v13 = vadd.f32 %v6358_v59, %v6248_v15 }
 0x377   : > { %3551 = vst.msk [vmem:[%s6174_s30 + $0x78] sm:$0xff] %vm3535_vm0, %v3486_v55  ;;  %v6421_v37 = vadd.f32 %v3180_v44, %v497_v33  ;;  %3391 = vmatmul.mubr.bf16.gmra.mrb[248].mxu1 %v6241_v35  ;;  %v3741_v60 = vmul.f32 %v6413_v53, %v6413_v53  ;;  %v2852_v55 = vadd.f32 %v6317_v8, %v6248_v15 }
 0x378   : > { %v2879_v11 = vpop.f32.mrb[160].mxu0  ;;  %3398 = vmatprep.mubr.bf16.mxu1 %v6284_v28  ;;  %v3746_v8 = vmul.f32 %v6447_v23, %v6447_v23 }
 0x379   : > { %v2880_v43 = vadd.f32 %v2879_v11, %v6157_v4  ;;  %v6434_v35 = vpop.f32.mrb[161].mxu0  ;;  %v3874_v52 = vadd.f32 %v3741_v60, %v3740_v17  ;;  %v3743_v3 = vmul.f32 %v6421_v37, %v6421_v37  ;;  %v3425_v60 = vld [vmem:[%s6153_s26 + $0x90] sm:$0xff] }
 0x37a   : > { %v2883_v57 = vpop.f32.mrb[162].mxu0  ;;  %v3184_v21 = vpop.f32.mrb[144].mxu1 }
 0x37b   : > { %v3487_v28 = vadd.f32 %v3423_v46, %v2880_v43  ;;  %v2884_v0 = vadd.f32 %v2883_v57, %v6157_v4  ;;  %v3185_v56 = vadd.f32 %v3184_v21, %v6272_v34  ;;  %v6445_v58 = vpop.f32.mrb[163].mxu0  ;;  %v3186_v62 = vpop.f32.mrb[145].mxu1  ;;  %3875 = vadd.xlane.f32.xlu0 %v3874_v52  ;;  %v3877_v18 = vadd.f32 %v3743_v3, %v3742_v7  ;;  %v3426_v52 = vld [vmem:[%s6153_s26 + $0x98] sm:$0xff] }
 0x37c   : > { %v3187_v33 = vpop.f32.mrb[146].mxu1  ;;  %v505_v3 = vunpack.c.h.bf16 %v5165_v27 }
 0x37d   : > { %3552 = vst.msk [vmem:[%s6174_s30 + $0x80] sm:$0xff] %vm3535_vm0, %v3487_v28  ;;  %v3488_v24 = vadd.f32 %v3424_v40, %v2884_v0  ;;  %v6451_v49 = vadd.f32 %v3185_v56, %v499_v36  ;;  %v3188_v48 = vadd.f32 %v3187_v33, %v6272_v34  ;;  %v3189_v51 = vpop.f32.mrb[147].mxu1  ;;  %3878 = vadd.xlane.f32.xlu1 %v3877_v18 }
 0x37e   : > { %v6477_v36 = vadd.f32 %v2852_v55, %v502_v12  ;;  %v6484_v56 = vadd.f32 %v2856_v32, %v504_v30  ;;  %v2866_v30 = vadd.f32 %v6369_v6, %v6248_v15 }
 0x37f   : > { %3553 = vst.msk [vmem:[%s6174_s30 + $0x88] sm:$0xff] %vm3535_vm0, %v3488_v24  ;;  %v6459_v44 = vadd.f32 %v3188_v48, %v501_v22  ;;  %3399 = vmatmul.mubr.bf16.gmra.mrb[252].mxu1 %v6276_v47  ;;  %v3745_v50 = vmul.f32 %v6451_v49, %v6451_v49  ;;  %v5166_v48 = vld [vmem:[%s5590_s11 + $0x60] sm:$0xff] }
 0x380   : > { %v2889_v17 = vpop.f32.mrb[164].mxu0  ;;  %v506_v51 = vunpack.c.l.bf16 %v5166_v48  ;;  %v3748_v55 = vmul.f32 %v6477_v36, %v6477_v36 }
 0x381   : > { %v2890_v47 = vadd.f32 %v2889_v17, %v6157_v4  ;;  %v6473_v38 = vpop.f32.mrb[165].mxu0  ;;  %v3880_v11 = vadd.f32 %v3745_v50, %v3744_v2  ;;  %v3747_v46 = vmul.f32 %v6459_v44, %v6459_v44  ;;  %v5167_v50 = vld [vmem:[%s5590_s11 + $0x68] sm:$0xff] }
 0x382   : > { %v2893_v43 = vpop.f32.mrb[166].mxu0  ;;  %v3192_v7 = vpop.f32.mrb[148].mxu1  ;;  %v508_v27 = vunpack.c.l.bf16 %v5167_v50 }
 0x383   : > { %v3489_v57 = vadd.f32 %v3425_v60, %v2890_v47  ;;  %v2894_v40 = vadd.f32 %v2893_v43, %v6157_v4  ;;  %v3193_v5 = vadd.f32 %v3192_v7, %v6272_v34  ;;  %v6482_v21 = vpop.f32.mrb[167].mxu0  ;;  %v3194_v22 = vpop.f32.mrb[149].mxu1  ;;  %3881 = vadd.xlane.f32.xlu0 %v3880_v11  ;;  %v3883_v28 = vadd.f32 %v3747_v46, %v3746_v8  ;;  %v3427_v60 = vld [vmem:[%s6153_s26 + $0xa0] sm:$0xff] }
 0x384   : > { %v3195_v0 = vpop.f32.mrb[150].mxu1  ;;  %v3750_v47 = vmul.f32 %v6484_v56, %v6484_v56  ;;  %v6513_v46 = vadd.f32 %v2862_v13, %v506_v51  ;;  %v509_v7 = vunpack.c.h.bf16 %v5167_v50  ;;  %v5168_v13 = vld [vmem:[%s5590_s11 + $0x70] sm:$0xff] }
 0x385   : > { %3554 = vst.msk [vmem:[%s6174_s30 + $0x90] sm:$0xff] %vm3535_vm0, %v3489_v57  ;;  %v3490_v62 = vadd.f32 %v3426_v52, %v2894_v40  ;;  %v6488_v18 = vadd.f32 %v3193_v5, %v503_v14  ;;  %v3196_v33 = vadd.f32 %v3195_v0, %v6272_v34  ;;  %v3197_v24 = vpop.f32.mrb[151].mxu1  ;;  %3884 = vadd.xlane.f32.xlu1 %v3883_v28  ;;  %v507_v14 = vunpack.c.h.bf16 %v5166_v48  ;;  %v3428_v52 = vld [vmem:[%s6153_s26 + $0xa8] sm:$0xff] }
 0x386   : > { %v6520_v0 = vadd.f32 %v2866_v30, %v508_v27  ;;  %v3752_v27 = vmul.f32 %v6513_v46, %v6513_v46 }
 0x387   : > { %3555 = vst.msk [vmem:[%s6174_s30 + $0x98] sm:$0xff] %vm3535_vm0, %v3490_v62  ;;  %v6496_v12 = vadd.f32 %v3196_v33, %v505_v3  ;;  %v3749_v2 = vmul.f32 %v6488_v18, %v6488_v18 }
 0x388   : > { %v2899_v17 = vpop.f32.mrb[168].mxu0 }
 0x389   : > { %v2900_v59 = vadd.f32 %v2899_v17, %v6157_v4  ;;  %v6507_v8 = vpop.f32.mrb[169].mxu0  ;;  %v3886_v32 = vadd.f32 %v3749_v2, %v3748_v55  ;;  %v3751_v11 = vmul.f32 %v6496_v12, %v6496_v12  ;;  %v510_v55 = vunpack.c.l.bf16 %v5168_v13  ;;  %v5169_v17 = vld [vmem:[%s5590_s11 + $0x78] sm:$0xff] }
 0x38a   : > { %v2903_v43 = vpop.f32.mrb[170].mxu0  ;;  %v3200_v6 = vpop.f32.mrb[152].mxu1  ;;  %v2872_v2 = vadd.f32 %v6398_v39, %v6248_v15  ;;  %v2876_v39 = vadd.f32 %v6407_v42, %v6248_v15 }
 0x38b   : > { %v3491_v3 = vadd.f32 %v3427_v60, %v2900_v59  ;;  %v2904_v57 = vadd.f32 %v2903_v43, %v6157_v4  ;;  %v3201_v40 = vadd.f32 %v3200_v6, %v6272_v34  ;;  %v6518_v5 = vpop.f32.mrb[171].mxu0  ;;  %v3202_v22 = vpop.f32.mrb[153].mxu1  ;;  %3887 = vadd.xlane.f32.xlu0 %v3886_v32  ;;  %v3889_v28 = vadd.f32 %v3751_v11, %v3750_v47  ;;  %v3429_v59 = vld [vmem:[%s6153_s26 + $0xb0] sm:$0xff] }
 0x38c   : > { %v3203_v62 = vpop.f32.mrb[154].mxu1  ;;  %v512_v60 = vunpack.c.l.bf16 %v5169_v17  ;;  %v511_v32 = vunpack.c.h.bf16 %v5168_v13  ;;  %v3754_v47 = vmul.f32 %v6520_v0, %v6520_v0  ;;  %v513_v22 = vunpack.c.h.bf16 %v5169_v17 }
 0x38d   : > { %3556 = vst.msk [vmem:[%s6174_s30 + $0xa0] sm:$0xff] %vm3535_vm0, %v3491_v3  ;;  %v3492_v33 = vadd.f32 %v3428_v52, %v2904_v57  ;;  %v6524_v24 = vadd.f32 %v3201_v40, %v507_v14  ;;  %v3204_v48 = vadd.f32 %v3203_v62, %v6272_v34  ;;  %v3205_v51 = vpop.f32.mrb[155].mxu1  ;;  %3890 = vadd.xlane.f32.xlu1 %v3889_v28  ;;  %v3430_v57 = vld [vmem:[%s6153_s26 + $0xb8] sm:$0xff] }
 0x38f   : > { %3557 = vst.msk [vmem:[%s6174_s30 + $0xa8] sm:$0xff] %vm3535_vm0, %v3492_v33  ;;  %v6532_v50 = vadd.f32 %v3204_v48, %v509_v7  ;;  %v3753_v30 = vmul.f32 %v6524_v24, %v6524_v24  ;;  %v6549_v7 = vadd.f32 %v2872_v2, %v510_v55  ;;  %v6556_v55 = vadd.f32 %v2876_v39, %v512_v60  ;;  %v5171_v39 = vld [vmem:[%s5590_s11 + $0x88] sm:$0xff] }
 0x390   : > { %v2909_v14 = vpop.f32.mrb[172].mxu0 }
 0x391   : > { %v2910_v11 = vadd.f32 %v2909_v14, %v6157_v4  ;;  %v6545_v43 = vpop.f32.mrb[173].mxu0  ;;  %v3892_v52 = vadd.f32 %v3753_v30, %v3752_v27  ;;  %v3755_v6 = vmul.f32 %v6532_v50, %v6532_v50  ;;  %7795 = vst [vmem:[#allocation17_spill] sm:$0xff] %v6556_v55  ;;  %v5170_v14 = vld [vmem:[%s5590_s11 + $0x80] sm:$0xff]  ;;  %v3756_v60 = vmul.f32 %v6549_v7, %v6549_v7 }
 0x392   : > { %v2913_v3 = vpop.f32.mrb[174].mxu0  ;;  %v3208_v40 = vpop.f32.mrb[156].mxu1 }
 0x393   : > { %v3493_v28 = vadd.f32 %v3429_v59, %v2910_v11  ;;  %v2914_v62 = vadd.f32 %v2913_v3, %v6157_v4  ;;  %v3209_v42 = vadd.f32 %v3208_v40, %v6272_v34  ;;  %v6554_v33 = vpop.f32.mrb[175].mxu0  ;;  %v3210_v48 = vpop.f32.mrb[157].mxu1  ;;  %3893 = vadd.xlane.f32.xlu0 %v3892_v52  ;;  %v3895_v51 = vadd.f32 %v3755_v6, %v3754_v47 }
 0x394   : > { %v3211_v13 = vpop.f32.mrb[158].mxu1  ;;  %v514_v59 = vunpack.c.l.bf16 %v5170_v14  ;;  %v2882_v11 = vadd.f32 %v6434_v35, %v6248_v15  ;;  %v516_v52 = vunpack.c.l.bf16 %v5171_v39  ;;  %v2886_v6 = vadd.f32 %v6445_v58, %v6248_v15 }
 0x395   : > { %3558 = vst.msk [vmem:[%s6174_s30 + $0xb0] sm:$0xff] %vm3535_vm0, %v3493_v28  ;;  %v3494_v2 = vadd.f32 %v3430_v57, %v2914_v62  ;;  %v6560_v27 = vadd.f32 %v3209_v42, %v511_v32  ;;  %v3212_v30 = vadd.f32 %v3211_v13, %v6272_v34  ;;  %v3213_v17 = vpop.f32.mrb[159].mxu1  ;;  %3896 = vadd.xlane.f32.xlu1 %v3895_v51  ;;  %v3431_v57 = vld [vmem:[%s6153_s26 + $0xc0] sm:$0xff]  ;;  %v515_v40 = vunpack.c.h.bf16 %v5170_v14  ;;  %v3432_v13 = vld [vmem:[%s6153_s26 + $0xc8] sm:$0xff] }
 0x396   : > { %v3758_v62 = vmul.f32 %v6556_v55, %v6556_v55  ;;  %v6585_v48 = vadd.f32 %v2882_v11, %v514_v59 }
 0x397   : > { %3559 = vst.msk [vmem:[%s6174_s30 + $0xb8] sm:$0xff] %vm3535_vm0, %v3494_v2  ;;  %v6568_v47 = vadd.f32 %v3212_v30, %v513_v22  ;;  %v3757_v32 = vmul.f32 %v6560_v27, %v6560_v27  ;;  %v517_v2 = vunpack.c.h.bf16 %v5171_v39 }
 0x398   : > { %v2919_v3 = vpop.f32.mrb[176].mxu0  ;;  %7797 = vst [vmem:[#allocation19_spill] sm:$0xff] %v6585_v48 }
 0x399   : > { %7796 = vst [vmem:[#allocation18_spill] sm:$0xff] %v6568_v47  ;;  %v2920_v35 = vadd.f32 %v2919_v3, %v6157_v4  ;;  %v6579_v28 = vpop.f32.mrb[177].mxu0  ;;  %v3898_v22 = vadd.f32 %v3757_v32, %v3756_v60  ;;  %v3759_v42 = vmul.f32 %v6568_v47, %v6568_v47  ;;  %v6592_v47 = vadd.f32 %v2886_v6, %v516_v52 }
 0x39a   : > { %v2923_v51 = vpop.f32.mrb[178].mxu0  ;;  %v3216_v58 = vpop.f32.mrb[160].mxu1  ;;  %v3760_v6 = vmul.f32 %v6585_v48, %v6585_v48 }
 0x39b   : > { %v3495_v30 = vadd.f32 %v3431_v57, %v2920_v35  ;;  %v2924_v17 = vadd.f32 %v2923_v51, %v6157_v4  ;;  %v3217_v14 = vadd.f32 %v3216_v58, %v6272_v34  ;;  %v6590_v60 = vpop.f32.mrb[179].mxu0  ;;  %v3218_v32 = vpop.f32.mrb[161].mxu1  ;;  %3899 = vadd.xlane.f32.xlu0 %v3898_v22  ;;  %v3901_v3 = vadd.f32 %v3759_v42, %v3758_v62  ;;  %v5172_v51 = vld [vmem:[%s5590_s11 + $0x90] sm:$0xff]  ;;  %v5173_v62 = vld [vmem:[%s5590_s11 + $0x98] sm:$0xff] }
 0x39c   : > { %7798 = vst [vmem:[#allocation20_spill] sm:$0xff] %v6592_v47  ;;  %v3219_v59 = vpop.f32.mrb[162].mxu1  ;;  %v518_v58 = vunpack.c.l.bf16 %v5172_v51  ;;  %v2892_v22 = vadd.f32 %v6473_v38, %v6248_v15  ;;  %v520_v42 = vunpack.c.l.bf16 %v5173_v62  ;;  %v2896_v38 = vadd.f32 %v6482_v21, %v6248_v15 }
 0x39d   : > { %3560 = vst.msk [vmem:[%s6174_s30 + $0xc0] sm:$0xff] %vm3535_vm0, %v3495_v30  ;;  %v3496_v11 = vadd.f32 %v3432_v13, %v2924_v17  ;;  %v6596_v39 = vadd.f32 %v3217_v14, %v515_v40  ;;  %v3220_v57 = vadd.f32 %v3219_v59, %v6272_v34  ;;  %v3221_v35 = vpop.f32.mrb[163].mxu1  ;;  %3902 = vadd.xlane.f32.xlu1 %v3901_v3  ;;  %v3433_v30 = vld [vmem:[%s6153_s26 + $0xd0] sm:$0xff]  ;;  %v519_v17 = vunpack.c.h.bf16 %v5172_v51 }
 0x39e   : > { %v3762_v14 = vmul.f32 %v6592_v47, %v6592_v47  ;;  %v3434_v35 = vld [vmem:[%s6153_s26 + $0xd8] sm:$0xff] }
 0x39f   : > { %7799 = vst [vmem:[#allocation21_spill] sm:$0xff] %v6596_v39  ;;  %3561 = vst.msk [vmem:[%s6174_s30 + $0xc8] sm:$0xff] %vm3535_vm0, %v3496_v11  ;;  %v6604_v52 = vadd.f32 %v3220_v57, %v517_v2  ;;  %v3761_v40 = vmul.f32 %v6596_v39, %v6596_v39  ;;  %v6621_v11 = vadd.f32 %v2892_v22, %v518_v58  ;;  %v521_v39 = vunpack.c.h.bf16 %v5173_v62 }
 0x3a0   : > { %v2929_v13 = vpop.f32.mrb[180].mxu0  ;;  %v6628_v58 = vadd.f32 %v2896_v38, %v520_v42  ;;  %v5175_v42 = vld [vmem:[%s5590_s11 + $0xa8] sm:$0xff] }
 0x3a1   : > { %7800 = vst [vmem:[#allocation22_spill] sm:$0xff] %v6604_v52  ;;  %v2930_v2 = vadd.f32 %v2929_v13, %v6157_v4  ;;  %v6617_v32 = vpop.f32.mrb[181].mxu0  ;;  %v3904_v3 = vadd.f32 %v3761_v40, %v3760_v6  ;;  %v3763_v59 = vmul.f32 %v6604_v52, %v6604_v52  ;;  %7801 = vst [vmem:[#allocation23_spill] sm:$0xff] %v6621_v11 }
 0x3a2   : > { %v2933_v57 = vpop.f32.mrb[182].mxu0  ;;  %v3224_v51 = vpop.f32.mrb[164].mxu1  ;;  %7802 = vst [vmem:[#allocation24_spill] sm:$0xff] %v6628_v58 }
 0x3a3   : > { %v3497_v47 = vadd.f32 %v3433_v30, %v2930_v2  ;;  %v2934_v48 = vadd.f32 %v2933_v57, %v6157_v4  ;;  %v3225_v21 = vadd.f32 %v3224_v51, %v6272_v34  ;;  %v6626_v13 = vpop.f32.mrb[183].mxu0  ;;  %v3226_v6 = vpop.f32.mrb[165].mxu1  ;;  %3905 = vadd.xlane.f32.xlu0 %v3904_v3  ;;  %v3907_v40 = vadd.f32 %v3763_v59, %v3762_v14  ;;  %v5174_v57 = vld [vmem:[%s5590_s11 + $0xa0] sm:$0xff] }
 0x3a4   : > { %v3227_v52 = vpop.f32.mrb[166].mxu1  ;;  %v522_v51 = vunpack.c.l.bf16 %v5174_v57  ;;  %v2902_v3 = vadd.f32 %v6507_v8, %v6248_v15  ;;  %v3435_v59 = vld [vmem:[%s6153_s26 + $0xe0] sm:$0xff]  ;;  %v3766_v6 = vmul.f32 %v6628_v58, %v6628_v58 }
 0x3a5   : > { %3562 = vst.msk [vmem:[%s6174_s30 + $0xd0] sm:$0xff] %vm3535_vm0, %v3497_v47  ;;  %v3498_v22 = vadd.f32 %v3434_v35, %v2934_v48  ;;  %v6632_v62 = vadd.f32 %v3225_v21, %v519_v17  ;;  %v3228_v30 = vadd.f32 %v3227_v52, %v6272_v34  ;;  %v3229_v2 = vpop.f32.mrb[167].mxu1  ;;  %3908 = vadd.xlane.f32.xlu1 %v3907_v40  ;;  %v524_v52 = vunpack.c.l.bf16 %v5175_v42 }
 0x3a6   : > { %v3764_v47 = vmul.f32 %v6621_v11, %v6621_v11  ;;  %v2906_v17 = vadd.f32 %v6518_v5, %v6248_v15  ;;  %v523_v35 = vunpack.c.h.bf16 %v5174_v57  ;;  %v3436_v2 = vld [vmem:[%s6153_s26 + $0xe8] sm:$0xff] }
 0x3a7   : > { %7803 = vst [vmem:[#allocation25_spill] sm:$0xff] %v6632_v62  ;;  %3563 = vst.msk [vmem:[%s6174_s30 + $0xd8] sm:$0xff] %vm3535_vm0, %v3498_v22  ;;  %v6640_v14 = vadd.f32 %v3228_v30, %v521_v39  ;;  %v3765_v48 = vmul.f32 %v6632_v62, %v6632_v62  ;;  %v6657_v22 = vadd.f32 %v2902_v3, %v522_v51  ;;  %v525_v62 = vunpack.c.h.bf16 %v5175_v42 }
 0x3a8   : > { %v2939_v38 = vpop.f32.mrb[184].mxu0 }
 0x3a9   : > { %7804 = vst [vmem:[#allocation26_spill] sm:$0xff] %v6640_v14  ;;  %v2940_v8 = vadd.f32 %v2939_v38, %v6157_v4  ;;  %v6651_v21 = vpop.f32.mrb[185].mxu0  ;;  %v3910_v39 = vadd.f32 %v3765_v48, %v3764_v47  ;;  %v3767_v40 = vmul.f32 %v6640_v14, %v6640_v14  ;;  %7805 = vst [vmem:[#allocation27_spill] sm:$0xff] %v6657_v22 }
 0x3aa   : > { %v2943_v30 = vpop.f32.mrb[186].mxu0  ;;  %v3232_v5 = vpop.f32.mrb[168].mxu1  ;;  %v6664_v14 = vadd.f32 %v2906_v17, %v524_v52  ;;  %v3768_v17 = vmul.f32 %v6657_v22, %v6657_v22 }
 0x3ab   : > { %v3499_v57 = vadd.f32 %v3435_v59, %v2940_v8  ;;  %v2944_v38 = vadd.f32 %v2943_v30, %v6157_v4  ;;  %v3233_v11 = vadd.f32 %v3232_v5, %v6272_v34  ;;  %v6662_v47 = vpop.f32.mrb[187].mxu0  ;;  %v3234_v48 = vpop.f32.mrb[169].mxu1  ;;  %3911 = vadd.xlane.f32.xlu0 %v3910_v39  ;;  %v3913_v58 = vadd.f32 %v3767_v40, %v3766_v6  ;;  %v5176_v30 = vld [vmem:[%s5590_s11 + $0xb0] sm:$0xff] }
 0x3ac   : > { %7806 = vst [vmem:[#allocation28_spill] sm:$0xff] %v6664_v14  ;;  %v3235_v51 = vpop.f32.mrb[170].mxu1  ;;  %v526_v5 = vunpack.c.l.bf16 %v5176_v30  ;;  %v2912_v39 = vadd.f32 %v6545_v43, %v6248_v15  ;;  %v2916_v43 = vadd.f32 %v6554_v33, %v6248_v15 }
 0x3ad   : > { %3564 = vst.msk [vmem:[%s6174_s30 + $0xe0] sm:$0xff] %vm3535_vm0, %v3499_v57  ;;  %v3500_v3 = vadd.f32 %v3436_v2, %v2944_v38  ;;  %v6668_v42 = vadd.f32 %v3233_v11, %v523_v35  ;;  %v3236_v59 = vadd.f32 %v3235_v51, %v6272_v34  ;;  %v3237_v8 = vpop.f32.mrb[171].mxu1  ;;  %3914 = vadd.xlane.f32.xlu1 %v3913_v58  ;;  %v5177_v35 = vld [vmem:[%s5590_s11 + $0xb8] sm:$0xff]  ;;  %v3437_v58 = vld [vmem:[%s6153_s26 + $0xf0] sm:$0xff]  ;;  %v527_v2 = vunpack.c.h.bf16 %v5176_v30 }
 0x3ae   : > { %v528_v6 = vunpack.c.l.bf16 %v5177_v35  ;;  %v3770_v57 = vmul.f32 %v6664_v14, %v6664_v14  ;;  %v3438_v8 = vld [vmem:[%s6153_s26 + $0xf8] sm:$0xff] }
 0x3af   : > { %7807 = vst [vmem:[#allocation29_spill] sm:$0xff] %v6668_v42  ;;  %3565 = vst.msk [vmem:[%s6174_s30 + $0xe8] sm:$0xff] %vm3535_vm0, %v3500_v3  ;;  %v6676_v52 = vadd.f32 %v3236_v59, %v525_v62  ;;  %v3769_v11 = vmul.f32 %v6668_v42, %v6668_v42  ;;  %v6693_v3 = vadd.f32 %v2912_v39, %v526_v5  ;;  %v529_v42 = vunpack.c.h.bf16 %v5177_v35 }
 0x3b0   : > { %v2949_v40 = vpop.f32.mrb[188].mxu0  ;;  %v6700_v5 = vadd.f32 %v2916_v43, %v528_v6  ;;  %v5179_v6 = vld [vmem:[%s5590_s11 + $0xc8] sm:$0xff] }
 0x3b1   : > { %7808 = vst [vmem:[#allocation30_spill] sm:$0xff] %v6676_v52  ;;  %v2950_v62 = vadd.f32 %v2949_v40, %v6157_v4  ;;  %v6689_v38 = vpop.f32.mrb[189].mxu0  ;;  %v3916_v48 = vadd.f32 %v3769_v11, %v3768_v17  ;;  %v3771_v51 = vmul.f32 %v6676_v52, %v6676_v52  ;;  %7809 = vst [vmem:[#allocation31_spill] sm:$0xff] %v6693_v3 }
 0x3b2   : > { %v2953_v59 = vpop.f32.mrb[190].mxu0  ;;  %v3240_v30 = vpop.f32.mrb[172].mxu1  ;;  %7810 = vst [vmem:[#allocation32_spill] sm:$0xff] %v6700_v5 }
 0x3b3   : > { %v3501_v14 = vadd.f32 %v3437_v58, %v2950_v62  ;;  %v2954_v22 = vadd.f32 %v2953_v59, %v6157_v4  ;;  %v3241_v33 = vadd.f32 %v3240_v30, %v6272_v34  ;;  %v6698_v40 = vpop.f32.mrb[191].mxu0  ;;  %v3242_v17 = vpop.f32.mrb[173].mxu1  ;;  %3917 = vadd.xlane.f32.xlu0 %v3916_v48  ;;  %v3919_v11 = vadd.f32 %v3771_v51, %v3770_v57  ;;  %v5178_v59 = vld [vmem:[%s5590_s11 + $0xc0] sm:$0xff] }
 0x3b4   : > { %v3243_v52 = vpop.f32.mrb[174].mxu1  ;;  %v530_v30 = vunpack.c.l.bf16 %v5178_v59  ;;  %v2922_v48 = vadd.f32 %v6579_v28, %v6248_v15  ;;  %v3439_v51 = vld [vmem:[%s6153_s26 + $0x100] sm:$0xff]  ;;  %v3774_v17 = vmul.f32 %v6700_v5, %v6700_v5 }
 0x3b5   : > { %3566 = vst.msk [vmem:[%s6174_s30 + $0xf0] sm:$0xff] %vm3535_vm0, %v3501_v14  ;;  %v3502_v39 = vadd.f32 %v3438_v8, %v2954_v22  ;;  %v6704_v35 = vadd.f32 %v3241_v33, %v527_v2  ;;  %v3244_v58 = vadd.f32 %v3243_v52, %v6272_v34  ;;  %v3245_v62 = vpop.f32.mrb[175].mxu1  ;;  %3920 = vadd.xlane.f32.xlu1 %v3919_v11  ;;  %v532_v52 = vunpack.c.l.bf16 %v5179_v6 }
 0x3b6   : > { %v3772_v14 = vmul.f32 %v6693_v3, %v6693_v3  ;;  %v2926_v2 = vadd.f32 %v6590_v60, %v6248_v15  ;;  %v531_v8 = vunpack.c.h.bf16 %v5178_v59  ;;  %v3440_v62 = vld [vmem:[%s6153_s26 + $0x108] sm:$0xff] }
 0x3b7   : > { %7811 = vst [vmem:[#allocation33_spill] sm:$0xff] %v6704_v35  ;;  %3567 = vst.msk [vmem:[%s6174_s30 + $0xf8] sm:$0xff] %vm3535_vm0, %v3502_v39  ;;  %v6712_v57 = vadd.f32 %v3244_v58, %v529_v42  ;;  %v3773_v22 = vmul.f32 %v6704_v35, %v6704_v35  ;;  %v6729_v39 = vadd.f32 %v2922_v48, %v530_v30  ;;  %v533_v35 = vunpack.c.h.bf16 %v5179_v6 }
 0x3b8   : > { %v2959_v43 = vpop.f32.mrb[192].mxu0 }
 0x3b9   : > { %7812 = vst [vmem:[#allocation34_spill] sm:$0xff] %v6712_v57  ;;  %v2960_v28 = vadd.f32 %v2959_v43, %v6157_v4  ;;  %v6723_v33 = vpop.f32.mrb[193].mxu0  ;;  %v3922_v42 = vadd.f32 %v3773_v22, %v3772_v14  ;;  %v3775_v11 = vmul.f32 %v6712_v57, %v6712_v57  ;;  %7813 = vst [vmem:[#allocation35_spill] sm:$0xff] %v6729_v39 }
 0x3ba   : > { %v2963_v58 = vpop.f32.mrb[194].mxu0  ;;  %v3248_v60 = vpop.f32.mrb[176].mxu1  ;;  %v6736_v57 = vadd.f32 %v2926_v2, %v532_v52  ;;  %v3776_v2 = vmul.f32 %v6729_v39, %v6729_v39 }
 0x3bb   : > { %v3503_v59 = vadd.f32 %v3439_v51, %v2960_v28  ;;  %v2964_v43 = vadd.f32 %v2963_v58, %v6157_v4  ;;  %v3249_v3 = vadd.f32 %v3248_v60, %v6272_v34  ;;  %v6734_v14 = vpop.f32.mrb[195].mxu0  ;;  %v3250_v22 = vpop.f32.mrb[177].mxu1  ;;  %3923 = vadd.xlane.f32.xlu0 %v3922_v42  ;;  %v3925_v5 = vadd.f32 %v3775_v11, %v3774_v17  ;;  %v5180_v58 = vld [vmem:[%s5590_s11 + $0xd0] sm:$0xff] }
 0x3bc   : > { %7814 = vst [vmem:[#allocation36_spill] sm:$0xff] %v6736_v57  ;;  %v3251_v30 = vpop.f32.mrb[178].mxu1  ;;  %v534_v60 = vunpack.c.l.bf16 %v5180_v58  ;;  %v2932_v42 = vadd.f32 %v6617_v32, %v6248_v15  ;;  %v2936_v32 = vadd.f32 %v6626_v13, %v6248_v15 }
 0x3bd   : > { %3568 = vst.msk [vmem:[%s6174_s30 + $0x100] sm:$0xff] %vm3535_vm0, %v3503_v59  ;;  %v3504_v48 = vadd.f32 %v3440_v62, %v2964_v43  ;;  %v6740_v6 = vadd.f32 %v3249_v3, %v531_v8  ;;  %v3252_v51 = vadd.f32 %v3251_v30, %v6272_v34  ;;  %v3253_v28 = vpop.f32.mrb[179].mxu1  ;;  %3926 = vadd.xlane.f32.xlu1 %v3925_v5  ;;  %v5181_v8 = vld [vmem:[%s5590_s11 + $0xd8] sm:$0xff]  ;;  %v3441_v5 = vld [vmem:[%s6153_s26 + $0x110] sm:$0xff]  ;;  %v535_v62 = vunpack.c.h.bf16 %v5180_v58 }
 0x3be   : > { %v536_v17 = vunpack.c.l.bf16 %v5181_v8  ;;  %v3778_v59 = vmul.f32 %v6736_v57, %v6736_v57  ;;  %v3442_v28 = vld [vmem:[%s6153_s26 + $0x118] sm:$0xff] }
 0x3bf   : > { %7815 = vst [vmem:[#allocation37_spill] sm:$0xff] %v6740_v6  ;;  %3569 = vst.msk [vmem:[%s6174_s30 + $0x108] sm:$0xff] %vm3535_vm0, %v3504_v48  ;;  %v6748_v52 = vadd.f32 %v3252_v51, %v533_v35  ;;  %v3777_v3 = vmul.f32 %v6740_v6, %v6740_v6  ;;  %v6765_v48 = vadd.f32 %v2932_v42, %v534_v60  ;;  %v537_v6 = vunpack.c.h.bf16 %v5181_v8 }
 0x3c0   : > { %v2969_v11 = vpop.f32.mrb[196].mxu0  ;;  %v6772_v60 = vadd.f32 %v2936_v32, %v536_v17  ;;  %v5183_v17 = vld [vmem:[%s5590_s11 + $0xe8] sm:$0xff] }
 0x3c1   : > { %7816 = vst [vmem:[#allocation38_spill] sm:$0xff] %v6748_v52  ;;  %v2970_v35 = vadd.f32 %v2969_v11, %v6157_v4  ;;  %v6761_v43 = vpop.f32.mrb[197].mxu0  ;;  %v3928_v22 = vadd.f32 %v3777_v3, %v3776_v2  ;;  %v3779_v30 = vmul.f32 %v6748_v52, %v6748_v52  ;;  %7817 = vst [vmem:[#allocation39_spill] sm:$0xff] %v6765_v48 }
 0x3c2   : > { %v2973_v51 = vpop.f32.mrb[198].mxu0  ;;  %v3256_v58 = vpop.f32.mrb[180].mxu1  ;;  %7818 = vst [vmem:[#allocation40_spill] sm:$0xff] %v6772_v60 }
 0x3c3   : > { %v3505_v57 = vadd.f32 %v3441_v5, %v2970_v35  ;;  %v2974_v39 = vadd.f32 %v2973_v51, %v6157_v4  ;;  %v3257_v13 = vadd.f32 %v3256_v58, %v6272_v34  ;;  %v6770_v11 = vpop.f32.mrb[199].mxu0  ;;  %v3258_v2 = vpop.f32.mrb[181].mxu1  ;;  %3929 = vadd.xlane.f32.xlu0 %v3928_v22  ;;  %v3931_v3 = vadd.f32 %v3779_v30, %v3778_v59  ;;  %v5182_v51 = vld [vmem:[%s5590_s11 + $0xe0] sm:$0xff] }
 0x3c4   : > { %v3259_v52 = vpop.f32.mrb[182].mxu1  ;;  %v538_v58 = vunpack.c.l.bf16 %v5182_v51  ;;  %v2942_v22 = vadd.f32 %v6651_v21, %v6248_v15  ;;  %v3443_v30 = vld [vmem:[%s6153_s26 + $0x120] sm:$0xff]  ;;  %v3782_v2 = vmul.f32 %v6772_v60, %v6772_v60 }
 0x3c5   : > { %3570 = vst.msk [vmem:[%s6174_s30 + $0x110] sm:$0xff] %vm3535_vm0, %v3505_v57  ;;  %v3506_v42 = vadd.f32 %v3442_v28, %v2974_v39  ;;  %v6776_v8 = vadd.f32 %v3257_v13, %v535_v62  ;;  %v3260_v5 = vadd.f32 %v3259_v52, %v6272_v34  ;;  %v3261_v35 = vpop.f32.mrb[183].mxu1  ;;  %3932 = vadd.xlane.f32.xlu1 %v3931_v3  ;;  %v540_v52 = vunpack.c.l.bf16 %v5183_v17 }
 0x3c6   : > { %v3780_v57 = vmul.f32 %v6765_v48, %v6765_v48  ;;  %v2946_v62 = vadd.f32 %v6662_v47, %v6248_v15  ;;  %v539_v28 = vunpack.c.h.bf16 %v5182_v51  ;;  %v3444_v35 = vld [vmem:[%s6153_s26 + $0x128] sm:$0xff] }
 0x3c7   : > { %7819 = vst [vmem:[#allocation41_spill] sm:$0xff] %v6776_v8  ;;  %3571 = vst.msk [vmem:[%s6174_s30 + $0x118] sm:$0xff] %vm3535_vm0, %v3506_v42  ;;  %v6784_v59 = vadd.f32 %v3260_v5, %v537_v6  ;;  %v3781_v39 = vmul.f32 %v6776_v8, %v6776_v8  ;;  %v6801_v42 = vadd.f32 %v2942_v22, %v538_v58  ;;  %v541_v8 = vunpack.c.h.bf16 %v5183_v17 }
 0x3c8   : > { %v2979_v32 = vpop.f32.mrb[200].mxu0 }
 0x3c9   : > { %7820 = vst [vmem:[#allocation42_spill] sm:$0xff] %v6784_v59  ;;  %v2980_v21 = vadd.f32 %v2979_v32, %v6157_v4  ;;  %v6795_v13 = vpop.f32.mrb[201].mxu0  ;;  %v3934_v6 = vadd.f32 %v3781_v39, %v3780_v57  ;;  %v3783_v3 = vmul.f32 %v6784_v59, %v6784_v59  ;;  %7821 = vst [vmem:[#allocation43_spill] sm:$0xff] %v6801_v42 }
 0x3ca   : > { %v2983_v5 = vpop.f32.mrb[202].mxu0  ;;  %v3264_v47 = vpop.f32.mrb[184].mxu1  ;;  %v6808_v59 = vadd.f32 %v2946_v62, %v540_v52  ;;  %v3784_v62 = vmul.f32 %v6801_v42, %v6801_v42 }
 0x3cb   : > { %v3507_v51 = vadd.f32 %v3443_v30, %v2980_v21  ;;  %v2984_v32 = vadd.f32 %v2983_v5, %v6157_v4  ;;  %v3265_v48 = vadd.f32 %v3264_v47, %v6272_v34  ;;  %v6806_v57 = vpop.f32.mrb[203].mxu0  ;;  %v3266_v39 = vpop.f32.mrb[185].mxu1  ;;  %3935 = vadd.xlane.f32.xlu0 %v3934_v6  ;;  %v3937_v60 = vadd.f32 %v3783_v3, %v3782_v2  ;;  %v5184_v5 = vld [vmem:[%s5590_s11 + $0xf0] sm:$0xff] }
 0x3cc   : > { %7822 = vst [vmem:[#allocation44_spill] sm:$0xff] %v6808_v59  ;;  %v3267_v58 = vpop.f32.mrb[186].mxu1  ;;  %v542_v47 = vunpack.c.l.bf16 %v5184_v5  ;;  %v2952_v6 = vadd.f32 %v6689_v38, %v6248_v15  ;;  %v2956_v38 = vadd.f32 %v6698_v40, %v6248_v15 }
 0x3cd   : > { %3572 = vst.msk [vmem:[%s6174_s30 + $0x120] sm:$0xff] %vm3535_vm0, %v3507_v51  ;;  %v3508_v22 = vadd.f32 %v3444_v35, %v2984_v32  ;;  %v6812_v17 = vadd.f32 %v3265_v48, %v539_v28  ;;  %v3268_v30 = vadd.f32 %v3267_v58, %v6272_v34  ;;  %v3269_v21 = vpop.f32.mrb[187].mxu1  ;;  %3938 = vadd.xlane.f32.xlu1 %v3937_v60  ;;  %v5185_v28 = vld [vmem:[%s5590_s11 + $0xf8] sm:$0xff]  ;;  %v3445_v60 = vld [vmem:[%s6153_s26 + $0x130] sm:$0xff]  ;;  %v543_v35 = vunpack.c.h.bf16 %v5184_v5 }
 0x3ce   : > { %v544_v2 = vunpack.c.l.bf16 %v5185_v28  ;;  %v3786_v51 = vmul.f32 %v6808_v59, %v6808_v59  ;;  %v3446_v21 = vld [vmem:[%s6153_s26 + $0x138] sm:$0xff] }
 0x3cf   : > { %7823 = vst [vmem:[#allocation45_spill] sm:$0xff] %v6812_v17  ;;  %3573 = vst.msk [vmem:[%s6174_s30 + $0x128] sm:$0xff] %vm3535_vm0, %v3508_v22  ;;  %v6820_v52 = vadd.f32 %v3268_v30, %v541_v8  ;;  %v3785_v48 = vmul.f32 %v6812_v17, %v6812_v17  ;;  %v6837_v22 = vadd.f32 %v2952_v6, %v542_v47  ;;  %v545_v17 = vunpack.c.h.bf16 %v5185_v28 }
 0x3d0   : > { %v2989_v3 = vpop.f32.mrb[204].mxu0  ;;  %v6844_v47 = vadd.f32 %v2956_v38, %v544_v2  ;;  %v5187_v2 = vld [vmem:[%s5590_s11 + $0x108] sm:$0xff] }
 0x3d1   : > { %7824 = vst [vmem:[#allocation46_spill] sm:$0xff] %v6820_v52  ;;  %v2990_v8 = vadd.f32 %v2989_v3, %v6157_v4  ;;  %v6833_v32 = vpop.f32.mrb[205].mxu0  ;;  %v3940_v39 = vadd.f32 %v3785_v48, %v3784_v62  ;;  %v3787_v58 = vmul.f32 %v6820_v52, %v6820_v52  ;;  %7825 = vst [vmem:[#allocation47_spill] sm:$0xff] %v6837_v22 }
 0x3d2   : > { %v2993_v30 = vpop.f32.mrb[206].mxu0  ;;  %v3272_v5 = vpop.f32.mrb[188].mxu1  ;;  %7826 = vst [vmem:[#allocation48_spill] sm:$0xff] %v6844_v47 }
 0x3d3   : > { %v3509_v59 = vadd.f32 %v3445_v60, %v2990_v8  ;;  %v2994_v42 = vadd.f32 %v2993_v30, %v6157_v4  ;;  %v3273_v40 = vadd.f32 %v3272_v5, %v6272_v34  ;;  %v6842_v3 = vpop.f32.mrb[207].mxu0  ;;  %v3274_v62 = vpop.f32.mrb[189].mxu1  ;;  %3941 = vadd.xlane.f32.xlu0 %v3940_v39  ;;  %v3943_v48 = vadd.f32 %v3787_v58, %v3786_v51  ;;  %v5186_v30 = vld [vmem:[%s5590_s11 + $0x100] sm:$0xff] }
 0x3d4   : > { %v3275_v52 = vpop.f32.mrb[190].mxu1  ;;  %v546_v5 = vunpack.c.l.bf16 %v5186_v30  ;;  %v2962_v39 = vadd.f32 %v6723_v33, %v6248_v15  ;;  %v3447_v58 = vld [vmem:[%s6153_s26 + $0x140] sm:$0xff]  ;;  %v3790_v62 = vmul.f32 %v6844_v47, %v6844_v47 }
 0x3d5   : > { %3574 = vst.msk [vmem:[%s6174_s30 + $0x130] sm:$0xff] %vm3535_vm0, %v3509_v59  ;;  %v3510_v6 = vadd.f32 %v3446_v21, %v2994_v42  ;;  %v6848_v28 = vadd.f32 %v3273_v40, %v543_v35  ;;  %v3276_v60 = vadd.f32 %v3275_v52, %v6272_v34  ;;  %v3277_v8 = vpop.f32.mrb[191].mxu1  ;;  %3944 = vadd.xlane.f32.xlu1 %v3943_v48  ;;  %v548_v52 = vunpack.c.l.bf16 %v5187_v2 }
 0x3d6   : > { %v3788_v59 = vmul.f32 %v6837_v22, %v6837_v22  ;;  %v2966_v35 = vadd.f32 %v6734_v14, %v6248_v15  ;;  %v547_v21 = vunpack.c.h.bf16 %v5186_v30  ;;  %v3448_v8 = vld [vmem:[%s6153_s26 + $0x148] sm:$0xff] }
 0x3d7   : > { %7827 = vst [vmem:[#allocation49_spill] sm:$0xff] %v6848_v28  ;;  %3575 = vst.msk [vmem:[%s6174_s30 + $0x138] sm:$0xff] %vm3535_vm0, %v3510_v6  ;;  %v6856_v51 = vadd.f32 %v3276_v60, %v545_v17  ;;  %v3789_v42 = vmul.f32 %v6848_v28, %v6848_v28  ;;  %v6873_v6 = vadd.f32 %v2962_v39, %v546_v5  ;;  %v549_v28 = vunpack.c.h.bf16 %v5187_v2 }
 0x3d8   : > { %v2999_v38 = vpop.f32.mrb[208].mxu0 }
 0x3d9   : > { %7828 = vst [vmem:[#allocation50_spill] sm:$0xff] %v6856_v51  ;;  %v3000_v33 = vadd.f32 %v2999_v38, %v6157_v4  ;;  %v6867_v40 = vpop.f32.mrb[209].mxu0  ;;  %v3946_v17 = vadd.f32 %v3789_v42, %v3788_v59  ;;  %v3791_v48 = vmul.f32 %v6856_v51, %v6856_v51  ;;  %7829 = vst [vmem:[#allocation51_spill] sm:$0xff] %v6873_v6 }
 0x3da   : > { %v3003_v60 = vpop.f32.mrb[210].mxu0  ;;  %v3280_v14 = vpop.f32.mrb[192].mxu1  ;;  %v6880_v51 = vadd.f32 %v2966_v35, %v548_v52  ;;  %v3792_v35 = vmul.f32 %v6873_v6, %v6873_v6 }
 0x3db   : > { %v3511_v30 = vadd.f32 %v3447_v58, %v3000_v33  ;;  %v3004_v38 = vadd.f32 %v3003_v60, %v6157_v4  ;;  %v3281_v22 = vadd.f32 %v3280_v14, %v6272_v34  ;;  %v6878_v59 = vpop.f32.mrb[211].mxu0  ;;  %v3282_v42 = vpop.f32.mrb[193].mxu1  ;;  %3947 = vadd.xlane.f32.xlu0 %v3946_v17  ;;  %v3949_v47 = vadd.f32 %v3791_v48, %v3790_v62  ;;  %v5188_v60 = vld [vmem:[%s5590_s11 + $0x110] sm:$0xff] }
 0x3dc   : > { %7830 = vst [vmem:[#allocation52_spill] sm:$0xff] %v6880_v51  ;;  %v3283_v5 = vpop.f32.mrb[194].mxu1  ;;  %v550_v14 = vunpack.c.l.bf16 %v5188_v60  ;;  %v2972_v17 = vadd.f32 %v6761_v43, %v6248_v15  ;;  %v2976_v43 = vadd.f32 %v6770_v11, %v6248_v15 }
 0x3dd   : > { %3576 = vst.msk [vmem:[%s6174_s30 + $0x140] sm:$0xff] %vm3535_vm0, %v3511_v30  ;;  %v3512_v39 = vadd.f32 %v3448_v8, %v3004_v38  ;;  %v6884_v2 = vadd.f32 %v3281_v22, %v547_v21  ;;  %v3284_v58 = vadd.f32 %v3283_v5, %v6272_v34  ;;  %v3285_v33 = vpop.f32.mrb[195].mxu1  ;;  %3950 = vadd.xlane.f32.xlu1 %v3949_v47  ;;  %v5189_v21 = vld [vmem:[%s5590_s11 + $0x118] sm:$0xff]  ;;  %v3449_v47 = vld [vmem:[%s6153_s26 + $0x150] sm:$0xff]  ;;  %v551_v8 = vunpack.c.h.bf16 %v5188_v60 }
 0x3de   : > { %v552_v62 = vunpack.c.l.bf16 %v5189_v21  ;;  %v3794_v30 = vmul.f32 %v6880_v51, %v6880_v51  ;;  %v3450_v33 = vld [vmem:[%s6153_s26 + $0x158] sm:$0xff] }
 0x3df   : > { %7831 = vst [vmem:[#allocation53_spill] sm:$0xff] %v6884_v2  ;;  %3577 = vst.msk [vmem:[%s6174_s30 + $0x148] sm:$0xff] %vm3535_vm0, %v3512_v39  ;;  %v6892_v52 = vadd.f32 %v3284_v58, %v549_v28  ;;  %v3793_v22 = vmul.f32 %v6884_v2, %v6884_v2  ;;  %v6909_v39 = vadd.f32 %v2972_v17, %v550_v14  ;;  %v553_v2 = vunpack.c.h.bf16 %v5189_v21 }
 0x3e0   : > { %v3009_v48 = vpop.f32.mrb[212].mxu0  ;;  %v6916_v14 = vadd.f32 %v2976_v43, %v552_v62  ;;  %v5191_v62 = vld [vmem:[%s5590_s11 + $0x128] sm:$0xff] }
 0x3e1   : > { %7832 = vst [vmem:[#allocation54_spill] sm:$0xff] %v6892_v52  ;;  %v3010_v28 = vadd.f32 %v3009_v48, %v6157_v4  ;;  %v6905_v38 = vpop.f32.mrb[213].mxu0  ;;  %v3952_v42 = vadd.f32 %v3793_v22, %v3792_v35  ;;  %v3795_v5 = vmul.f32 %v6892_v52, %v6892_v52  ;;  %7833 = vst [vmem:[#allocation55_spill] sm:$0xff] %v6909_v39 }
 0x3e2   : > { %v3013_v58 = vpop.f32.mrb[214].mxu0  ;;  %v3288_v60 = vpop.f32.mrb[196].mxu1  ;;  %7834 = vst [vmem:[#allocation56_spill] sm:$0xff] %v6916_v14 }
 0x3e3   : > { %v3513_v51 = vadd.f32 %v3449_v47, %v3010_v28  ;;  %v3014_v6 = vadd.f32 %v3013_v58, %v6157_v4  ;;  %v3289_v11 = vadd.f32 %v3288_v60, %v6272_v34  ;;  %v6914_v48 = vpop.f32.mrb[215].mxu0  ;;  %v3290_v35 = vpop.f32.mrb[197].mxu1  ;;  %3953 = vadd.xlane.f32.xlu0 %v3952_v42  ;;  %v3955_v22 = vadd.f32 %v3795_v5, %v3794_v30  ;;  %v5190_v58 = vld [vmem:[%s5590_s11 + $0x120] sm:$0xff] }
 0x3e4   : > { %v3291_v52 = vpop.f32.mrb[198].mxu1  ;;  %v554_v60 = vunpack.c.l.bf16 %v5190_v58  ;;  %v2982_v42 = vadd.f32 %v6795_v13, %v6248_v15  ;;  %v3451_v5 = vld [vmem:[%s6153_s26 + $0x160] sm:$0xff]  ;;  %v3798_v35 = vmul.f32 %v6916_v14, %v6916_v14 }
 0x3e5   : > { %3578 = vst.msk [vmem:[%s6174_s30 + $0x150] sm:$0xff] %vm3535_vm0, %v3513_v51  ;;  %v3514_v17 = vadd.f32 %v3450_v33, %v3014_v6  ;;  %v6920_v21 = vadd.f32 %v3289_v11, %v551_v8  ;;  %v3292_v47 = vadd.f32 %v3291_v52, %v6272_v34  ;;  %v3293_v28 = vpop.f32.mrb[199].mxu1  ;;  %3956 = vadd.xlane.f32.xlu1 %v3955_v22  ;;  %v556_v52 = vunpack.c.l.bf16 %v5191_v62 }
 0x3e6   : > { %v3796_v51 = vmul.f32 %v6909_v39, %v6909_v39  ;;  %v2986_v8 = vadd.f32 %v6806_v57, %v6248_v15  ;;  %v555_v33 = vunpack.c.h.bf16 %v5190_v58  ;;  %v3452_v28 = vld [vmem:[%s6153_s26 + $0x168] sm:$0xff] }
 0x3e7   : > { %7835 = vst [vmem:[#allocation57_spill] sm:$0xff] %v6920_v21  ;;  %3579 = vst.msk [vmem:[%s6174_s30 + $0x158] sm:$0xff] %vm3535_vm0, %v3514_v17  ;;  %v6928_v30 = vadd.f32 %v3292_v47, %v553_v2  ;;  %v3797_v6 = vmul.f32 %v6920_v21, %v6920_v21  ;;  %v6945_v17 = vadd.f32 %v2982_v42, %v554_v60  ;;  %v557_v21 = vunpack.c.h.bf16 %v5191_v62 }
 0x3e8   : > { %v3019_v43 = vpop.f32.mrb[216].mxu0 }
 0x3e9   : > { %7836 = vst [vmem:[#allocation58_spill] sm:$0xff] %v6928_v30  ;;  %v3020_v13 = vadd.f32 %v3019_v43, %v6157_v4  ;;  %v6939_v11 = vpop.f32.mrb[217].mxu0  ;;  %v3958_v2 = vadd.f32 %v3797_v6, %v3796_v51  ;;  %v3799_v22 = vmul.f32 %v6928_v30, %v6928_v30  ;;  %7837 = vst [vmem:[#allocation59_spill] sm:$0xff] %v6945_v17 }
 0x3ea   : > { %v3023_v47 = vpop.f32.mrb[218].mxu0  ;;  %v3296_v57 = vpop.f32.mrb[200].mxu1  ;;  %v6952_v30 = vadd.f32 %v2986_v8, %v556_v52  ;;  %v3800_v8 = vmul.f32 %v6945_v17, %v6945_v17 }
 0x3eb   : > { %v3515_v58 = vadd.f32 %v3451_v5, %v3020_v13  ;;  %v3024_v43 = vadd.f32 %v3023_v47, %v6157_v4  ;;  %v3297_v39 = vadd.f32 %v3296_v57, %v6272_v34  ;;  %v6950_v51 = vpop.f32.mrb[219].mxu0  ;;  %v3298_v6 = vpop.f32.mrb[201].mxu1  ;;  %3959 = vadd.xlane.f32.xlu0 %v3958_v2  ;;  %v3961_v14 = vadd.f32 %v3799_v22, %v3798_v35  ;;  %v5192_v47 = vld [vmem:[%s5590_s11 + $0x130] sm:$0xff] }
 0x3ec   : > { %7838 = vst [vmem:[#allocation60_spill] sm:$0xff] %v6952_v30  ;;  %v3299_v60 = vpop.f32.mrb[202].mxu1  ;;  %v558_v57 = vunpack.c.l.bf16 %v5192_v47  ;;  %v2992_v2 = vadd.f32 %v6833_v32, %v6248_v15  ;;  %v559_v32 = vunpack.c.h.bf16 %v5192_v47 }
 0x3ed   : > { %3580 = vst.msk [vmem:[%s6174_s30 + $0x160] sm:$0xff] %vm3535_vm0, %v3515_v58  ;;  %v3516_v42 = vadd.f32 %v3452_v28, %v3024_v43  ;;  %v6956_v62 = vadd.f32 %v3297_v39, %v555_v33  ;;  %v3300_v5 = vadd.f32 %v3299_v60, %v6272_v34  ;;  %v3301_v13 = vpop.f32.mrb[203].mxu1  ;;  %3962 = vadd.xlane.f32.xlu1 %v3961_v14  ;;  %v5193_v33 = vld [vmem:[%s5590_s11 + $0x138] sm:$0xff]  ;;  %v3453_v28 = vld [vmem:[%s6153_s26 + $0x170] sm:$0xff] }
 0x3ee   : > { %v560_v35 = vunpack.c.l.bf16 %v5193_v33  ;;  %v2996_v14 = vadd.f32 %v6842_v3, %v6248_v15  ;;  %v3454_v13 = vld [vmem:[%s6153_s26 + $0x178] sm:$0xff]  ;;  %v561_v47 = vunpack.c.h.bf16 %v5193_v33 }
 0x3ef   : > { %7839 = vst [vmem:[#allocation61_spill] sm:$0xff] %v6956_v62  ;;  %3581 = vst.msk [vmem:[%s6174_s30 + $0x168] sm:$0xff] %vm3535_vm0, %v3516_v42  ;;  %v6964_v52 = vadd.f32 %v3300_v5, %v557_v21  ;;  %v3801_v39 = vmul.f32 %v6956_v62, %v6956_v62  ;;  %v3802_v21 = vmul.f32 %v6952_v30, %v6952_v30 }
 0x3f0   : > { %v3029_v22 = vpop.f32.mrb[220].mxu0  ;;  %v3858_v58 = vpop.xlane.xlu0 %3857  ;;  %v6981_v5 = vadd.f32 %v2992_v2, %v558_v57 }
 0x3f1   : > { %7840 = vst [vmem:[#allocation62_spill] sm:$0xff] %v6964_v52  ;;  %v3030_v43 = vadd.f32 %v3029_v22, %v6157_v4  ;;  %5026 = vrsqrt.f32 %v3858_v58  ;;  %v6977_v6 = vpop.f32.mrb[221].mxu0  ;;  %v3964_v60 = vadd.f32 %v3801_v39, %v3800_v8  ;;  %v3803_v42 = vmul.f32 %v6964_v52, %v6964_v52 }
 0x3f2   : > { %7841 = vst [vmem:[#allocation63_spill] sm:$0xff] %v6981_v5  ;;  %v3033_v3 = vpop.f32.mrb[222].mxu0  ;;  %v3304_v62 = vpop.f32.mrb[204].mxu1  ;;  %v6988_v52 = vadd.f32 %v2996_v14, %v560_v35  ;;  %v3002_v35 = vadd.f32 %v6867_v40, %v6248_v15 }
 0x3f3   : > { %v3517_v17 = vadd.f32 %v3453_v28, %v3030_v43  ;;  %v3034_v30 = vadd.f32 %v3033_v3, %v6157_v4  ;;  %v3305_v22 = vadd.f32 %v3304_v62, %v6272_v34  ;;  %v6986_v58 = vpop.f32.mrb[223].mxu0  ;;  %v3306_v8 = vpop.f32.mrb[205].mxu1  ;;  %3965 = vadd.xlane.f32.xlu0 %v3964_v60  ;;  %v3967_v39 = vadd.f32 %v3803_v42, %v3802_v21  ;;  %v5194_v60 = vld [vmem:[%s5590_s11 + $0x140] sm:$0xff] }
 0x3f4   : > { %7842 = vst [vmem:[#allocation64_spill] sm:$0xff] %v6988_v52  ;;  %v3307_v57 = vpop.f32.mrb[206].mxu1  ;;  %v3861_v2 = vpop.xlane.xlu0 %3860  ;;  %v562_v21 = vunpack.c.l.bf16 %v5194_v60  ;;  %v3006_v3 = vadd.f32 %v6878_v59, %v6248_v15  ;;  %v3806_v8 = vmul.f32 %v6988_v52, %v6988_v52 }
 0x3f5   : > { %3582 = vst.msk [vmem:[%s6174_s30 + $0x170] sm:$0xff] %vm3535_vm0, %v3517_v17  ;;  %v3518_v33 = vadd.f32 %v3454_v13, %v3034_v30  ;;  %v6993_v28 = vadd.f32 %v3305_v22, %v559_v32  ;;  %v3308_v62 = vadd.f32 %v3307_v57, %v6272_v34  ;;  %5028 = vrsqrt.f32 %v3861_v2  ;;  %v3309_v43 = vpop.f32.mrb[207].mxu1  ;;  %3968 = vadd.xlane.f32.xlu1 %v3967_v39  ;;  %v5195_v32 = vld [vmem:[%s5590_s11 + $0x148] sm:$0xff]  ;;  %v3455_v13 = vld [vmem:[%s6153_s26 + $0x180] sm:$0xff] }
 0x3f6   : > { %v3804_v30 = vmul.f32 %v6981_v5, %v6981_v5  ;;  %v564_v42 = vunpack.c.l.bf16 %v5195_v32  ;;  %v7022_v59 = vadd.f32 %v3002_v35, %v562_v21  ;;  %v3456_v43 = vld [vmem:[%s6153_s26 + $0x188] sm:$0xff]  ;;  %v565_v5 = vunpack.c.h.bf16 %v5195_v32 }
 0x3f7   : > { %7843 = vst [vmem:[#allocation65_spill] sm:$0xff] %v6993_v28  ;;  %3583 = vst.msk [vmem:[%s6174_s30 + $0x178] sm:$0xff] %vm3535_vm0, %v3518_v33  ;;  %v7001_v14 = vadd.f32 %v3308_v62, %v561_v47  ;;  %v3805_v17 = vmul.f32 %v6993_v28, %v6993_v28  ;;  %v563_v47 = vunpack.c.h.bf16 %v5194_v60 }
 0x3f8   : > { %v3039_v40 = vpop.f32.mrb[224].mxu0  ;;  %v3864_v22 = vpop.xlane.xlu1 %3863  ;;  %v7029_v21 = vadd.f32 %v3006_v3, %v564_v42  ;;  %v5196_v42 = vld [vmem:[%s5590_s11 + $0x150] sm:$0xff] }
 0x3f9   : > { %7844 = vst [vmem:[#allocation66_spill] sm:$0xff] %v7001_v14  ;;  %v3040_v39 = vadd.f32 %v3039_v40, %v6157_v4  ;;  %5030 = vrsqrt.f32 %v3864_v22  ;;  %v7018_v57 = vpop.f32.mrb[225].mxu0  ;;  %v3970_v2 = vadd.f32 %v3805_v17, %v3804_v30  ;;  %v3807_v33 = vmul.f32 %v7001_v14, %v7001_v14 }
 0x3fa   : > { %v3043_v62 = vpop.f32.mrb[226].mxu0  ;;  %v3312_v28 = vpop.f32.mrb[208].mxu1  ;;  %v566_v3 = vunpack.c.l.bf16 %v5196_v42 }
 0x3fb   : > { %v5027_v60 = vpop.eup %5026  ;;  %v3519_v55 = vadd.f32 %v3455_v13, %v3040_v39  ;;  %v3044_v52 = vadd.f32 %v3043_v62, %v6157_v4  ;;  %v3313_v40 = vadd.f32 %v3312_v28, %v6272_v34  ;;  %v7027_v22 = vpop.f32.mrb[227].mxu0  ;;  %3971 = vadd.xlane.f32.xlu0 %v3970_v2  ;;  %v3973_v17 = vadd.f32 %v3807_v33, %v3806_v8 }
 0x3fc   : > { %v3314_v30 = vpop.f32.mrb[209].mxu1  ;;  %v4112_v35 = vmul.f32 %v5027_v60, %v6281_v25  ;;  %v4113_v14 = vmul.f32 %v5027_v60, %v6296_v63  ;;  %v3867_v13 = vpop.xlane.xlu1 %3866  ;;  %v3012_v25 = vadd.f32 %v6905_v38, %v6248_v15  ;;  %v567_v60 = vunpack.c.h.bf16 %v5196_v42 }
 0x3fd   : > { %v3315_v32 = vpop.f32.mrb[210].mxu1  ;;  %3584 = vst.msk [vmem:[%s6174_s30 + $0x180] sm:$0xff] %vm3535_vm0, %v3519_v55  ;;  %v3520_v39 = vadd.f32 %v3456_v43, %v3044_v52  ;;  %v7035_v28 = vadd.f32 %v3313_v40, %v563_v47  ;;  %5032 = vrsqrt.f32 %v3867_v13  ;;  %3974 = vadd.xlane.f32.xlu1 %v3973_v17  ;;  %v3808_v52 = vmul.f32 %v7022_v59, %v7022_v59 }
 0x3fe   : > { %v3316_v62 = vadd.f32 %v3315_v32, %v6272_v34  ;;  %v3317_v2 = vpop.f32.mrb[211].mxu1  ;;  %4240 = vst [vmem:[%s7042_s24] sm:$0xff] %v4112_v35  ;;  %4241 = vst [vmem:[%s7042_s24 + $0x8] sm:$0xff] %v4113_v14  ;;  %v3457_v14 = vld [vmem:[%s6153_s26 + $0x190] sm:$0xff]  ;;  %v7064_v35 = vadd.f32 %v3012_v25, %v566_v3  ;;  %v3016_v13 = vadd.f32 %v6914_v48, %v6248_v15 }
 0x3ff   : > { %v5029_v63 = vpop.eup %5028  ;;  %3585 = vst.msk [vmem:[%s6174_s30 + $0x188] sm:$0xff] %vm3535_vm0, %v3520_v39  ;;  %v3809_v47 = vmul.f32 %v7035_v28, %v7035_v28 }
 0x400   : > { %v7048_v55 = vadd.f32 %v3316_v62, %v565_v5  ;;  %v4114_v38 = vmul.f32 %v5029_v63, %v6303_v19  ;;  %v4115_v8 = vmul.f32 %v5029_v63, %v6307_v20  ;;  %v3049_v33 = vpop.f32.mrb[228].mxu0  ;;  %v3870_v43 = vpop.xlane.xlu0 %3869  ;;  %v3810_v5 = vmul.f32 %v7029_v21, %v7029_v21  ;;  %v5197_v20 = vld [vmem:[%s5590_s11 + $0x158] sm:$0xff] }
 0x401   : > { %v3050_v40 = vadd.f32 %v3049_v33, %v6157_v4  ;;  %5034 = vrsqrt.f32 %v3870_v43  ;;  %v7060_v30 = vpop.f32.mrb[229].mxu0  ;;  %v3976_v17 = vadd.f32 %v3809_v47, %v3808_v52  ;;  %v568_v32 = vunpack.c.l.bf16 %v5197_v20  ;;  %v3458_v62 = vld [vmem:[%s6153_s26 + $0x198] sm:$0xff] }
 0x402   : > { %v3811_v19 = vmul.f32 %v7048_v55, %v7048_v55  ;;  %4242 = vst [vmem:[%s7042_s24 + $0x10] sm:$0xff] %v4114_v38  ;;  %4243 = vst [vmem:[%s7042_s24 + $0x18] sm:$0xff] %v4115_v8  ;;  %v3053_v39 = vpop.f32.mrb[230].mxu0  ;;  %v3320_v2 = vpop.f32.mrb[212].mxu1 }
 0x403   : > { %v5031_v42 = vpop.eup %5030  ;;  %v3521_v63 = vadd.f32 %v3457_v14, %v3050_v40  ;;  %v3054_v52 = vadd.f32 %v3053_v39, %v6157_v4  ;;  %v3321_v47 = vadd.f32 %v3320_v2, %v6272_v34  ;;  %v3873_v3 = vpop.xlane.xlu1 %3872  ;;  %3977 = vadd.xlane.f32.xlu0 %v3976_v17  ;;  %v569_v14 = vunpack.c.h.bf16 %v5197_v20  ;;  %v5198_v17 = vld [vmem:[%s5590_s11 + $0x160] sm:$0xff] }
 0x404   : > { %v7074_v25 = vpop.f32.mrb[231].mxu0  ;;  %v3979_v33 = vadd.f32 %v3811_v19, %v3810_v5  ;;  %v4116_v48 = vmul.f32 %v5031_v42, %v6321_v10  ;;  %v4117_v38 = vmul.f32 %v5031_v42, %v6335_v54  ;;  %5036 = vrsqrt.f32 %v3873_v3  ;;  %v3322_v8 = vpop.f32.mrb[213].mxu1 }
 0x405   : > { %3586 = vst.msk [vmem:[%s6174_s30 + $0x190] sm:$0xff] %vm3535_vm0, %v3521_v63  ;;  %v3522_v43 = vadd.f32 %v3458_v62, %v3054_v52  ;;  %v7080_v40 = vadd.f32 %v3321_v47, %v567_v60  ;;  %v3323_v39 = vpop.f32.mrb[214].mxu1  ;;  %v7082_v2 = vadd.f32 %v3016_v13, %v568_v32  ;;  %v570_v19 = vunpack.c.l.bf16 %v5198_v17  ;;  %v3459_v52 = vld [vmem:[%s6153_s26 + $0x1a0] sm:$0xff] }
 0x406   : > { %3980 = vadd.xlane.f32.xlu1 %v3979_v33  ;;  %4244 = vst [vmem:[%s7042_s24 + $0x20] sm:$0xff] %v4116_v48  ;;  %4245 = vst [vmem:[%s7042_s24 + $0x28] sm:$0xff] %v4117_v38  ;;  %v3324_v10 = vadd.f32 %v3323_v39, %v6272_v34  ;;  %v3325_v5 = vpop.f32.mrb[215].mxu1  ;;  %v3022_v20 = vadd.f32 %v6939_v11, %v6248_v15  ;;  %v3812_v60 = vmul.f32 %v7064_v35, %v7064_v35  ;;  %v5199_v38 = vld [vmem:[%s5590_s11 + $0x168] sm:$0xff] }
 0x407   : > { %v5033_v54 = vpop.eup %5032  ;;  %3587 = vst.msk [vmem:[%s6174_s30 + $0x198] sm:$0xff] %vm3535_vm0, %v3522_v43  ;;  %v3813_v32 = vmul.f32 %v7080_v40, %v7080_v40  ;;  %v571_v33 = vunpack.c.h.bf16 %v5198_v17  ;;  %v572_v8 = vunpack.c.l.bf16 %v5199_v38  ;;  %v3814_v39 = vmul.f32 %v7082_v2, %v7082_v2 }
 0x408   : > { %v4118_v13 = vmul.f32 %v5033_v54, %v6338_v26  ;;  %v4119_v62 = vmul.f32 %v5033_v54, %v6347_v41  ;;  %v7098_v42 = vadd.f32 %v3324_v10, %v569_v14  ;;  %v3059_v63 = vpop.f32.mrb[232].mxu0  ;;  %v3876_v11 = vpop.xlane.xlu0 %3875  ;;  %v3026_v26 = vadd.f32 %v6950_v51, %v6248_v15  ;;  %v3460_v14 = vld [vmem:[%s6153_s26 + $0x1a8] sm:$0xff] }
 0x409   : > { %v3060_v47 = vadd.f32 %v3059_v63, %v6157_v4  ;;  %5038 = vrsqrt.f32 %v3876_v11  ;;  %v7102_v3 = vpop.f32.mrb[233].mxu0  ;;  %v3982_v48 = vadd.f32 %v3813_v32, %v3812_v60  ;;  %v7114_v54 = vadd.f32 %v3022_v20, %v570_v19 }
 0x40a   : > { %7845 = vst [vmem:[#allocation67_spill] sm:$0xff] %v7098_v42  ;;  %4246 = vst [vmem:[%s7042_s24 + $0x30] sm:$0xff] %v4118_v13  ;;  %v3063_v41 = vpop.f32.mrb[234].mxu0  ;;  %v3328_v43 = vpop.f32.mrb[216].mxu1  ;;  %v3815_v10 = vmul.f32 %v7098_v42, %v7098_v42  ;;  %v573_v19 = vunpack.c.h.bf16 %v5199_v38  ;;  %v7126_v42 = vadd.f32 %v3026_v26, %v572_v8 }
 0x40b   : > { %4247 = vst [vmem:[%s7042_s24 + $0x38] sm:$0xff] %v4119_v62  ;;  %v5035_v5 = vpop.eup %5034  ;;  %v3523_v17 = vadd.f32 %v3459_v52, %v3060_v47  ;;  %v3064_v60 = vadd.f32 %v3063_v41, %v6157_v4  ;;  %v3329_v51 = vadd.f32 %v3328_v43, %v6272_v34  ;;  %v3879_v32 = vpop.xlane.xlu1 %3878  ;;  %3983 = vadd.xlane.f32.xlu0 %v3982_v48  ;;  %v5200_v48 = vld [vmem:[%s5590_s11 + $0x170] sm:$0xff] }
 0x40c   : > { %v7118_v13 = vpop.f32.mrb[235].mxu0  ;;  %v4120_v62 = vmul.f32 %v5035_v5, %v6365_v16  ;;  %v4121_v63 = vmul.f32 %v5035_v5, %v6375_v31  ;;  %5040 = vrsqrt.f32 %v3879_v32  ;;  %v3330_v11 = vpop.f32.mrb[217].mxu1  ;;  %v3985_v41 = vadd.f32 %v3815_v10, %v3814_v39  ;;  %v3461_v5 = vld [vmem:[%s6153_s26 + $0x1b0] sm:$0xff] }
 0x40d   : > { %3588 = vst.msk [vmem:[%s6174_s30 + $0x1a0] sm:$0xff] %vm3535_vm0, %v3523_v17  ;;  %v3524_v20 = vadd.f32 %v3460_v14, %v3064_v60  ;;  %v7124_v52 = vadd.f32 %v3329_v51, %v571_v33  ;;  %v3331_v47 = vpop.f32.mrb[218].mxu1  ;;  %v574_v16 = vunpack.c.l.bf16 %v5200_v48  ;;  %v3032_v31 = vadd.f32 %v6977_v6, %v6248_v15 }
 0x40e   : > { %v5037_v43 = vpop.eup %5036  ;;  %4248 = vst [vmem:[%s7042_s24 + $0x40] sm:$0xff] %v4120_v62  ;;  %4249 = vst [vmem:[%s7042_s24 + $0x48] sm:$0xff] %v4121_v63  ;;  %v3332_v38 = vadd.f32 %v3331_v47, %v6272_v34  ;;  %v3333_v14 = vpop.f32.mrb[219].mxu1  ;;  %3986 = vadd.xlane.f32.xlu1 %v3985_v41  ;;  %v3816_v8 = vmul.f32 %v7114_v54, %v7114_v54  ;;  %v575_v60 = vunpack.c.h.bf16 %v5200_v48  ;;  %v5201_v62 = vld [vmem:[%s5590_s11 + $0x178] sm:$0xff] }
 0x40f   : > { %v4122_v33 = vmul.f32 %v5037_v43, %v6371_v29  ;;  %v4123_v39 = vmul.f32 %v5037_v43, %v6383_v45  ;;  %3589 = vst.msk [vmem:[%s6174_s30 + $0x1a8] sm:$0xff] %vm3535_vm0, %v3524_v20  ;;  %v3817_v6 = vmul.f32 %v7124_v52, %v7124_v52  ;;  %v7150_v32 = vadd.f32 %v3032_v31, %v574_v16  ;;  %v3462_v20 = vld [vmem:[%s6153_s26 + $0x1b8] sm:$0xff] }
 0x410   : > { %v7142_v26 = vadd.f32 %v3332_v38, %v573_v19  ;;  %v3069_v10 = vpop.f32.mrb[236].mxu0  ;;  %v3882_v17 = vpop.xlane.xlu0 %3881  ;;  %v576_v63 = vunpack.c.l.bf16 %v5201_v62  ;;  %v3036_v11 = vadd.f32 %v6986_v58, %v6248_v15  ;;  %v3818_v58 = vmul.f32 %v7126_v42, %v7126_v42 }
 0x411   : > { %4250 = vst [vmem:[%s7042_s24 + $0x50] sm:$0xff] %v4122_v33  ;;  %4251 = vst [vmem:[%s7042_s24 + $0x58] sm:$0xff] %v4123_v39  ;;  %v3070_v29 = vadd.f32 %v3069_v10, %v6157_v4  ;;  %5042 = vrsqrt.f32 %v3882_v17  ;;  %v7148_v45 = vpop.f32.mrb[237].mxu0  ;;  %v3988_v51 = vadd.f32 %v3817_v6, %v3816_v8  ;;  %v577_v6 = vunpack.c.h.bf16 %v5201_v62 }
 0x412   : > { %7846 = vst [vmem:[#allocation68_spill] sm:$0xff] %v7142_v26  ;;  %v3073_v19 = vpop.f32.mrb[238].mxu0  ;;  %v3336_v47 = vpop.f32.mrb[220].mxu1  ;;  %v3819_v41 = vmul.f32 %v7142_v26, %v7142_v26  ;;  %v3820_v62 = vmul.f32 %v7150_v32, %v7150_v32 }
 0x413   : > { %v5039_v43 = vpop.eup %5038  ;;  %v3525_v38 = vadd.f32 %v3461_v5, %v3070_v29  ;;  %v3074_v14 = vadd.f32 %v3073_v19, %v6157_v4  ;;  %v3337_v48 = vadd.f32 %v3336_v47, %v6272_v34  ;;  %v3885_v16 = vpop.xlane.xlu1 %3884  ;;  %3989 = vadd.xlane.f32.xlu0 %v3988_v51  ;;  %v7170_v19 = vadd.f32 %v3036_v11, %v576_v63  ;;  %v5202_v47 = vld [vmem:[%s5590_s11 + $0x180] sm:$0xff] }
 0x414   : > { %v7160_v31 = vpop.f32.mrb[239].mxu0  ;;  %v4124_v33 = vmul.f32 %v5039_v43, %v6402_v61  ;;  %v4125_v39 = vmul.f32 %v5039_v43, %v6413_v53  ;;  %5044 = vrsqrt.f32 %v3885_v16  ;;  %v3338_v8 = vpop.f32.mrb[221].mxu1  ;;  %v3991_v29 = vadd.f32 %v3819_v41, %v3818_v58  ;;  %v5203_v16 = vld [vmem:[%s5590_s11 + $0x188] sm:$0xff] }
 0x415   : > { %3590 = vst.msk [vmem:[%s6174_s30 + $0x1b0] sm:$0xff] %vm3535_vm0, %v3525_v38  ;;  %v3526_v10 = vadd.f32 %v3462_v20, %v3074_v14  ;;  %v7168_v5 = vadd.f32 %v3337_v48, %v575_v60  ;;  %v3339_v17 = vpop.f32.mrb[222].mxu1  ;;  %v578_v26 = vunpack.c.l.bf16 %v5202_v47  ;;  %v3042_v60 = vadd.f32 %v7018_v57, %v6248_v15  ;;  %v3463_v38 = vld [vmem:[%s6153_s26 + $0x1c0] sm:$0xff]  ;;  %v3464_v8 = vld [vmem:[%s6153_s26 + $0x1c8] sm:$0xff] }
 0x416   : > { %v5041_v51 = vpop.eup %5040  ;;  %4252 = vst [vmem:[%s7042_s24 + $0x60] sm:$0xff] %v4124_v33  ;;  %4253 = vst [vmem:[%s7042_s24 + $0x68] sm:$0xff] %v4125_v39  ;;  %v3340_v61 = vadd.f32 %v3339_v17, %v6272_v34  ;;  %v3341_v53 = vpop.f32.mrb[223].mxu1  ;;  %3992 = vadd.xlane.f32.xlu1 %v3991_v29  ;;  %v580_v58 = vunpack.c.l.bf16 %v5203_v16  ;;  %v3046_v33 = vadd.f32 %v7027_v22, %v6248_v15 }
 0x417   : > { %v4126_v20 = vmul.f32 %v5041_v51, %v6409_v1  ;;  %v4127_v63 = vmul.f32 %v5041_v51, %v6421_v37  ;;  %3591 = vst.msk [vmem:[%s6174_s30 + $0x1b8] sm:$0xff] %vm3535_vm0, %v3526_v10  ;;  %v3821_v11 = vmul.f32 %v7168_v5, %v7168_v5  ;;  %v579_v37 = vunpack.c.h.bf16 %v5202_v47 }
 0x418   : > { %v7186_v41 = vadd.f32 %v3340_v61, %v577_v6  ;;  %v3079_v43 = vpop.f32.mrb[240].mxu0  ;;  %v3888_v14 = vpop.xlane.xlu0 %3887  ;;  %v3822_v10 = vmul.f32 %v7170_v19, %v7170_v19  ;;  %v7202_v51 = vadd.f32 %v3042_v60, %v578_v26  ;;  %v581_v26 = vunpack.c.h.bf16 %v5203_v16 }
 0x419   : > { %4254 = vst [vmem:[%s7042_s24 + $0x70] sm:$0xff] %v4126_v20  ;;  %4255 = vst [vmem:[%s7042_s24 + $0x78] sm:$0xff] %v4127_v63  ;;  %v3080_v57 = vadd.f32 %v3079_v43, %v6157_v4  ;;  %5046 = vrsqrt.f32 %v3888_v14  ;;  %v7192_v1 = vpop.f32.mrb[241].mxu0  ;;  %v3994_v48 = vadd.f32 %v3821_v11, %v3820_v62 }
 0x41a   : > { %v3083_v39 = vpop.f32.mrb[242].mxu0  ;;  %v3344_v6 = vpop.f32.mrb[224].mxu1  ;;  %v3823_v17 = vmul.f32 %v7186_v41, %v7186_v41 }
 0x41b   : > { %v5043_v29 = vpop.eup %5042  ;;  %v3527_v47 = vadd.f32 %v3463_v38, %v3080_v57  ;;  %v3084_v61 = vadd.f32 %v3083_v39, %v6157_v4  ;;  %v3345_v53 = vadd.f32 %v3344_v6, %v6272_v34  ;;  %v3891_v22 = vpop.xlane.xlu1 %3890  ;;  %3995 = vadd.xlane.f32.xlu0 %v3994_v48  ;;  %v7214_v39 = vadd.f32 %v3046_v33, %v580_v58  ;;  %v5204_v48 = vld [vmem:[%s5590_s11 + $0x190] sm:$0xff] }
 0x41c   : > { %v7206_v62 = vpop.f32.mrb[243].mxu0  ;;  %v4128_v20 = vmul.f32 %v5043_v29, %v6440_v9  ;;  %v4129_v63 = vmul.f32 %v5043_v29, %v6451_v49  ;;  %5048 = vrsqrt.f32 %v3891_v22  ;;  %v3346_v11 = vpop.f32.mrb[225].mxu1  ;;  %v3997_v14 = vadd.f32 %v3823_v17, %v3822_v10  ;;  %v3465_v17 = vld [vmem:[%s6153_s26 + $0x1d0] sm:$0xff]  ;;  %v5205_v22 = vld [vmem:[%s5590_s11 + $0x198] sm:$0xff] }
 0x41d   : > { %3592 = vst.msk [vmem:[%s6174_s30 + $0x1c0] sm:$0xff] %vm3535_vm0, %v3527_v47  ;;  %v3528_v60 = vadd.f32 %v3464_v8, %v3084_v61  ;;  %v7212_v43 = vadd.f32 %v3345_v53, %v579_v37  ;;  %v3347_v38 = vpop.f32.mrb[226].mxu1  ;;  %v582_v9 = vunpack.c.l.bf16 %v5204_v48  ;;  %v3052_v49 = vadd.f32 %v7060_v30, %v6248_v15  ;;  %v3466_v11 = vld [vmem:[%s6153_s26 + $0x1d8] sm:$0xff] }
 0x41e   : > { %v5045_v57 = vpop.eup %5044  ;;  %4256 = vst [vmem:[%s7042_s24 + $0x80] sm:$0xff] %v4128_v20  ;;  %4257 = vst [vmem:[%s7042_s24 + $0x88] sm:$0xff] %v4129_v63  ;;  %v3348_v16 = vadd.f32 %v3347_v38, %v6272_v34  ;;  %v3349_v8 = vpop.f32.mrb[227].mxu1  ;;  %3998 = vadd.xlane.f32.xlu1 %v3997_v14  ;;  %v3824_v58 = vmul.f32 %v7202_v51, %v7202_v51  ;;  %v583_v47 = vunpack.c.h.bf16 %v5204_v48  ;;  %v584_v20 = vunpack.c.l.bf16 %v5205_v22 }
 0x41f   : > { %v4130_v37 = vmul.f32 %v5045_v57, %v6447_v23  ;;  %v4131_v6 = vmul.f32 %v5045_v57, %v6459_v44  ;;  %3593 = vst.msk [vmem:[%s6174_s30 + $0x1c8] sm:$0xff] %vm3535_vm0, %v3528_v60  ;;  %v3825_v30 = vmul.f32 %v7212_v43, %v7212_v43  ;;  %v7238_v53 = vadd.f32 %v3052_v49, %v582_v9 }
 0x420   : > { %v7230_v33 = vadd.f32 %v3348_v16, %v581_v26  ;;  %v3089_v10 = vpop.f32.mrb[244].mxu0  ;;  %v3894_v29 = vpop.xlane.xlu0 %3893  ;;  %v3826_v60 = vmul.f32 %v7214_v39, %v7214_v39  ;;  %v3056_v57 = vadd.f32 %v7074_v25, %v6248_v15 }
 0x421   : > { %4258 = vst [vmem:[%s7042_s24 + $0x90] sm:$0xff] %v4130_v37  ;;  %4259 = vst [vmem:[%s7042_s24 + $0x98] sm:$0xff] %v4131_v6  ;;  %v3090_v23 = vadd.f32 %v3089_v10, %v6157_v4  ;;  %5050 = vrsqrt.f32 %v3894_v29  ;;  %v7236_v44 = vpop.f32.mrb[245].mxu0  ;;  %v4000_v61 = vadd.f32 %v3825_v30, %v3824_v58  ;;  %v585_v30 = vunpack.c.h.bf16 %v5205_v22 }
 0x422   : > { %v3093_v63 = vpop.f32.mrb[246].mxu0  ;;  %v3352_v26 = vpop.f32.mrb[228].mxu1  ;;  %v3827_v38 = vmul.f32 %v7230_v33, %v7230_v33 }
 0x423   : > { %v5047_v14 = vpop.eup %5046  ;;  %v3529_v48 = vadd.f32 %v3465_v17, %v3090_v23  ;;  %v3094_v9 = vadd.f32 %v3093_v63, %v6157_v4  ;;  %v3353_v49 = vadd.f32 %v3352_v26, %v6272_v34  ;;  %v3897_v16 = vpop.xlane.xlu1 %3896  ;;  %4001 = vadd.xlane.f32.xlu0 %v4000_v61  ;;  %v5206_v63 = vld [vmem:[%s5590_s11 + $0x1a0] sm:$0xff] }
 0x424   : > { %v7250_v8 = vpop.f32.mrb[247].mxu0  ;;  %v4132_v37 = vmul.f32 %v5047_v14, %v6477_v36  ;;  %v4133_v6 = vmul.f32 %v5047_v14, %v6488_v18  ;;  %5052 = vrsqrt.f32 %v3897_v16  ;;  %v3354_v58 = vpop.f32.mrb[229].mxu1  ;;  %v4003_v29 = vadd.f32 %v3827_v38, %v3826_v60  ;;  %v5207_v16 = vld [vmem:[%s5590_s11 + $0x1a8] sm:$0xff] }
 0x425   : > { %3594 = vst.msk [vmem:[%s6174_s30 + $0x1d0] sm:$0xff] %vm3535_vm0, %v3529_v48  ;;  %v3530_v25 = vadd.f32 %v3466_v11, %v3094_v9  ;;  %v7256_v10 = vadd.f32 %v3353_v49, %v583_v47  ;;  %v3355_v17 = vpop.f32.mrb[230].mxu1  ;;  %v586_v61 = vunpack.c.l.bf16 %v5206_v63  ;;  %v3062_v36 = vadd.f32 %v7102_v3, %v6248_v15  ;;  %v3467_v48 = vld [vmem:[%s6153_s26 + $0x1e0] sm:$0xff] }
 0x426   : > { %v5049_v23 = vpop.eup %5048  ;;  %4260 = vst [vmem:[%s7042_s24 + $0xa0] sm:$0xff] %v4132_v37  ;;  %4261 = vst [vmem:[%s7042_s24 + $0xa8] sm:$0xff] %v4133_v6  ;;  %v3356_v18 = vadd.f32 %v3355_v17, %v6272_v34  ;;  %v3357_v22 = vpop.f32.mrb[231].mxu1  ;;  %v3828_v47 = vmul.f32 %v7238_v53, %v7238_v53  ;;  %v7266_v11 = vadd.f32 %v3056_v57, %v584_v20  ;;  %4004 = vadd.xlane.f32.xlu1 %v4003_v29 }
 0x427   : > { %v4134_v26 = vmul.f32 %v5049_v23, %v6484_v56  ;;  %v4135_v60 = vmul.f32 %v5049_v23, %v6496_v12  ;;  %3595 = vst.msk [vmem:[%s6174_s30 + $0x1d8] sm:$0xff] %vm3535_vm0, %v3530_v25  ;;  %v3829_v3 = vmul.f32 %v7256_v10, %v7256_v10  ;;  %v587_v12 = vunpack.c.h.bf16 %v5206_v63 }
 0x428   : > { %v7274_v38 = vadd.f32 %v3356_v18, %v585_v30  ;;  %v3099_v14 = vpop.f32.mrb[248].mxu0  ;;  %v3900_v9 = vpop.xlane.xlu0 %3899  ;;  %v7282_v49 = vadd.f32 %v3062_v36, %v586_v61  ;;  %v588_v37 = vunpack.c.l.bf16 %v5207_v16  ;;  %v3066_v6 = vadd.f32 %v7118_v13, %v6248_v15  ;;  %v3468_v30 = vld [vmem:[%s6153_s26 + $0x1e8] sm:$0xff] }
 0x429   : > { %4262 = vst [vmem:[%s7042_s24 + $0xb0] sm:$0xff] %v4134_v26  ;;  %4263 = vst [vmem:[%s7042_s24 + $0xb8] sm:$0xff] %v4135_v60  ;;  %v3100_v20 = vadd.f32 %v3099_v14, %v6157_v4  ;;  %5054 = vrsqrt.f32 %v3900_v9  ;;  %v7280_v56 = vpop.f32.mrb[249].mxu0  ;;  %v4006_v57 = vadd.f32 %v3829_v3, %v3828_v47  ;;  %v3830_v13 = vmul.f32 %v7266_v11, %v7266_v11 }
 0x42a   : > { %v3103_v58 = vpop.f32.mrb[250].mxu0  ;;  %v3360_v25 = vpop.f32.mrb[232].mxu1  ;;  %v3831_v17 = vmul.f32 %v7274_v38, %v7274_v38  ;;  %v589_v60 = vunpack.c.h.bf16 %v5207_v16  ;;  %v3832_v16 = vmul.f32 %v7282_v49, %v7282_v49 }
 0x42b   : > { %v5051_v29 = vpop.eup %5050  ;;  %v3531_v23 = vadd.f32 %v3467_v48, %v3100_v20  ;;  %v3104_v18 = vadd.f32 %v3103_v58, %v6157_v4  ;;  %v3361_v63 = vadd.f32 %v3360_v25, %v6272_v34  ;;  %v3903_v61 = vpop.xlane.xlu1 %3902  ;;  %4007 = vadd.xlane.f32.xlu0 %v4006_v57  ;;  %v7302_v57 = vadd.f32 %v3066_v6, %v588_v37  ;;  %v5208_v58 = vld [vmem:[%s5590_s11 + $0x1b0] sm:$0xff] }
 0x42c   : > { %v7292_v36 = vpop.f32.mrb[251].mxu0  ;;  %v4136_v22 = vmul.f32 %v5051_v29, %v6513_v46  ;;  %v4137_v47 = vmul.f32 %v5051_v29, %v6524_v24  ;;  %5056 = vrsqrt.f32 %v3903_v61  ;;  %v3362_v26 = vpop.f32.mrb[233].mxu1  ;;  %v4009_v9 = vadd.f32 %v3831_v17, %v3830_v13  ;;  %v5209_v61 = vld [vmem:[%s5590_s11 + $0x1b8] sm:$0xff] }
 0x42d   : > { %3596 = vst.msk [vmem:[%s6174_s30 + $0x1e0] sm:$0xff] %vm3535_vm0, %v3531_v23  ;;  %v3532_v3 = vadd.f32 %v3468_v30, %v3104_v18  ;;  %v7300_v14 = vadd.f32 %v3361_v63, %v587_v12  ;;  %v3363_v48 = vpop.f32.mrb[234].mxu1  ;;  %v590_v25 = vunpack.c.l.bf16 %v5208_v58  ;;  %v3072_v12 = vadd.f32 %v7148_v45, %v6248_v15  ;;  %v3469_v23 = vld [vmem:[%s6153_s26 + $0x1f0] sm:$0xff]  ;;  %v3470_v26 = vld [vmem:[%s6153_s26 + $0x1f8] sm:$0xff] }
 0x42e   : > { %v5053_v20 = vpop.eup %5052  ;;  %4264 = vst [vmem:[%s7042_s24 + $0xc0] sm:$0xff] %v4136_v22  ;;  %4265 = vst [vmem:[%s7042_s24 + $0xc8] sm:$0xff] %v4137_v47  ;;  %v3364_v46 = vadd.f32 %v3363_v48, %v6272_v34  ;;  %v3365_v24 = vpop.f32.mrb[235].mxu1  ;;  %4010 = vadd.xlane.f32.xlu1 %v4009_v9  ;;  %v592_v13 = vunpack.c.l.bf16 %v5209_v61  ;;  %v3076_v22 = vadd.f32 %v7160_v31, %v6248_v15 }
 0x42f   : > { %v4138_v30 = vmul.f32 %v5053_v20, %v6520_v0  ;;  %v4139_v37 = vmul.f32 %v5053_v20, %v6532_v50  ;;  %3597 = vst.msk [vmem:[%s6174_s30 + $0x1e8] sm:$0xff] %vm3535_vm0, %v3532_v3  ;;  %v3833_v6 = vmul.f32 %v7300_v14, %v7300_v14  ;;  %v591_v50 = vunpack.c.h.bf16 %v5208_v58 }
 0x430   : > { %v7318_v17 = vadd.f32 %v3364_v46, %v589_v60  ;;  %v3109_v29 = vpop.f32.mrb[252].mxu0  ;;  %v3906_v18 = vpop.xlane.xlu0 %3905  ;;  %v3834_v3 = vmul.f32 %v7302_v57, %v7302_v57  ;;  %v7334_v20 = vadd.f32 %v3072_v12, %v590_v25  ;;  %v593_v25 = vunpack.c.h.bf16 %v5209_v61 }
 0x431   : > { %4266 = vst [vmem:[%s7042_s24 + $0xd0] sm:$0xff] %v4138_v30  ;;  %4267 = vst [vmem:[%s7042_s24 + $0xd8] sm:$0xff] %v4139_v37  ;;  %v3110_v45 = vadd.f32 %v3109_v29, %v6157_v4  ;;  %5058 = vrsqrt.f32 %v3906_v18  ;;  %v7324_v0 = vpop.f32.mrb[253].mxu0  ;;  %v4012_v63 = vadd.f32 %v3833_v6, %v3832_v16 }
 0x432   : > { %v3113_v47 = vpop.f32.mrb[254].mxu0  ;;  %v3368_v60 = vpop.f32.mrb[236].mxu1  ;;  %v3835_v48 = vmul.f32 %v7318_v17, %v7318_v17 }
 0x433   : > { %v5055_v9 = vpop.eup %5054  ;;  %v3533_v58 = vadd.f32 %v3469_v23, %v3110_v45  ;;  %v3114_v46 = vadd.f32 %v3113_v47, %v6157_v4  ;;  %v3369_v24 = vadd.f32 %v3368_v60, %v6272_v34  ;;  %v3909_v31 = vpop.xlane.xlu1 %3908  ;;  %4013 = vadd.xlane.f32.xlu0 %v4012_v63  ;;  %v7346_v45 = vadd.f32 %v3076_v22, %v592_v13  ;;  %v5210_v63 = vld [vmem:[%s5590_s11 + $0x1c0] sm:$0xff]  ;;  %v7848_v60 = vld [vmem:[#allocation18_spill] sm:$0xff] }
 0x434   : > { %v7338_v16 = vpop.f32.mrb[255].mxu0  ;;  %v4140_v30 = vmul.f32 %v5055_v9, %v6549_v7  ;;  %v4141_v37 = vmul.f32 %v5055_v9, %v6560_v27  ;;  %5060 = vrsqrt.f32 %v3909_v31  ;;  %v3370_v6 = vpop.f32.mrb[237].mxu1  ;;  %v4015_v23 = vadd.f32 %v3835_v48, %v3834_v3  ;;  %v5211_v22 = vld [vmem:[%s5590_s11 + $0x1c8] sm:$0xff] }
 0x435   : > { %3598 = vst.msk [vmem:[%s6174_s30 + $0x1f0] sm:$0xff] %vm3535_vm0, %v3533_v58  ;;  %v3534_v4 = vadd.f32 %v3470_v26, %v3114_v46  ;;  %v7344_v12 = vadd.f32 %v3369_v24, %v591_v50  ;;  %v3371_v29 = vpop.f32.mrb[238].mxu1  ;;  %v594_v7 = vunpack.c.l.bf16 %v5210_v63  ;;  %v3082_v27 = vadd.f32 %v7192_v1, %v6248_v15  ;;  %v7847_v50 = vld [vmem:[#allocation17_spill] sm:$0xff] }
 0x436   : > { %v5057_v18 = vpop.eup %5056  ;;  %4268 = vst [vmem:[%s7042_s24 + $0xe0] sm:$0xff] %v4140_v30  ;;  %4269 = vst [vmem:[%s7042_s24 + $0xe8] sm:$0xff] %v4141_v37  ;;  %v3372_v61 = vadd.f32 %v3371_v29, %v6272_v34  ;;  %v3373_v47 = vpop.f32.mrb[239].mxu1  ;;  %4016 = vadd.xlane.f32.xlu1 %v4015_v23  ;;  %v3836_v13 = vmul.f32 %v7334_v20, %v7334_v20  ;;  %v596_v48 = vunpack.c.l.bf16 %v5211_v22  ;;  %v595_v24 = vunpack.c.h.bf16 %v5210_v63 }
 0x437   : > { %v4142_v26 = vmul.f32 %v5057_v18, %v7847_v50  ;;  %v4143_v3 = vmul.f32 %v5057_v18, %v7848_v60  ;;  %3599 = vst.msk [vmem:[%s6174_s30 + $0x1f8] sm:$0xff] %vm3535_vm0, %v3534_v4  ;;  %v3837_v1 = vmul.f32 %v7344_v12, %v7344_v12  ;;  %v3086_v9 = vadd.f32 %v7206_v62, %v6248_v15 }
 0x438   : > { %v7365_v58 = vadd.f32 %v3372_v61, %v593_v25  ;;  %v3912_v46 = vpop.xlane.xlu0 %3911  ;;  %v7369_v30 = vadd.f32 %v3082_v27, %v594_v7  ;;  %v3838_v4 = vmul.f32 %v7346_v45, %v7346_v45  ;;  %v597_v18 = vunpack.c.h.bf16 %v5211_v22  ;;  %v7849_v7 = vld [vmem:[#allocation19_spill] sm:$0xff]  ;;  %v7850_v61 = vld [vmem:[#allocation21_spill] sm:$0xff] }
 0x439   : > { %4270 = vst [vmem:[%s7042_s24 + $0xf0] sm:$0xff] %v4142_v26  ;;  %4271 = vst [vmem:[%s7042_s24 + $0xf8] sm:$0xff] %v4143_v3  ;;  %5062 = vrsqrt.f32 %v3912_v46  ;;  %v4018_v31 = vadd.f32 %v3837_v1, %v3836_v13  ;;  %v7376_v63 = vadd.f32 %v3086_v9, %v596_v48  ;;  %v5212_v46 = vld [vmem:[%s5590_s11 + $0x1d0] sm:$0xff]  ;;  %v3092_v22 = vadd.f32 %v7236_v44, %v6248_v15  ;;  %v7851_v9 = vld [vmem:[#allocation20_spill] sm:$0xff] }
 0x43a   : > { %v3376_v37 = vpop.f32.mrb[240].mxu1  ;;  %v3915_v6 = vpop.xlane.xlu1 %3914  ;;  %v3839_v29 = vmul.f32 %v7365_v58, %v7365_v58  ;;  %v3840_v48 = vmul.f32 %v7369_v30, %v7369_v30  ;;  %v599_v44 = vunpack.c.h.bf16 %v5212_v46 }
 0x43b   : > { %v5059_v62 = vpop.eup %5058  ;;  %v3377_v25 = vadd.f32 %v3376_v37, %v6272_v34  ;;  %5064 = vrsqrt.f32 %v3915_v6  ;;  %v3378_v23 = vpop.f32.mrb[241].mxu1  ;;  %4019 = vadd.xlane.f32.xlu0 %v4018_v31  ;;  %v598_v37 = vunpack.c.l.bf16 %v5212_v46  ;;  %v7852_v31 = vld [vmem:[#allocation22_spill] sm:$0xff] }
 0x43c   : > { %v4144_v27 = vmul.f32 %v5059_v62, %v7849_v7  ;;  %v4145_v47 = vmul.f32 %v5059_v62, %v7850_v61  ;;  %v3379_v50 = vpop.f32.mrb[242].mxu1  ;;  %v4021_v26 = vadd.f32 %v3839_v29, %v3838_v4  ;;  %v5213_v62 = vld [vmem:[%s5590_s11 + $0x1d8] sm:$0xff]  ;;  %v3842_v7 = vmul.f32 %v7376_v63, %v7376_v63 }
 0x43d   : > { %v7380_v60 = vadd.f32 %v3377_v25, %v595_v24  ;;  %v3380_v3 = vadd.f32 %v3379_v50, %v6272_v34  ;;  %v3381_v13 = vpop.f32.mrb[243].mxu1  ;;  %v600_v25 = vunpack.c.l.bf16 %v5213_v62 }
 0x43e   : > { %v5061_v1 = vpop.eup %5060  ;;  %4272 = vst [vmem:[%s7042_s24 + $0x100] sm:$0xff] %v4144_v27  ;;  %4273 = vst [vmem:[%s7042_s24 + $0x108] sm:$0xff] %v4145_v47  ;;  %4022 = vadd.xlane.f32.xlu1 %v4021_v26  ;;  %v3096_v27 = vadd.f32 %v7250_v8, %v6248_v15  ;;  %v601_v26 = vunpack.c.h.bf16 %v5213_v62  ;;  %v7405_v13 = vadd.f32 %v3092_v22, %v598_v37 }
 0x43f   : > { %v4146_v24 = vmul.f32 %v5061_v1, %v7851_v9  ;;  %v4147_v6 = vmul.f32 %v5061_v1, %v7852_v31  ;;  %v7392_v4 = vadd.f32 %v3380_v3, %v597_v18  ;;  %v3841_v29 = vmul.f32 %v7380_v60, %v7380_v60  ;;  %v7853_v9 = vld [vmem:[#allocation23_spill] sm:$0xff] }
 0x440   : > { %v3918_v23 = vpop.xlane.xlu0 %3917  ;;  %v7410_v62 = vadd.f32 %v3096_v27, %v600_v25  ;;  %v3102_v25 = vadd.f32 %v7280_v56, %v6248_v15 }
 0x441   : > { %4274 = vst [vmem:[%s7042_s24 + $0x110] sm:$0xff] %v4146_v24  ;;  %4275 = vst [vmem:[%s7042_s24 + $0x118] sm:$0xff] %v4147_v6  ;;  %5066 = vrsqrt.f32 %v3918_v23  ;;  %v4024_v61 = vadd.f32 %v3841_v29, %v3840_v48  ;;  %v3843_v18 = vmul.f32 %v7392_v4, %v7392_v4  ;;  %v7854_v24 = vld [vmem:[#allocation25_spill] sm:$0xff] }
 0x442   : > { %v3384_v47 = vpop.f32.mrb[244].mxu1  ;;  %v3921_v50 = vpop.xlane.xlu1 %3920  ;;  %7855 = vst [vmem:[#allocation17_spill] sm:$0xff] %v7410_v62  ;;  %v3846_v56 = vmul.f32 %v7410_v62, %v7410_v62 }
 0x443   : > { %v5063_v3 = vpop.eup %5062  ;;  %v3385_v1 = vadd.f32 %v3384_v47, %v6272_v34  ;;  %5068 = vrsqrt.f32 %v3921_v50  ;;  %v3386_v8 = vpop.f32.mrb[245].mxu1  ;;  %4025 = vadd.xlane.f32.xlu0 %v4024_v61  ;;  %v4027_v46 = vadd.f32 %v3843_v18, %v3842_v7  ;;  %v5214_v47 = vld [vmem:[%s5590_s11 + $0x1e0] sm:$0xff]  ;;  %v7856_v7 = vld [vmem:[#allocation24_spill] sm:$0xff]  ;;  %v7857_v50 = vld [vmem:[#allocation26_spill] sm:$0xff] }
 0x444   : > { %v4148_v48 = vmul.f32 %v5063_v3, %v7853_v9  ;;  %v4149_v31 = vmul.f32 %v5063_v3, %v7854_v24  ;;  %v3387_v6 = vpop.f32.mrb[246].mxu1  ;;  %v602_v61 = vunpack.c.l.bf16 %v5214_v47  ;;  %v5215_v8 = vld [vmem:[%s5590_s11 + $0x1e8] sm:$0xff]  ;;  %v3106_v9 = vadd.f32 %v7292_v36, %v6248_v15 }
 0x445   : > { %v5065_v29 = vpop.eup %5064  ;;  %v7412_v23 = vadd.f32 %v3385_v1, %v599_v44  ;;  %v3388_v37 = vadd.f32 %v3387_v6, %v6272_v34  ;;  %v3389_v22 = vpop.f32.mrb[247].mxu1  ;;  %4028 = vadd.xlane.f32.xlu1 %v4027_v46  ;;  %v3844_v44 = vmul.f32 %v7405_v13, %v7405_v13  ;;  %v604_v46 = vunpack.c.l.bf16 %v5215_v8 }
 0x446   : > { %4276 = vst [vmem:[%s7042_s24 + $0x120] sm:$0xff] %v4148_v48  ;;  %4277 = vst [vmem:[%s7042_s24 + $0x128] sm:$0xff] %v4149_v31  ;;  %v4150_v18 = vmul.f32 %v5065_v29, %v7856_v7  ;;  %v4151_v3 = vmul.f32 %v5065_v29, %v7857_v50  ;;  %v603_v24 = vunpack.c.h.bf16 %v5214_v47  ;;  %v7437_v7 = vadd.f32 %v3102_v25, %v602_v61 }
 0x447   : > { %v7422_v27 = vadd.f32 %v3388_v37, %v601_v26  ;;  %v3845_v1 = vmul.f32 %v7412_v23, %v7412_v23  ;;  %v605_v37 = vunpack.c.h.bf16 %v5215_v8  ;;  %v7440_v50 = vadd.f32 %v3106_v9, %v604_v46  ;;  %v7861_v46 = vld [vmem:[#allocation28_spill] sm:$0xff] }
 0x448   : > { %4278 = vst [vmem:[%s7042_s24 + $0x130] sm:$0xff] %v4150_v18  ;;  %4279 = vst [vmem:[%s7042_s24 + $0x138] sm:$0xff] %v4151_v3  ;;  %v3924_v48 = vpop.xlane.xlu0 %3923  ;;  %v7859_v3 = vld [vmem:[#allocation27_spill] sm:$0xff] }
 0x449   : > { %7858 = vst [vmem:[#allocation18_spill] sm:$0xff] %v7422_v27  ;;  %5070 = vrsqrt.f32 %v3924_v48  ;;  %v4030_v31 = vadd.f32 %v3845_v1, %v3844_v44  ;;  %v3847_v26 = vmul.f32 %v7422_v27, %v7422_v27  ;;  %v7860_v1 = vld [vmem:[#allocation29_spill] sm:$0xff] }
 0x44a   : > { %v3392_v6 = vpop.f32.mrb[248].mxu1  ;;  %v3927_v29 = vpop.xlane.xlu1 %3926 }
 0x44b   : > { %v5067_v22 = vpop.eup %5066  ;;  %v3393_v36 = vadd.f32 %v3392_v6, %v6272_v34  ;;  %5072 = vrsqrt.f32 %v3927_v29  ;;  %v3394_v47 = vpop.f32.mrb[249].mxu1  ;;  %4031 = vadd.xlane.f32.xlu0 %v4030_v31  ;;  %v4033_v18 = vadd.f32 %v3847_v26, %v3846_v56  ;;  %v5216_v6 = vld [vmem:[%s5590_s11 + $0x1f0] sm:$0xff]  ;;  %v7862_v56 = vld [vmem:[#allocation30_spill] sm:$0xff]  ;;  %v3112_v29 = vadd.f32 %v7324_v0, %v6248_v15 }
 0x44c   : > { %v4152_v44 = vmul.f32 %v5067_v22, %v7859_v3  ;;  %v4153_v48 = vmul.f32 %v5067_v22, %v7860_v1  ;;  %v3395_v27 = vpop.f32.mrb[250].mxu1  ;;  %v606_v31 = vunpack.c.l.bf16 %v5216_v6  ;;  %v607_v3 = vunpack.c.h.bf16 %v5216_v6 }
 0x44d   : > { %v5069_v8 = vpop.eup %5068  ;;  %v7444_v62 = vadd.f32 %v3393_v36, %v603_v24  ;;  %v3396_v61 = vadd.f32 %v3395_v27, %v6272_v34  ;;  %v3397_v25 = vpop.f32.mrb[251].mxu1  ;;  %4034 = vadd.xlane.f32.xlu1 %v4033_v18  ;;  %v3848_v24 = vmul.f32 %v7437_v7, %v7437_v7  ;;  %v5217_v36 = vld [vmem:[%s5590_s11 + $0x1f8] sm:$0xff]  ;;  %v3116_v0 = vadd.f32 %v7338_v16, %v6248_v15  ;;  %v7864_v15 = vld [vmem:[#allocation31_spill] sm:$0xff]  ;;  %s4392_s11 = sshll.u32 %s7042_s24, 4  ;;  %s7656_s11 = int_to_ptr.vmem [resolvable:$true] %s4392_s11 }
 0x44e   : > { %4280 = vst [vmem:[%s7042_s24 + $0x140] sm:$0xff] %v4152_v44  ;;  %4281 = vst [vmem:[%s7042_s24 + $0x148] sm:$0xff] %v4153_v48  ;;  %v4154_v9 = vmul.f32 %v5069_v8, %v7861_v46  ;;  %v4155_v26 = vmul.f32 %v5069_v8, %v7862_v56  ;;  %v608_v47 = vunpack.c.l.bf16 %v5217_v36  ;;  %v3850_v44 = vmul.f32 %v7440_v50, %v7440_v50  ;;  %s5302_s22 = scalar_lea.vmem %s7656_s11, 16384  ;;  %p5309_p13 = scmp.lt.s32.totalorder %s7656_s11, %s5307_s27 }
 0x44f   : > { %v7454_v22 = vadd.f32 %v3396_v61, %v605_v37  ;;  %v3849_v27 = vmul.f32 %v7444_v62, %v7444_v62  ;;  %v609_v61 = vunpack.c.h.bf16 %v5217_v36  ;;  %v7469_v46 = vadd.f32 %v3112_v29, %v606_v31  ;;  %p5303_p4 = scmp.ne.s32.totalorder %s7656_s11, %s5302_s22  ;;  %p5310_p1 = scmp.lt.s32.totalorder %s5308_s29, %s5302_s22 }
 0x450   : > { %4282 = vst [vmem:[%s7042_s24 + $0x150] sm:$0xff] %v4154_v9  ;;  %4283 = vst [vmem:[%s7042_s24 + $0x158] sm:$0xff] %v4155_v26  ;;  %v3930_v18 = vpop.xlane.xlu0 %3929  ;;  %v7865_v26 = vld [vmem:[#allocation33_spill] sm:$0xff]  ;;  %v7474_v36 = vadd.f32 %v3116_v0, %v608_v47 }
 0x451   : > { %7863 = vst [vmem:[#allocation19_spill] sm:$0xff] %v7454_v22  ;;  %5074 = vrsqrt.f32 %v3930_v18  ;;  %v4036_v37 = vadd.f32 %v3849_v27, %v3848_v24  ;;  %v3851_v1 = vmul.f32 %v7454_v22, %v7454_v22  ;;  %p5304_p8 = pnand %p5303_p4, %p7905_p7  ;;  %p5311_p6 = por %p5310_p1, %p5309_p13 }
 0x452   : > { %v3400_v48 = vpop.f32.mrb[252].mxu1  ;;  %v3933_v8 = vpop.xlane.xlu1 %3932  ;;  %v3854_v0 = vmul.f32 %v7474_v36, %v7474_v36 }
 0x453   : > { %v5071_v25 = vpop.eup %5070  ;;  %v3401_v6 = vadd.f32 %v3400_v48, %v6272_v34  ;;  %5076 = vrsqrt.f32 %v3933_v8  ;;  %v3402_v9 = vpop.f32.mrb[253].mxu1  ;;  %4037 = vadd.xlane.f32.xlu0 %v4036_v37  ;;  %v4039_v56 = vadd.f32 %v3851_v1, %v3850_v44  ;;  %v7866_v37 = vld [vmem:[#allocation32_spill] sm:$0xff]  ;;  %v7867_v1 = vld [vmem:[#allocation34_spill] sm:$0xff]  ;;  %p5305_p11 = pneg %p5304_p8 }
 0x454   : > { %v4156_v16 = vmul.f32 %v5071_v25, %v7864_v15  ;;  %v4157_v24 = vmul.f32 %v5071_v25, %v7865_v26  ;;  %v3403_v27 = vpop.f32.mrb[254].mxu1  ;;  %v3852_v25 = vmul.f32 %v7469_v46, %v7469_v46  ;;  %v7868_v15 = vld [vmem:[#allocation35_spill] sm:$0xff]  ;;  %v7869_v26 = vld [vmem:[#allocation37_spill] sm:$0xff] }
 0x455   : > { %v5073_v18 = vpop.eup %5072  ;;  %v7476_v22 = vadd.f32 %v3401_v6, %v607_v3  ;;  %v3404_v31 = vadd.f32 %v3403_v27, %v6272_v34  ;;  %v3405_v29 = vpop.f32.mrb[255].mxu1  ;;  %4040 = vadd.xlane.f32.xlu1 %v4039_v56  ;;  %p5312_p9 = pnand %p5311_p6, %p5305_p11 }
 0x456   : > { %4284 = vst [vmem:[%s7042_s24 + $0x160] sm:$0xff] %v4156_v16  ;;  %4285 = vst [vmem:[%s7042_s24 + $0x168] sm:$0xff] %v4157_v24  ;;  %v4158_v44 = vmul.f32 %v5073_v18, %v7866_v37  ;;  %v4159_v48 = vmul.f32 %v5073_v18, %v7867_v1  ;;  %v7870_v18 = vld [vmem:[#allocation36_spill] sm:$0xff]  ;;  %v7871_v29 = vld [vmem:[#allocation38_spill] sm:$0xff] }
 0x457   : > { %v7483_v8 = vadd.f32 %v3404_v31, %v609_v61  ;;  %v3853_v47 = vmul.f32 %v7476_v22, %v7476_v22 }
 0x458   : > { %4286 = vst [vmem:[%s7042_s24 + $0x170] sm:$0xff] %v4158_v44  ;;  %4287 = vst [vmem:[%s7042_s24 + $0x178] sm:$0xff] %v4159_v48  ;;  %v3936_v34 = vpop.xlane.xlu0 %3935 }
 0x459   : > { %5078 = vrsqrt.f32 %v3936_v34  ;;  %v4042_v3 = vadd.f32 %v3853_v47, %v3852_v25  ;;  %v3855_v61 = vmul.f32 %v7483_v8, %v7483_v8  ;;  %v7872_v25 = vld [vmem:[#allocation39_spill] sm:$0xff]  ;;  %v7873_v34 = vld [vmem:[#allocation41_spill] sm:$0xff] }
 0x45a   : > { %v3939_v6 = vpop.xlane.xlu1 %3938 }
 0x45b   : > { %v5075_v9 = vpop.eup %5074  ;;  %5080 = vrsqrt.f32 %v3939_v6  ;;  %4043 = vadd.xlane.f32.xlu0 %v4042_v3  ;;  %v4045_v56 = vadd.f32 %v3855_v61, %v3854_v0  ;;  %v7874_v61 = vld [vmem:[#allocation40_spill] sm:$0xff] }
 0x45c   : > { %v4160_v16 = vmul.f32 %v5075_v9, %v7868_v15  ;;  %v4161_v24 = vmul.f32 %v5075_v9, %v7869_v26  ;;  %v7875_v9 = vld [vmem:[#allocation42_spill] sm:$0xff] }
 0x45d   : > { %v5077_v27 = vpop.eup %5076  ;;  %4046 = vadd.xlane.f32.xlu1 %v4045_v56 }
 0x45e   : > { %4288 = vst [vmem:[%s7042_s24 + $0x180] sm:$0xff] %v4160_v16  ;;  %4289 = vst [vmem:[%s7042_s24 + $0x188] sm:$0xff] %v4161_v24  ;;  %v4162_v31 = vmul.f32 %v5077_v27, %v7870_v18  ;;  %v4163_v37 = vmul.f32 %v5077_v27, %v7871_v29  ;;  %v7876_v24 = vld [vmem:[#allocation43_spill] sm:$0xff]  ;;  %v7877_v18 = vld [vmem:[#allocation45_spill] sm:$0xff] }
 0x460   : > { %4290 = vst [vmem:[%s7042_s24 + $0x190] sm:$0xff] %v4162_v31  ;;  %4291 = vst [vmem:[%s7042_s24 + $0x198] sm:$0xff] %v4163_v37  ;;  %v3942_v44 = vpop.xlane.xlu0 %3941  ;;  %v7878_v37 = vld [vmem:[#allocation44_spill] sm:$0xff] }
 0x461   : > { %5082 = vrsqrt.f32 %v3942_v44 }
 0x462   : > { %v3945_v1 = vpop.xlane.xlu1 %3944 }
 0x463   : > { %v5079_v48 = vpop.eup %5078  ;;  %5084 = vrsqrt.f32 %v3945_v1  ;;  %v7879_v1 = vld [vmem:[#allocation46_spill] sm:$0xff] }
 0x464   : > { %v4164_v47 = vmul.f32 %v5079_v48, %v7872_v25  ;;  %v4165_v3 = vmul.f32 %v5079_v48, %v7873_v34 }
 0x465   : > { %v5081_v0 = vpop.eup %5080 }
 0x466   : > { %4292 = vst [vmem:[%s7042_s24 + $0x1a0] sm:$0xff] %v4164_v47  ;;  %4293 = vst [vmem:[%s7042_s24 + $0x1a8] sm:$0xff] %v4165_v3  ;;  %v4166_v6 = vmul.f32 %v5081_v0, %v7874_v61  ;;  %v4167_v56 = vmul.f32 %v5081_v0, %v7875_v9  ;;  %v7880_v3 = vld [vmem:[#allocation47_spill] sm:$0xff]  ;;  %v7881_v61 = vld [vmem:[#allocation49_spill] sm:$0xff] }
 0x468   : > { %4294 = vst [vmem:[%s7042_s24 + $0x1b0] sm:$0xff] %v4166_v6  ;;  %4295 = vst [vmem:[%s7042_s24 + $0x1b8] sm:$0xff] %v4167_v56  ;;  %v3948_v15 = vpop.xlane.xlu0 %3947  ;;  %v7882_v56 = vld [vmem:[#allocation48_spill] sm:$0xff] }
 0x469   : > { %5086 = vrsqrt.f32 %v3948_v15 }
 0x46a   : > { %v3951_v16 = vpop.xlane.xlu1 %3950 }
 0x46b   : > { %v5083_v26 = vpop.eup %5082  ;;  %5088 = vrsqrt.f32 %v3951_v16  ;;  %v7883_v16 = vld [vmem:[#allocation50_spill] sm:$0xff] }
 0x46c   : > { %v4168_v27 = vmul.f32 %v5083_v26, %v7876_v24  ;;  %v4169_v31 = vmul.f32 %v5083_v26, %v7877_v18 }
 0x46d   : > { %v5085_v29 = vpop.eup %5084 }
 0x46e   : > { %4296 = vst [vmem:[%s7042_s24 + $0x1c0] sm:$0xff] %v4168_v27  ;;  %4297 = vst [vmem:[%s7042_s24 + $0x1c8] sm:$0xff] %v4169_v31  ;;  %v4170_v44 = vmul.f32 %v5085_v29, %v7878_v37  ;;  %v4171_v48 = vmul.f32 %v5085_v29, %v7879_v1  ;;  %v7884_v31 = vld [vmem:[#allocation51_spill] sm:$0xff]  ;;  %v7885_v37 = vld [vmem:[#allocation53_spill] sm:$0xff] }
 0x470   : > { %4298 = vst [vmem:[%s7042_s24 + $0x1d0] sm:$0xff] %v4170_v44  ;;  %4299 = vst [vmem:[%s7042_s24 + $0x1d8] sm:$0xff] %v4171_v48  ;;  %v3954_v25 = vpop.xlane.xlu0 %3953  ;;  %v7886_v48 = vld [vmem:[#allocation52_spill] sm:$0xff] }
 0x471   : > { %5090 = vrsqrt.f32 %v3954_v25 }
 0x472   : > { %v3957_v47 = vpop.xlane.xlu1 %3956 }
 0x473   : > { %v5087_v34 = vpop.eup %5086  ;;  %5092 = vrsqrt.f32 %v3957_v47  ;;  %v7887_v47 = vld [vmem:[#allocation54_spill] sm:$0xff] }
 0x474   : > { %v4172_v0 = vmul.f32 %v5087_v34, %v7880_v3  ;;  %v4173_v6 = vmul.f32 %v5087_v34, %v7881_v61 }
 0x475   : > { %v5089_v9 = vpop.eup %5088 }
 0x476   : > { %4300 = vst [vmem:[%s7042_s24 + $0x1e0] sm:$0xff] %v4172_v0  ;;  %4301 = vst [vmem:[%s7042_s24 + $0x1e8] sm:$0xff] %v4173_v6  ;;  %v4174_v15 = vmul.f32 %v5089_v9, %v7882_v56  ;;  %v4175_v26 = vmul.f32 %v5089_v9, %v7883_v16  ;;  %v7888_v6 = vld [vmem:[#allocation55_spill] sm:$0xff]  ;;  %v7889_v56 = vld [vmem:[#allocation57_spill] sm:$0xff] }
 0x478   : > { %4302 = vst [vmem:[%s7042_s24 + $0x1f0] sm:$0xff] %v4174_v15  ;;  %4303 = vst [vmem:[%s7042_s24 + $0x1f8] sm:$0xff] %v4175_v26  ;;  %v3960_v24 = vpop.xlane.xlu0 %3959  ;;  %v7890_v26 = vld [vmem:[#allocation56_spill] sm:$0xff] }
 0x479   : > { %5094 = vrsqrt.f32 %v3960_v24 }
 0x47a   : > { %v3963_v27 = vpop.xlane.xlu1 %3962 }
 0x47b   : > { %v5091_v18 = vpop.eup %5090  ;;  %5096 = vrsqrt.f32 %v3963_v27  ;;  %v7891_v27 = vld [vmem:[#allocation58_spill] sm:$0xff] }
 0x47c   : > { %v4176_v29 = vmul.f32 %v5091_v18, %v7884_v31  ;;  %v4177_v44 = vmul.f32 %v5091_v18, %v7885_v37 }
 0x47d   : > { %v5093_v1 = vpop.eup %5092 }
 0x47e   : > { %4304 = vst [vmem:[%s7042_s24 + $0x200] sm:$0xff] %v4176_v29  ;;  %4305 = vst [vmem:[%s7042_s24 + $0x208] sm:$0xff] %v4177_v44  ;;  %v4178_v25 = vmul.f32 %v5093_v1, %v7886_v48  ;;  %v4179_v34 = vmul.f32 %v5093_v1, %v7887_v47  ;;  %v7892_v44 = vld [vmem:[#allocation59_spill] sm:$0xff]  ;;  %v7893_v48 = vld [vmem:[#allocation61_spill] sm:$0xff] }
 0x480   : > { %4306 = vst [vmem:[%s7042_s24 + $0x210] sm:$0xff] %v4178_v25  ;;  %4307 = vst [vmem:[%s7042_s24 + $0x218] sm:$0xff] %v4179_v34  ;;  %v3966_v3 = vpop.xlane.xlu0 %3965  ;;  %v7894_v34 = vld [vmem:[#allocation60_spill] sm:$0xff] }
 0x481   : > { %5098 = vrsqrt.f32 %v3966_v3 }
 0x482   : > { %v3969_v0 = vpop.xlane.xlu1 %3968 }
 0x483   : > { %v5095_v61 = vpop.eup %5094  ;;  %5100 = vrsqrt.f32 %v3969_v0  ;;  %v7895_v0 = vld [vmem:[#allocation62_spill] sm:$0xff] }
 0x484   : > { %v4180_v9 = vmul.f32 %v5095_v61, %v7888_v6  ;;  %v4181_v15 = vmul.f32 %v5095_v61, %v7889_v56 }
 0x485   : > { %v5097_v16 = vpop.eup %5096 }
 0x486   : > { %4308 = vst [vmem:[%s7042_s24 + $0x220] sm:$0xff] %v4180_v9  ;;  %4309 = vst [vmem:[%s7042_s24 + $0x228] sm:$0xff] %v4181_v15  ;;  %v4182_v24 = vmul.f32 %v5097_v16, %v7890_v26  ;;  %v4183_v18 = vmul.f32 %v5097_v16, %v7891_v27  ;;  %v7896_v15 = vld [vmem:[#allocation63_spill] sm:$0xff]  ;;  %v7897_v26 = vld [vmem:[#allocation65_spill] sm:$0xff] }
 0x488   : > { %4310 = vst [vmem:[%s7042_s24 + $0x230] sm:$0xff] %v4182_v24  ;;  %4311 = vst [vmem:[%s7042_s24 + $0x238] sm:$0xff] %v4183_v18  ;;  %v3972_v31 = vpop.xlane.xlu0 %3971  ;;  %v7898_v18 = vld [vmem:[#allocation64_spill] sm:$0xff] }
 0x489   : > { %5102 = vrsqrt.f32 %v3972_v31 }
 0x48a   : > { %v3975_v29 = vpop.xlane.xlu1 %3974 }
 0x48b   : > { %v5099_v37 = vpop.eup %5098  ;;  %5104 = vrsqrt.f32 %v3975_v29  ;;  %v7899_v29 = vld [vmem:[#allocation66_spill] sm:$0xff] }
 0x48c   : > { %v4184_v1 = vmul.f32 %v5099_v37, %v7892_v44  ;;  %v4185_v25 = vmul.f32 %v5099_v37, %v7893_v48 }
 0x48d   : > { %v5101_v47 = vpop.eup %5100 }
 0x48e   : > { %4312 = vst [vmem:[%s7042_s24 + $0x240] sm:$0xff] %v4184_v1  ;;  %4313 = vst [vmem:[%s7042_s24 + $0x248] sm:$0xff] %v4185_v25  ;;  %v4186_v3 = vmul.f32 %v5101_v47, %v7894_v34  ;;  %v4187_v61 = vmul.f32 %v5101_v47, %v7895_v0 }
 0x490   : > { %4314 = vst [vmem:[%s7042_s24 + $0x250] sm:$0xff] %v4186_v3  ;;  %4315 = vst [vmem:[%s7042_s24 + $0x258] sm:$0xff] %v4187_v61  ;;  %v3978_v6 = vpop.xlane.xlu0 %3977 }
 0x491   : > { %5106 = vrsqrt.f32 %v3978_v6 }
 0x493   : > { %v3981_v9 = vpop.xlane.xlu1 %3980  ;;  %v5103_v56 = vpop.eup %5102 }
 0x494   : > { %5108 = vrsqrt.f32 %v3981_v9  ;;  %v4188_v16 = vmul.f32 %v5103_v56, %v7896_v15  ;;  %v4189_v24 = vmul.f32 %v5103_v56, %v7897_v26  ;;  %v7900_v56 = vld [vmem:[#allocation67_spill] sm:$0xff] }
 0x495   : > { %v5105_v27 = vpop.eup %5104 }
 0x496   : > { %4316 = vst [vmem:[%s7042_s24 + $0x260] sm:$0xff] %v4188_v16  ;;  %4317 = vst [vmem:[%s7042_s24 + $0x268] sm:$0xff] %v4189_v24  ;;  %v4190_v31 = vmul.f32 %v5105_v27, %v7898_v18  ;;  %v4191_v37 = vmul.f32 %v5105_v27, %v7899_v29  ;;  %v7901_v18 = vld [vmem:[#allocation68_spill] sm:$0xff] }
 0x498   : > { %4318 = vst [vmem:[%s7042_s24 + $0x270] sm:$0xff] %v4190_v31  ;;  %4319 = vst [vmem:[%s7042_s24 + $0x278] sm:$0xff] %v4191_v37  ;;  %v3984_v44 = vpop.xlane.xlu0 %3983 }
 0x499   : > { %5110 = vrsqrt.f32 %v3984_v44 }
 0x49b   : > { %v5107_v1 = vpop.eup %5106  ;;  %v3987_v47 = vpop.xlane.xlu1 %3986 }
 0x49c   : > { %v4192_v48 = vmul.f32 %v5107_v1, %v7022_v59  ;;  %v4193_v25 = vmul.f32 %v5107_v1, %v7035_v28  ;;  %5112 = vrsqrt.f32 %v3987_v47 }
 0x49e   : > { %v5109_v34 = vpop.eup %5108  ;;  %4320 = vst [vmem:[%s7042_s24 + $0x280] sm:$0xff] %v4192_v48  ;;  %4321 = vst [vmem:[%s7042_s24 + $0x288] sm:$0xff] %v4193_v25 }
 0x49f   : > { %v4194_v3 = vmul.f32 %v5109_v34, %v7029_v21  ;;  %v4195_v0 = vmul.f32 %v5109_v34, %v7048_v55 }
 0x4a0   : > { %v3990_v61 = vpop.xlane.xlu0 %3989 }
 0x4a1   : > { %4322 = vst [vmem:[%s7042_s24 + $0x290] sm:$0xff] %v4194_v3  ;;  %4323 = vst [vmem:[%s7042_s24 + $0x298] sm:$0xff] %v4195_v0  ;;  %5114 = vrsqrt.f32 %v3990_v61 }
 0x4a3   : > { %v5111_v59 = vpop.eup %5110  ;;  %v3993_v9 = vpop.xlane.xlu1 %3992 }
 0x4a4   : > { %v4196_v28 = vmul.f32 %v5111_v59, %v7064_v35  ;;  %v4197_v6 = vmul.f32 %v5111_v59, %v7080_v40  ;;  %5116 = vrsqrt.f32 %v3993_v9 }
 0x4a6   : > { %4324 = vst [vmem:[%s7042_s24 + $0x2a0] sm:$0xff] %v4196_v28  ;;  %4325 = vst [vmem:[%s7042_s24 + $0x2a8] sm:$0xff] %v4197_v6  ;;  %v5113_v21 = vpop.eup %5112 }
 0x4a7   : > { %v4198_v55 = vmul.f32 %v5113_v21, %v7082_v2  ;;  %v4199_v15 = vmul.f32 %v5113_v21, %v7900_v56 }
 0x4a8   : > { %v3996_v16 = vpop.xlane.xlu0 %3995 }
 0x4a9   : > { %5118 = vrsqrt.f32 %v3996_v16  ;;  %4326 = vst [vmem:[%s7042_s24 + $0x2b0] sm:$0xff] %v4198_v55  ;;  %4327 = vst [vmem:[%s7042_s24 + $0x2b8] sm:$0xff] %v4199_v15 }
 0x4ab   : > { %v5115_v35 = vpop.eup %5114  ;;  %v3999_v24 = vpop.xlane.xlu1 %3998 }
 0x4ac   : > { %v4200_v40 = vmul.f32 %v5115_v35, %v7114_v54  ;;  %v4201_v26 = vmul.f32 %v5115_v35, %v7124_v52  ;;  %5120 = vrsqrt.f32 %v3999_v24 }
 0x4ae   : > { %4328 = vst [vmem:[%s7042_s24 + $0x2c0] sm:$0xff] %v4200_v40  ;;  %4329 = vst [vmem:[%s7042_s24 + $0x2c8] sm:$0xff] %v4201_v26  ;;  %v5117_v2 = vpop.eup %5116 }
 0x4af   : > { %v4202_v27 = vmul.f32 %v5117_v2, %v7126_v42  ;;  %v4203_v31 = vmul.f32 %v5117_v2, %v7901_v18 }
 0x4b0   : > { %v4002_v29 = vpop.xlane.xlu0 %4001 }
 0x4b1   : > { %5122 = vrsqrt.f32 %v4002_v29  ;;  %4330 = vst [vmem:[%s7042_s24 + $0x2d0] sm:$0xff] %v4202_v27  ;;  %4331 = vst [vmem:[%s7042_s24 + $0x2d8] sm:$0xff] %v4203_v31 }
 0x4b3   : > { %v5119_v54 = vpop.eup %5118  ;;  %v4005_v44 = vpop.xlane.xlu1 %4004 }
 0x4b4   : > { %v4204_v52 = vmul.f32 %v5119_v54, %v7150_v32  ;;  %v4205_v37 = vmul.f32 %v5119_v54, %v7168_v5  ;;  %5124 = vrsqrt.f32 %v4005_v44 }
 0x4b6   : > { %4332 = vst [vmem:[%s7042_s24 + $0x2e0] sm:$0xff] %v4204_v52  ;;  %4333 = vst [vmem:[%s7042_s24 + $0x2e8] sm:$0xff] %v4205_v37  ;;  %v5121_v42 = vpop.eup %5120 }
 0x4b7   : > { %v4206_v1 = vmul.f32 %v5121_v42, %v7170_v19  ;;  %v4207_v48 = vmul.f32 %v5121_v42, %v7186_v41 }
 0x4b8   : > { %v4008_v25 = vpop.xlane.xlu0 %4007 }
 0x4b9   : > { %5126 = vrsqrt.f32 %v4008_v25  ;;  %4334 = vst [vmem:[%s7042_s24 + $0x2f0] sm:$0xff] %v4206_v1  ;;  %4335 = vst [vmem:[%s7042_s24 + $0x2f8] sm:$0xff] %v4207_v48  ;;  %v7904_v25 = vld [vmem:[#allocation19_spill] sm:$0xff] }
 0x4bb   : > { %v5123_v32 = vpop.eup %5122  ;;  %v4011_v34 = vpop.xlane.xlu1 %4010 }
 0x4bc   : > { %v4208_v5 = vmul.f32 %v5123_v32, %v7202_v51  ;;  %v4209_v47 = vmul.f32 %v5123_v32, %v7212_v43  ;;  %5128 = vrsqrt.f32 %v4011_v34 }
 0x4be   : > { %4336 = vst [vmem:[%s7042_s24 + $0x300] sm:$0xff] %v4208_v5  ;;  %4337 = vst [vmem:[%s7042_s24 + $0x308] sm:$0xff] %v4209_v47  ;;  %v5125_v19 = vpop.eup %5124 }
 0x4bf   : > { %v4210_v41 = vmul.f32 %v5125_v19, %v7214_v39  ;;  %v4211_v3 = vmul.f32 %v5125_v19, %v7230_v33 }
 0x4c0   : > { %v4014_v0 = vpop.xlane.xlu0 %4013 }
 0x4c1   : > { %5130 = vrsqrt.f32 %v4014_v0  ;;  %4338 = vst [vmem:[%s7042_s24 + $0x310] sm:$0xff] %v4210_v41  ;;  %4339 = vst [vmem:[%s7042_s24 + $0x318] sm:$0xff] %v4211_v3 }
 0x4c3   : > { %v5127_v51 = vpop.eup %5126  ;;  %v4017_v59 = vpop.xlane.xlu1 %4016 }
 0x4c4   : > { %v4212_v43 = vmul.f32 %v5127_v51, %v7238_v53  ;;  %v4213_v61 = vmul.f32 %v5127_v51, %v7256_v10  ;;  %5132 = vrsqrt.f32 %v4017_v59 }
 0x4c6   : > { %4340 = vst [vmem:[%s7042_s24 + $0x320] sm:$0xff] %v4212_v43  ;;  %4341 = vst [vmem:[%s7042_s24 + $0x328] sm:$0xff] %v4213_v61  ;;  %v5129_v39 = vpop.eup %5128 }
 0x4c7   : > { %v4214_v33 = vmul.f32 %v5129_v39, %v7266_v11  ;;  %v4215_v28 = vmul.f32 %v5129_v39, %v7274_v38 }
 0x4c8   : > { %v4020_v6 = vpop.xlane.xlu0 %4019 }
 0x4c9   : > { %5134 = vrsqrt.f32 %v4020_v6  ;;  %4342 = vst [vmem:[%s7042_s24 + $0x330] sm:$0xff] %v4214_v33  ;;  %4343 = vst [vmem:[%s7042_s24 + $0x338] sm:$0xff] %v4215_v28 }
 0x4cb   : > { %v5131_v53 = vpop.eup %5130  ;;  %v4023_v9 = vpop.xlane.xlu1 %4022 }
 0x4cc   : > { %v4216_v10 = vmul.f32 %v5131_v53, %v7282_v49  ;;  %v4217_v21 = vmul.f32 %v5131_v53, %v7300_v14  ;;  %5136 = vrsqrt.f32 %v4023_v9 }
 0x4ce   : > { %4344 = vst [vmem:[%s7042_s24 + $0x340] sm:$0xff] %v4216_v10  ;;  %4345 = vst [vmem:[%s7042_s24 + $0x348] sm:$0xff] %v4217_v21  ;;  %v5133_v11 = vpop.eup %5132 }
 0x4cf   : > { %v4218_v38 = vmul.f32 %v5133_v11, %v7302_v57  ;;  %v4219_v55 = vmul.f32 %v5133_v11, %v7318_v17 }
 0x4d0   : > { %v4026_v56 = vpop.xlane.xlu0 %4025 }
 0x4d1   : > { %5138 = vrsqrt.f32 %v4026_v56  ;;  %4346 = vst [vmem:[%s7042_s24 + $0x350] sm:$0xff] %v4218_v38  ;;  %4347 = vst [vmem:[%s7042_s24 + $0x358] sm:$0xff] %v4219_v55 }
 0x4d2   : > { %v4029_v15 = vpop.xlane.xlu1 %4028 }
 0x4d3   : > { %v5135_v49 = vpop.eup %5134  ;;  %5140 = vrsqrt.f32 %v4029_v15 }
 0x4d4   : > { %v4220_v14 = vmul.f32 %v5135_v49, %v7334_v20  ;;  %v4221_v16 = vmul.f32 %v5135_v49, %v7344_v12 }
 0x4d6   : > { %v5137_v35 = vpop.eup %5136  ;;  %4348 = vst [vmem:[%s7042_s24 + $0x360] sm:$0xff] %v4220_v14  ;;  %4349 = vst [vmem:[%s7042_s24 + $0x368] sm:$0xff] %v4221_v16 }
 0x4d7   : > { %v4222_v57 = vmul.f32 %v5137_v35, %v7346_v45  ;;  %v4223_v17 = vmul.f32 %v5137_v35, %v7365_v58 }
 0x4d8   : > { %v4032_v40 = vpop.xlane.xlu0 %4031 }
 0x4d9   : > { %4350 = vst [vmem:[%s7042_s24 + $0x370] sm:$0xff] %v4222_v57  ;;  %4351 = vst [vmem:[%s7042_s24 + $0x378] sm:$0xff] %v4223_v17  ;;  %5142 = vrsqrt.f32 %v4032_v40 }
 0x4da   : > { %v4035_v26 = vpop.xlane.xlu1 %4034 }
 0x4db   : > { %v5139_v24 = vpop.eup %5138  ;;  %5144 = vrsqrt.f32 %v4035_v26 }
 0x4dc   : > { %v4224_v20 = vmul.f32 %v5139_v24, %v7369_v30  ;;  %v4225_v12 = vmul.f32 %v5139_v24, %v7380_v60 }
 0x4dd   : > { %v5141_v2 = vpop.eup %5140 }
 0x4de   : > { %4352 = vst [vmem:[%s7042_s24 + $0x380] sm:$0xff] %v4224_v20  ;;  %4353 = vst [vmem:[%s7042_s24 + $0x388] sm:$0xff] %v4225_v12  ;;  %v4226_v45 = vmul.f32 %v5141_v2, %v7376_v63  ;;  %v4227_v58 = vmul.f32 %v5141_v2, %v7392_v4  ;;  %v7902_v63 = vld [vmem:[#allocation17_spill] sm:$0xff]  ;;  %v7903_v4 = vld [vmem:[#allocation18_spill] sm:$0xff] }
 0x4e0   : > { %4354 = vst [vmem:[%s7042_s24 + $0x390] sm:$0xff] %v4226_v45  ;;  %4355 = vst [vmem:[%s7042_s24 + $0x398] sm:$0xff] %v4227_v58  ;;  %v4038_v27 = vpop.xlane.xlu0 %4037 }
 0x4e1   : > { %5146 = vrsqrt.f32 %v4038_v27 }
 0x4e2   : > { %v4041_v18 = vpop.xlane.xlu1 %4040 }
 0x4e3   : > { %v5143_v31 = vpop.eup %5142  ;;  %5148 = vrsqrt.f32 %v4041_v18 }
 0x4e4   : > { %v4228_v30 = vmul.f32 %v5143_v31, %v7405_v13  ;;  %v4229_v60 = vmul.f32 %v5143_v31, %v7412_v23 }
 0x4e5   : > { %v5145_v29 = vpop.eup %5144 }
 0x4e6   : > { %4356 = vst [vmem:[%s7042_s24 + $0x3a0] sm:$0xff] %v4228_v30  ;;  %4357 = vst [vmem:[%s7042_s24 + $0x3a8] sm:$0xff] %v4229_v60  ;;  %v4230_v54 = vmul.f32 %v5145_v29, %v7902_v63  ;;  %v4231_v52 = vmul.f32 %v5145_v29, %v7903_v4 }
 0x4e8   : > { %4358 = vst [vmem:[%s7042_s24 + $0x3b0] sm:$0xff] %v4230_v54  ;;  %4359 = vst [vmem:[%s7042_s24 + $0x3b8] sm:$0xff] %v4231_v52  ;;  %v4044_v37 = vpop.xlane.xlu0 %4043 }
 0x4e9   : > { %5150 = vrsqrt.f32 %v4044_v37 }
 0x4ea   : > { %v4047_v13 = vpop.xlane.xlu1 %4046 }
 0x4eb   : > { %v5147_v44 = vpop.eup %5146  ;;  %5152 = vrsqrt.f32 %v4047_v13 }
 0x4ec   : > { %v4232_v23 = vmul.f32 %v5147_v44, %v7437_v7  ;;  %v4233_v42 = vmul.f32 %v5147_v44, %v7444_v62 }
 0x4ed   : > { %v5149_v1 = vpop.eup %5148 }
 0x4ee   : > { %4360 = vst [vmem:[%s7042_s24 + $0x3c0] sm:$0xff] %v4232_v23  ;;  %4361 = vst [vmem:[%s7042_s24 + $0x3c8] sm:$0xff] %v4233_v42  ;;  %v4234_v48 = vmul.f32 %v5149_v1, %v7440_v50  ;;  %v4235_v32 = vmul.f32 %v5149_v1, %v7904_v25 }
 0x4f0   : > { %4362 = vst [vmem:[%s7042_s24 + $0x3d0] sm:$0xff] %v4234_v48  ;;  %4363 = vst [vmem:[%s7042_s24 + $0x3d8] sm:$0xff] %v4235_v32 }
 0x4f3   : > { %v5151_v7 = vpop.eup %5150 }
 0x4f4   : > { %v4236_v62 = vmul.f32 %v5151_v7, %v7469_v46  ;;  %v4237_v5 = vmul.f32 %v5151_v7, %v7476_v22 }
 0x4f5   : > { %v5153_v47 = vpop.eup %5152 }
 0x4f6   : > { %4364 = vst [vmem:[%s7042_s24 + $0x3e0] sm:$0xff] %v4236_v62  ;;  %4365 = vst [vmem:[%s7042_s24 + $0x3e8] sm:$0xff] %v4237_v5  ;;  %v4238_v50 = vmul.f32 %v5153_v47, %v7474_v36  ;;  %v4239_v34 = vmul.f32 %v5153_v47, %v7483_v8 }
 0x4f8   : > { %4366 = vst [vmem:[%s7042_s24 + $0x3f0] sm:$0xff] %v4238_v50  ;;  %4367 = vst [vmem:[%s7042_s24 + $0x3f8] sm:$0xff] %v4239_v34 }
 0x4f9   : > { %5315 = shalt.err (!%p5312_p9)
}
 0x4fa   : > { %s5316_s23 = scalar_lea.hbm %s7654_s17, 16384  ;;  %s5320_s16 = scalar_lea.hbm %s7716_s9, 32768 }
 0x4fb   : > { %p5317_p2 = scmp.ne.s32.totalorder %s7654_s17, %s5316_s23  ;;  %p5321_p5 = scmp.lt.u32.totalorder %s7654_s17, %s7716_s9 }
 0x4fc   : > { %p5322_p10 = scmp.lt.u32.totalorder %s5320_s16, %s5316_s23  ;;  %p5324_p4 = scmp.lt.u32.totalorder %s5316_s23, %s7654_s17 }
 0x4fd   : > { %p5318_p3 = pnand %p5317_p2, %p7905_p7 }
 0x4fe   : > { %p5323_p12 = por %p5322_p10, %p5321_p5 }
 0x4ff   : > { %p5319_p0 = pneg %p5318_p3 }
 0x500   : > { %p5325_p8 = por %p5324_p4, %p5323_p12 }
 0x502   : > { %p5326_p11 = pnand %p5325_p8, %p5319_p0 }
 0x504   : > { %5329 = shalt.err (!%p5326_p11)
}
 0x505   : > { %s5383_s21 = smov 256   ;;  %s5384_s24 = smov 16  }
 0x506   : > { %4737 = dma.vmem_to_hbm [thread:$0]  (%p7905_p7), %s7656_s11, 16384, %s7654_s17, %s7666_s13, %s5383_s21, %s5383_s21, %s5384_s24  }
 0x507 PF: > { %s7906_s28 = sld [smem:[#allocation12_spill]]  ;;  %s7907_s15 = sld [smem:[#allocation16_spill]] }
 0x508   : > { %p4759_p13 = scmp.ge.s32.totalorder %s5372_s12, 2 }
 0x50d   : > { %s4415_s20 = sand.u32 1, %s7906_s28   ;;  %p7908_p1 = scmp.ne.s32.totalorder %s7907_s15, 0 }
 0x50e   : > { %s4416_s22 = scalar_lea.sflag [#allocation4], %s4415_s20 }
 0x50f   : > { %p4750_p6 = pnand %p4759_p13, %p7908_p1 }
 0x511   : > { %5355 = dma.done.wait (!%p4750_p6), %s4416_s22, 16384  }
 0x512   : > { %5357 = vsyncadd (!%p4750_p6), %s4416_s22, 4294950912  ;;  %s7909_s12 = sld [smem:[#allocation14_spill]]  ;;  %s7910_s25 = sld [smem:[#allocation13_spill]] }
 0x513   : > { %s7911_s11 = sld [smem:[#allocation15_spill]]  ;;  %s7912_s30 = smov %s5364_s10 }
 0x518   : > { %p22_p9 = scmp.ge.s32.totalorder %s7909_s12, 4   ;;  %s7913_s10 = smov %s7910_s25 }
 0x51a   :  { %24 = sbr.rel (!%p22_p9) target bundleno = 5 (0x5), region = 115 }
 0x521   :  { %4421 = vsyncpa [#allocation3], 1 }
 0x522   :  { %4423 = vsyncpa [#allocation3 + $0x1], 1 }
 0x523   :  { %4424 = vsyncpa [#allocation6], 1 }
 0x524   :  { %4425 = vsyncpa [#allocation4], 1 }
 0x525   :  { %4427 = vsyncpa [#allocation4 + $0x1], 1 }

</bundles_post_ra>
